<compile_context>
chip_gen: v7x
topology: tpu7x:2x2x1
jax: 0.10.0
libtpu: 0.0.40
codegen_flags: <defaults>
</compile_context>

<pallas_src>
import functools
import math

import jax
import jax.numpy as jnp
from jax.experimental import pallas as pl
from jax.experimental.pallas import tpu as pltpu


def _round_up(x, m):
    return ((x + m - 1) // m) * m


# ---------------------------------------------------------------------------
# In-kernel helpers (operate on VMEM-resident values; all shapes static)
# ---------------------------------------------------------------------------
def _conv1d_relu_rows(h2d, w_packed, b_packed, n_pad):
    """Valid 1D conv + bias + ReLU on a (L*N_pad, C_in) row matrix.

    Rows ordered l-major / n-minor, channels on the lane dim.
    w_packed: (K*C_in, C_out) with row index k*C_in + c.
    b_packed: (1, C_out).
    Returns (L_out*N_pad, C_out), L_out = L - K + 1, same row ordering.
    K accumulated dots (no lane-axis im2col concat); all row-slice offsets are
    multiples of 8 because n_pad % 8 == 0.
    """
    ln, c_in = h2d.shape
    kc, c_out = w_packed.shape
    k_sz = kc // c_in
    l_in = ln // n_pad
    l_out = l_in - k_sz + 1
    rows = l_out * n_pad

    acc = jnp.dot(h2d[0:rows, :], w_packed[0:c_in, :],
                  preferred_element_type=jnp.float32)
    for k in range(1, k_sz):
        acc = acc + jnp.dot(h2d[k * n_pad:k * n_pad + rows, :],
                            w_packed[k * c_in:(k + 1) * c_in, :],
                            preferred_element_type=jnp.float32)
    return jnp.maximum(acc + b_packed, 0.0)


def _maxpool1d_rows(h2d, n_pad, pool):
    """MaxPool1d(kernel=pool, stride=pool, floor) over the l axis of (L*N_pad, C).

    With n_pad % 8 == 0 the reshape is tile-preserving and every per-p slice
    is a sublane-aligned view -> a handful of vmax ops.
    """
    if pool == 1:
        return h2d
    ln, c = h2d.shape
    l_in = ln // n_pad
    l_out = l_in // pool
    h3 = h2d[: l_out * pool * n_pad, :].reshape(l_out, pool * n_pad, c)
    m = h3[:, 0:n_pad, :]
    for p in range(1, pool):
        m = jnp.maximum(m, h3[:, p * n_pad:(p + 1) * n_pad, :])
    return m.reshape(l_out * n_pad, c)


def _make_fused_kernel(pools, n_pad):
    """Fused Conv1dEmbedding: 3 x (conv -> relu -> conv -> relu -> maxpool)."""

    def kernel(x_ref,
               w1a_ref, b1a_ref, w1b_ref, b1b_ref,
               w2a_ref, b2a_ref, w2b_ref, b2b_ref,
               w3a_ref, b3a_ref, w3b_ref, b3b_ref,
               o_ref):
        h = x_ref[...].astype(jnp.float32)        # (L*N_pad, C_in), 2-D boundary
        blocks = (
            (w1a_ref, b1a_ref, w1b_ref, b1b_ref, pools[0]),
            (w2a_ref, b2a_ref, w2b_ref, b2b_ref, pools[1]),
            (w3a_ref, b3a_ref, w3b_ref, b3b_ref, pools[2]),
        )
        for wa, ba, wb, bb, pool in blocks:
            h = _conv1d_relu_rows(h, wa[...], ba[...], n_pad)
            h = _conv1d_relu_rows(h, wb[...], bb[...], n_pad)
            h = _maxpool1d_rows(h, n_pad, pool)
        # Final h is (L_f*N_pad, 128) (last conv's columns zero-padded to 128)
        # -> lane-dense, unmasked store.
        o_ref[...] = h.astype(o_ref.dtype)

    return kernel


# ---------------------------------------------------------------------------
# Module glue (parameter init + forward)
# ---------------------------------------------------------------------------
def _init_conv_packed(key, c_in, c_out, k, pad_out_to=None):
    """PyTorch-style Conv1d init, pre-packed at init time to the kernel's
    layout: weight (K*C_in, C_out_pad) with row index k*C_in + c, bias
    (1, C_out_pad).  Optional zero-padding of the output-channel (lane) dim.
    Also returns the torch-layout params for the reference path.
    """
    kw, kb = jax.random.split(key)
    bound = 1.0 / math.sqrt(c_in * k)
    w = jax.random.uniform(kw, (c_out, c_in, k), jnp.float32, -bound, bound)
    b = jax.random.uniform(kb, (c_out,), jnp.float32, -bound, bound)
    w_packed = jnp.transpose(w, (2, 1, 0)).reshape(k * c_in, c_out)
    b_packed = b.reshape(1, c_out)
    if pad_out_to is not None and pad_out_to > c_out:
        w_packed = jnp.pad(w_packed, ((0, 0), (0, pad_out_to - c_out)))
        b_packed = jnp.pad(b_packed, ((0, 0), (0, pad_out_to - c_out)))
    return w_packed, b_packed, w, b


def init_conv1d_embedding(key, channel_input, layers_param):
    params, torch_params = {}, {}
    c_in = channel_input
    for i in (1, 2, 3):
        key, k1, k2 = jax.random.split(key, 3)
        c_out = layers_param[f"cnn{i}"]
        ksz = layers_param[f"kernel_{i}"]
        pool = int(layers_param[f"maxpool_{i}"])
        # Last conv of the last block: pad output channels to 128 lanes so the
        # kernel's final store is lane-dense (wrapper strips the pad).
        pad_out = _round_up(c_out, 128) if i == 3 else None
        w1p, b1p, w1, b1 = _init_conv_packed(k1, c_in, c_out, ksz)
        w2p, b2p, w2, b2 = _init_conv_packed(k2, c_out, c_out, ksz,
                                             pad_out_to=pad_out)
        params[f"cnn{i}"] = dict(w1=w1p, b1=b1p, w2=w2p, b2=b2p,
                                 pool=pool, k=ksz, c_out=c_out)
        torch_params[f"cnn{i}"] = dict(w1=w1, b1=b1, w2=w2, b2=b2, pool=pool)
        c_in = c_out
    return params, torch_params


def _estimate_vmem_bytes(l_in, n_pad, c_in, params):
    """Rough VMEM bound: f32 footprint of every stage value (rows padded to 8,
    lanes to 128) + packed weights, x3 headroom for temporaries/DMA buffers."""
    def arr_bytes(rows, cols):
        return _round_up(rows, 8) * _round_up(cols, 128) * 4

    total = arr_bytes(l_in * n_pad, c_in)
    l = l_in
    for i in (1, 2, 3):
        blk = params[f"cnn{i}"]
        k = blk["k"]
        c_mid = blk["w1"].shape[1]
        c_out_packed = blk["w2"].shape[1]
        l = l - (k - 1); total += arr_bytes(l * n_pad, c_mid)
        l = l - (k - 1); total += arr_bytes(l * n_pad, c_out_packed)
        l = l // blk["pool"]; total += arr_bytes(l * n_pad, c_out_packed)
        total += arr_bytes(*blk["w1"].shape) + arr_bytes(*blk["w2"].shape)
        total += arr_bytes(*blk["b1"].shape) + arr_bytes(*blk["b2"].shape)
    return total * 3


def conv1d_embedding_forward(x_lnc, params):
    """x_lnc: (L, N, C_in) -> (L_out, N, C_out).  params: packed (kernel) params."""
    l_in, n, c_in = x_lnc.shape
    n_pad = max(8, _round_up(n, 8))           # sublane-align the batch rows
    if n_pad != n:
        x_lnc = jnp.pad(x_lnc, ((0, 0), (0, n_pad - n), (0, 0)))
    x2d = x_lnc.reshape(l_in * n_pad, c_in)   # 2-D (rows, lanes) boundary

    flat_args = [x2d]
    pools = []
    l = l_in
    c_out_real = c_in
    c_out_packed = c_in
    for i in (1, 2, 3):
        blk = params[f"cnn{i}"]
        k = blk["k"]
        l = l - (k - 1)                       # conv 1 (valid)
        l = l - (k - 1)                       # conv 2 (valid)
        l = l // blk["pool"]                  # maxpool (floor)
        c_out_real = blk["c_out"]
        c_out_packed = blk["w2"].shape[1]
        pools.append(int(blk["pool"]))
        flat_args += [blk["w1"], blk["b1"], blk["w2"], blk["b2"]]

    kernel = _make_fused_kernel(tuple(pools), n_pad)
    vmem_bytes = int(min(max(_estimate_vmem_bytes(l_in, n_pad, c_in, params),
                             16 * 1024 * 1024),
                         48 * 1024 * 1024))

    vmem_spec = pl.BlockSpec(memory_space=pltpu.MemorySpace.VMEM)
    out2d = pl.pallas_call(
        kernel,
        out_shape=jax.ShapeDtypeStruct((l * n_pad, c_out_packed), x2d.dtype),
        in_specs=[vmem_spec] * len(flat_args),
        out_specs=vmem_spec,
        compiler_params=pltpu.CompilerParams(vmem_limit_bytes=vmem_bytes),
    )(*flat_args)

    # Free metadata reshape + strip of batch/channel padding in the wrapper.
    return out2d.reshape(l, n_pad, c_out_packed)[:, :n, :c_out_real]


# ---------------------------------------------------------------------------
# Pure-JAX reference (independent layout/math path, for correctness check)
# ---------------------------------------------------------------------------
def _ref_conv1d_relu(x_ncl, w, b):
    n, c_in, l = x_ncl.shape
    c_out, _, k = w.shape
    l_out = l - k + 1
    acc = jnp.zeros((n, c_out, l_out), jnp.float32)
    for kk in range(k):
        acc = acc + jnp.einsum("oc,ncl->nol", w[:, :, kk],
                               x_ncl[:, :, kk:kk + l_out])
    return jnp.maximum(acc + b[None, :, None], 0.0)


def _ref_forward(x_lnc, torch_params):
    h = jnp.transpose(x_lnc, (1, 2, 0))                       # (N, C, L)
    for i in (1, 2, 3):
        blk = torch_params[f"cnn{i}"]
        h = _ref_conv1d_relu(h, blk["w1"], blk["b1"])
        h = _ref_conv1d_relu(h, blk["w2"], blk["b2"])
        n, c, l = h.shape
        lp = l // blk["pool"]
        h = jnp.max(h[:, :, :lp * blk["pool"]].reshape(n, c, lp, blk["pool"]),
                    axis=-1)
    return jnp.transpose(h, (2, 0, 1))                        # (L, N, C)


# ---------------------------------------------------------------------------
if __name__ == "__main__":
    key = jax.random.PRNGKey(0)
    k_x, k_p = jax.random.split(key)

    # Small shapes: seq L=64, batch N=2, input channels C=4.
    L, N, C_IN = 64, 2, 4
    layers_param = {
        "cnn1": 8,  "kernel_1": 3, "maxpool_1": 2,
        "cnn2": 16, "kernel_2": 3, "maxpool_2": 2,
        "cnn3": 32, "kernel_3": 3, "maxpool_3": 2,
    }

    x = jax.random.normal(k_x, (L, N, C_IN), jnp.float32)
    params, torch_params = init_conv1d_embedding(k_p, C_IN, layers_param)

    fwd = jax.jit(functools.partial(conv1d_embedding_forward, params=params))
    out = jax.block_until_ready(fwd(x))

    ref = _ref_forward(x, torch_params)
    assert out.shape == ref.shape, (out.shape, ref.shape)
    assert jnp.allclose(out, ref, rtol=1e-4, atol=1e-4), (
        "mismatch vs reference, max abs err = "
        f"{float(jnp.max(jnp.abs(out - ref)))}")

    print("KERNEL_OK")
</pallas_src>

<mosaic_0001>
module attributes {stable_mosaic.version = 11 : i64} {
  func.func @kernel(%arg0: memref<512x4xf32, #tpu.memory_space<vmem>>, %arg1: memref<12x8xf32, #tpu.memory_space<vmem>>, %arg2: memref<1x8xf32, #tpu.memory_space<vmem>>, %arg3: memref<24x8xf32, #tpu.memory_space<vmem>>, %arg4: memref<1x8xf32, #tpu.memory_space<vmem>>, %arg5: memref<24x16xf32, #tpu.memory_space<vmem>>, %arg6: memref<1x16xf32, #tpu.memory_space<vmem>>, %arg7: memref<48x16xf32, #tpu.memory_space<vmem>>, %arg8: memref<1x16xf32, #tpu.memory_space<vmem>>, %arg9: memref<48x32xf32, #tpu.memory_space<vmem>>, %arg10: memref<1x32xf32, #tpu.memory_space<vmem>>, %arg11: memref<96x128xf32, #tpu.memory_space<vmem>>, %arg12: memref<1x128xf32, #tpu.memory_space<vmem>>, %arg13: memref<32x128xf32, #tpu.memory_space<vmem>>) attributes {dimension_semantics = [], scalar_prefetch = 0 : i64, scratch_operands = 0 : i64, tpu.core_type = #tpu.core_type<tc>} {
    %c0 = arith.constant 0 : index
    %c0_0 = arith.constant 0 : index
    %0 = vector.load %arg0[%c0, %c0_0] : memref<512x4xf32, #tpu.memory_space<vmem>>, vector<512x4xf32>
    %c0_1 = arith.constant 0 : index
    %c0_2 = arith.constant 0 : index
    %1 = vector.load %arg1[%c0_1, %c0_2] : memref<12x8xf32, #tpu.memory_space<vmem>>, vector<12x8xf32>
    %c0_3 = arith.constant 0 : index
    %c0_4 = arith.constant 0 : index
    %2 = vector.load %arg2[%c0_3, %c0_4] : memref<1x8xf32, #tpu.memory_space<vmem>>, vector<1x8xf32>
    %3 = vector.extract_strided_slice %0 {offsets = [0, 0], sizes = [496, 4], strides = [1, 1]} : vector<512x4xf32> to vector<496x4xf32>
    %4 = vector.extract_strided_slice %1 {offsets = [0, 0], sizes = [4, 8], strides = [1, 1]} : vector<12x8xf32> to vector<4x8xf32>
    %cst = arith.constant dense<0.000000e+00> : vector<496x8xf32>
    %5 = tpu.matmul %3, %4, %cst {dimension_numbers = #tpu.dot_dimension_numbers<[1], [0], [0], [1], [0, 0, 1, 1], [], []>} : vector<496x4xf32>, vector<4x8xf32>, vector<496x8xf32> -> vector<496x8xf32>
    %6 = vector.extract_strided_slice %0 {offsets = [8, 0], sizes = [496, 4], strides = [1, 1]} : vector<512x4xf32> to vector<496x4xf32>
    %7 = vector.extract_strided_slice %1 {offsets = [4, 0], sizes = [4, 8], strides = [1, 1]} : vector<12x8xf32> to vector<4x8xf32>
    %cst_5 = arith.constant dense<0.000000e+00> : vector<496x8xf32>
    %8 = tpu.matmul %6, %7, %cst_5 {dimension_numbers = #tpu.dot_dimension_numbers<[1], [0], [0], [1], [0, 0, 1, 1], [], []>} : vector<496x4xf32>, vector<4x8xf32>, vector<496x8xf32> -> vector<496x8xf32>
    %9 = arith.addf %5, %8 : vector<496x8xf32>
    %10 = vector.extract_strided_slice %0 {offsets = [16, 0], sizes = [496, 4], strides = [1, 1]} : vector<512x4xf32> to vector<496x4xf32>
    %11 = vector.extract_strided_slice %1 {offsets = [8, 0], sizes = [4, 8], strides = [1, 1]} : vector<12x8xf32> to vector<4x8xf32>
    %cst_6 = arith.constant dense<0.000000e+00> : vector<496x8xf32>
    %12 = tpu.matmul %10, %11, %cst_6 {dimension_numbers = #tpu.dot_dimension_numbers<[1], [0], [0], [1], [0, 0, 1, 1], [], []>} : vector<496x4xf32>, vector<4x8xf32>, vector<496x8xf32> -> vector<496x8xf32>
    %13 = arith.addf %9, %12 : vector<496x8xf32>
    %14 = vector.broadcast %2 : vector<1x8xf32> to vector<496x8xf32>
    %15 = arith.addf %13, %14 : vector<496x8xf32>
    %cst_7 = arith.constant 0.000000e+00 : f32
    %16 = vector.broadcast %cst_7 : f32 to vector<496x8xf32>
    %17 = arith.maximumf %15, %16 : vector<496x8xf32>
    %c0_8 = arith.constant 0 : index
    %c0_9 = arith.constant 0 : index
    %18 = vector.load %arg3[%c0_8, %c0_9] : memref<24x8xf32, #tpu.memory_space<vmem>>, vector<24x8xf32>
    %c0_10 = arith.constant 0 : index
    %c0_11 = arith.constant 0 : index
    %19 = vector.load %arg4[%c0_10, %c0_11] : memref<1x8xf32, #tpu.memory_space<vmem>>, vector<1x8xf32>
    %20 = vector.extract_strided_slice %17 {offsets = [0, 0], sizes = [480, 8], strides = [1, 1]} : vector<496x8xf32> to vector<480x8xf32>
    %21 = vector.extract_strided_slice %18 {offsets = [0, 0], sizes = [8, 8], strides = [1, 1]} : vector<24x8xf32> to vector<8x8xf32>
    %cst_12 = arith.constant dense<0.000000e+00> : vector<480x8xf32>
    %22 = tpu.matmul %20, %21, %cst_12 {dimension_numbers = #tpu.dot_dimension_numbers<[1], [0], [0], [1], [0, 0, 1, 1], [], []>} : vector<480x8xf32>, vector<8x8xf32>, vector<480x8xf32> -> vector<480x8xf32>
    %23 = vector.extract_strided_slice %17 {offsets = [8, 0], sizes = [480, 8], strides = [1, 1]} : vector<496x8xf32> to vector<480x8xf32>
    %24 = vector.extract_strided_slice %18 {offsets = [8, 0], sizes = [8, 8], strides = [1, 1]} : vector<24x8xf32> to vector<8x8xf32>
    %cst_13 = arith.constant dense<0.000000e+00> : vector<480x8xf32>
    %25 = tpu.matmul %23, %24, %cst_13 {dimension_numbers = #tpu.dot_dimension_numbers<[1], [0], [0], [1], [0, 0, 1, 1], [], []>} : vector<480x8xf32>, vector<8x8xf32>, vector<480x8xf32> -> vector<480x8xf32>
    %26 = arith.addf %22, %25 : vector<480x8xf32>
    %27 = vector.extract_strided_slice %17 {offsets = [16, 0], sizes = [480, 8], strides = [1, 1]} : vector<496x8xf32> to vector<480x8xf32>
    %28 = vector.extract_strided_slice %18 {offsets = [16, 0], sizes = [8, 8], strides = [1, 1]} : vector<24x8xf32> to vector<8x8xf32>
    %cst_14 = arith.constant dense<0.000000e+00> : vector<480x8xf32>
    %29 = tpu.matmul %27, %28, %cst_14 {dimension_numbers = #tpu.dot_dimension_numbers<[1], [0], [0], [1], [0, 0, 1, 1], [], []>} : vector<480x8xf32>, vector<8x8xf32>, vector<480x8xf32> -> vector<480x8xf32>
    %30 = arith.addf %26, %29 : vector<480x8xf32>
    %31 = vector.broadcast %19 : vector<1x8xf32> to vector<480x8xf32>
    %32 = arith.addf %30, %31 : vector<480x8xf32>
    %cst_15 = arith.constant 0.000000e+00 : f32
    %33 = vector.broadcast %cst_15 : f32 to vector<480x8xf32>
    %34 = arith.maximumf %32, %33 : vector<480x8xf32>
    %35 = vector.shape_cast %34 : vector<480x8xf32> to vector<30x16x8xf32>
    %36 = vector.extract_strided_slice %35 {offsets = [0, 0, 0], sizes = [30, 8, 8], strides = [1, 1, 1]} : vector<30x16x8xf32> to vector<30x8x8xf32>
    %37 = vector.extract_strided_slice %35 {offsets = [0, 8, 0], sizes = [30, 8, 8], strides = [1, 1, 1]} : vector<30x16x8xf32> to vector<30x8x8xf32>
    %38 = arith.maximumf %36, %37 : vector<30x8x8xf32>
    %39 = vector.shape_cast %38 : vector<30x8x8xf32> to vector<240x8xf32>
    %c0_16 = arith.constant 0 : index
    %c0_17 = arith.constant 0 : index
    %40 = vector.load %arg5[%c0_16, %c0_17] : memref<24x16xf32, #tpu.memory_space<vmem>>, vector<24x16xf32>
    %c0_18 = arith.constant 0 : index
    %c0_19 = arith.constant 0 : index
    %41 = vector.load %arg6[%c0_18, %c0_19] : memref<1x16xf32, #tpu.memory_space<vmem>>, vector<1x16xf32>
    %42 = vector.extract_strided_slice %39 {offsets = [0, 0], sizes = [224, 8], strides = [1, 1]} : vector<240x8xf32> to vector<224x8xf32>
    %43 = vector.extract_strided_slice %40 {offsets = [0, 0], sizes = [8, 16], strides = [1, 1]} : vector<24x16xf32> to vector<8x16xf32>
    %cst_20 = arith.constant dense<0.000000e+00> : vector<224x16xf32>
    %44 = tpu.matmul %42, %43, %cst_20 {dimension_numbers = #tpu.dot_dimension_numbers<[1], [0], [0], [1], [0, 0, 1, 1], [], []>} : vector<224x8xf32>, vector<8x16xf32>, vector<224x16xf32> -> vector<224x16xf32>
    %45 = vector.extract_strided_slice %39 {offsets = [8, 0], sizes = [224, 8], strides = [1, 1]} : vector<240x8xf32> to vector<224x8xf32>
    %46 = vector.extract_strided_slice %40 {offsets = [8, 0], sizes = [8, 16], strides = [1, 1]} : vector<24x16xf32> to vector<8x16xf32>
    %cst_21 = arith.constant dense<0.000000e+00> : vector<224x16xf32>
    %47 = tpu.matmul %45, %46, %cst_21 {dimension_numbers = #tpu.dot_dimension_numbers<[1], [0], [0], [1], [0, 0, 1, 1], [], []>} : vector<224x8xf32>, vector<8x16xf32>, vector<224x16xf32> -> vector<224x16xf32>
    %48 = arith.addf %44, %47 : vector<224x16xf32>
    %49 = vector.extract_strided_slice %39 {offsets = [16, 0], sizes = [224, 8], strides = [1, 1]} : vector<240x8xf32> to vector<224x8xf32>
    %50 = vector.extract_strided_slice %40 {offsets = [16, 0], sizes = [8, 16], strides = [1, 1]} : vector<24x16xf32> to vector<8x16xf32>
    %cst_22 = arith.constant dense<0.000000e+00> : vector<224x16xf32>
    %51 = tpu.matmul %49, %50, %cst_22 {dimension_numbers = #tpu.dot_dimension_numbers<[1], [0], [0], [1], [0, 0, 1, 1], [], []>} : vector<224x8xf32>, vector<8x16xf32>, vector<224x16xf32> -> vector<224x16xf32>
    %52 = arith.addf %48, %51 : vector<224x16xf32>
    %53 = vector.broadcast %41 : vector<1x16xf32> to vector<224x16xf32>
    %54 = arith.addf %52, %53 : vector<224x16xf32>
    %cst_23 = arith.constant 0.000000e+00 : f32
    %55 = vector.broadcast %cst_23 : f32 to vector<224x16xf32>
    %56 = arith.maximumf %54, %55 : vector<224x16xf32>
    %c0_24 = arith.constant 0 : index
    %c0_25 = arith.constant 0 : index
    %57 = vector.load %arg7[%c0_24, %c0_25] : memref<48x16xf32, #tpu.memory_space<vmem>>, vector<48x16xf32>
    %c0_26 = arith.constant 0 : index
    %c0_27 = arith.constant 0 : index
    %58 = vector.load %arg8[%c0_26, %c0_27] : memref<1x16xf32, #tpu.memory_space<vmem>>, vector<1x16xf32>
    %59 = vector.extract_strided_slice %56 {offsets = [0, 0], sizes = [208, 16], strides = [1, 1]} : vector<224x16xf32> to vector<208x16xf32>
    %60 = vector.extract_strided_slice %57 {offsets = [0, 0], sizes = [16, 16], strides = [1, 1]} : vector<48x16xf32> to vector<16x16xf32>
    %cst_28 = arith.constant dense<0.000000e+00> : vector<208x16xf32>
    %61 = tpu.matmul %59, %60, %cst_28 {dimension_numbers = #tpu.dot_dimension_numbers<[1], [0], [0], [1], [0, 0, 1, 1], [], []>} : vector<208x16xf32>, vector<16x16xf32>, vector<208x16xf32> -> vector<208x16xf32>
    %62 = vector.extract_strided_slice %56 {offsets = [8, 0], sizes = [208, 16], strides = [1, 1]} : vector<224x16xf32> to vector<208x16xf32>
    %63 = vector.extract_strided_slice %57 {offsets = [16, 0], sizes = [16, 16], strides = [1, 1]} : vector<48x16xf32> to vector<16x16xf32>
    %cst_29 = arith.constant dense<0.000000e+00> : vector<208x16xf32>
    %64 = tpu.matmul %62, %63, %cst_29 {dimension_numbers = #tpu.dot_dimension_numbers<[1], [0], [0], [1], [0, 0, 1, 1], [], []>} : vector<208x16xf32>, vector<16x16xf32>, vector<208x16xf32> -> vector<208x16xf32>
    %65 = arith.addf %61, %64 : vector<208x16xf32>
    %66 = vector.extract_strided_slice %56 {offsets = [16, 0], sizes = [208, 16], strides = [1, 1]} : vector<224x16xf32> to vector<208x16xf32>
    %67 = vector.extract_strided_slice %57 {offsets = [32, 0], sizes = [16, 16], strides = [1, 1]} : vector<48x16xf32> to vector<16x16xf32>
    %cst_30 = arith.constant dense<0.000000e+00> : vector<208x16xf32>
    %68 = tpu.matmul %66, %67, %cst_30 {dimension_numbers = #tpu.dot_dimension_numbers<[1], [0], [0], [1], [0, 0, 1, 1], [], []>} : vector<208x16xf32>, vector<16x16xf32>, vector<208x16xf32> -> vector<208x16xf32>
    %69 = arith.addf %65, %68 : vector<208x16xf32>
    %70 = vector.broadcast %58 : vector<1x16xf32> to vector<208x16xf32>
    %71 = arith.addf %69, %70 : vector<208x16xf32>
    %cst_31 = arith.constant 0.000000e+00 : f32
    %72 = vector.broadcast %cst_31 : f32 to vector<208x16xf32>
    %73 = arith.maximumf %71, %72 : vector<208x16xf32>
    %74 = vector.shape_cast %73 : vector<208x16xf32> to vector<13x16x16xf32>
    %75 = vector.extract_strided_slice %74 {offsets = [0, 0, 0], sizes = [13, 8, 16], strides = [1, 1, 1]} : vector<13x16x16xf32> to vector<13x8x16xf32>
    %76 = vector.extract_strided_slice %74 {offsets = [0, 8, 0], sizes = [13, 8, 16], strides = [1, 1, 1]} : vector<13x16x16xf32> to vector<13x8x16xf32>
    %77 = arith.maximumf %75, %76 : vector<13x8x16xf32>
    %78 = vector.shape_cast %77 : vector<13x8x16xf32> to vector<104x16xf32>
    %c0_32 = arith.constant 0 : index
    %c0_33 = arith.constant 0 : index
    %79 = vector.load %arg9[%c0_32, %c0_33] : memref<48x32xf32, #tpu.memory_space<vmem>>, vector<48x32xf32>
    %c0_34 = arith.constant 0 : index
    %c0_35 = arith.constant 0 : index
    %80 = vector.load %arg10[%c0_34, %c0_35] : memref<1x32xf32, #tpu.memory_space<vmem>>, vector<1x32xf32>
    %81 = vector.extract_strided_slice %78 {offsets = [0, 0], sizes = [88, 16], strides = [1, 1]} : vector<104x16xf32> to vector<88x16xf32>
    %82 = vector.extract_strided_slice %79 {offsets = [0, 0], sizes = [16, 32], strides = [1, 1]} : vector<48x32xf32> to vector<16x32xf32>
    %cst_36 = arith.constant dense<0.000000e+00> : vector<88x32xf32>
    %83 = tpu.matmul %81, %82, %cst_36 {dimension_numbers = #tpu.dot_dimension_numbers<[1], [0], [0], [1], [0, 0, 1, 1], [], []>} : vector<88x16xf32>, vector<16x32xf32>, vector<88x32xf32> -> vector<88x32xf32>
    %84 = vector.extract_strided_slice %78 {offsets = [8, 0], sizes = [88, 16], strides = [1, 1]} : vector<104x16xf32> to vector<88x16xf32>
    %85 = vector.extract_strided_slice %79 {offsets = [16, 0], sizes = [16, 32], strides = [1, 1]} : vector<48x32xf32> to vector<16x32xf32>
    %cst_37 = arith.constant dense<0.000000e+00> : vector<88x32xf32>
    %86 = tpu.matmul %84, %85, %cst_37 {dimension_numbers = #tpu.dot_dimension_numbers<[1], [0], [0], [1], [0, 0, 1, 1], [], []>} : vector<88x16xf32>, vector<16x32xf32>, vector<88x32xf32> -> vector<88x32xf32>
    %87 = arith.addf %83, %86 : vector<88x32xf32>
    %88 = vector.extract_strided_slice %78 {offsets = [16, 0], sizes = [88, 16], strides = [1, 1]} : vector<104x16xf32> to vector<88x16xf32>
    %89 = vector.extract_strided_slice %79 {offsets = [32, 0], sizes = [16, 32], strides = [1, 1]} : vector<48x32xf32> to vector<16x32xf32>
    %cst_38 = arith.constant dense<0.000000e+00> : vector<88x32xf32>
    %90 = tpu.matmul %88, %89, %cst_38 {dimension_numbers = #tpu.dot_dimension_numbers<[1], [0], [0], [1], [0, 0, 1, 1], [], []>} : vector<88x16xf32>, vector<16x32xf32>, vector<88x32xf32> -> vector<88x32xf32>
    %91 = arith.addf %87, %90 : vector<88x32xf32>
    %92 = vector.broadcast %80 : vector<1x32xf32> to vector<88x32xf32>
    %93 = arith.addf %91, %92 : vector<88x32xf32>
    %cst_39 = arith.constant 0.000000e+00 : f32
    %94 = vector.broadcast %cst_39 : f32 to vector<88x32xf32>
    %95 = arith.maximumf %93, %94 : vector<88x32xf32>
    %c0_40 = arith.constant 0 : index
    %c0_41 = arith.constant 0 : index
    %96 = vector.load %arg11[%c0_40, %c0_41] : memref<96x128xf32, #tpu.memory_space<vmem>>, vector<96x128xf32>
    %c0_42 = arith.constant 0 : index
    %c0_43 = arith.constant 0 : index
    %97 = vector.load %arg12[%c0_42, %c0_43] : memref<1x128xf32, #tpu.memory_space<vmem>>, vector<1x128xf32>
    %98 = vector.extract_strided_slice %95 {offsets = [0, 0], sizes = [72, 32], strides = [1, 1]} : vector<88x32xf32> to vector<72x32xf32>
    %99 = vector.extract_strided_slice %96 {offsets = [0, 0], sizes = [32, 128], strides = [1, 1]} : vector<96x128xf32> to vector<32x128xf32>
    %cst_44 = arith.constant dense<0.000000e+00> : vector<72x128xf32>
    %100 = tpu.matmul %98, %99, %cst_44 {dimension_numbers = #tpu.dot_dimension_numbers<[1], [0], [0], [1], [0, 0, 1, 1], [], []>} : vector<72x32xf32>, vector<32x128xf32>, vector<72x128xf32> -> vector<72x128xf32>
    %101 = vector.extract_strided_slice %95 {offsets = [8, 0], sizes = [72, 32], strides = [1, 1]} : vector<88x32xf32> to vector<72x32xf32>
    %102 = vector.extract_strided_slice %96 {offsets = [32, 0], sizes = [32, 128], strides = [1, 1]} : vector<96x128xf32> to vector<32x128xf32>
    %cst_45 = arith.constant dense<0.000000e+00> : vector<72x128xf32>
    %103 = tpu.matmul %101, %102, %cst_45 {dimension_numbers = #tpu.dot_dimension_numbers<[1], [0], [0], [1], [0, 0, 1, 1], [], []>} : vector<72x32xf32>, vector<32x128xf32>, vector<72x128xf32> -> vector<72x128xf32>
    %104 = arith.addf %100, %103 : vector<72x128xf32>
    %105 = vector.extract_strided_slice %95 {offsets = [16, 0], sizes = [72, 32], strides = [1, 1]} : vector<88x32xf32> to vector<72x32xf32>
    %106 = vector.extract_strided_slice %96 {offsets = [64, 0], sizes = [32, 128], strides = [1, 1]} : vector<96x128xf32> to vector<32x128xf32>
    %cst_46 = arith.constant dense<0.000000e+00> : vector<72x128xf32>
    %107 = tpu.matmul %105, %106, %cst_46 {dimension_numbers = #tpu.dot_dimension_numbers<[1], [0], [0], [1], [0, 0, 1, 1], [], []>} : vector<72x32xf32>, vector<32x128xf32>, vector<72x128xf32> -> vector<72x128xf32>
    %108 = arith.addf %104, %107 : vector<72x128xf32>
    %109 = vector.broadcast %97 : vector<1x128xf32> to vector<72x128xf32>
    %110 = arith.addf %108, %109 : vector<72x128xf32>
    %cst_47 = arith.constant 0.000000e+00 : f32
    %111 = vector.broadcast %cst_47 : f32 to vector<72x128xf32>
    %112 = arith.maximumf %110, %111 : vector<72x128xf32>
    %113 = vector.extract_strided_slice %112 {offsets = [0, 0], sizes = [64, 128], strides = [1, 1]} : vector<72x128xf32> to vector<64x128xf32>
    %114 = vector.shape_cast %113 : vector<64x128xf32> to vector<4x16x128xf32>
    %115 = vector.extract_strided_slice %114 {offsets = [0, 0, 0], sizes = [4, 8, 128], strides = [1, 1, 1]} : vector<4x16x128xf32> to vector<4x8x128xf32>
    %116 = vector.extract_strided_slice %114 {offsets = [0, 8, 0], sizes = [4, 8, 128], strides = [1, 1, 1]} : vector<4x16x128xf32> to vector<4x8x128xf32>
    %117 = arith.maximumf %115, %116 : vector<4x8x128xf32>
    %118 = vector.shape_cast %117 : vector<4x8x128xf32> to vector<32x128xf32>
    %c0_48 = arith.constant 0 : index
    %c0_49 = arith.constant 0 : index
    %119 = vector.load %arg13[%c0_48, %c0_49] : memref<32x128xf32, #tpu.memory_space<vmem>>, vector<32x128xf32>
    tpu.vector_store %arg13[%c0_48, %c0_49], %118 {strides = array<i32>} : memref<32x128xf32, #tpu.memory_space<vmem>>, vector<32x128xf32>,
    return
  }
}

</mosaic_0001>

<bundles_post_ra>
// kernel: conv1d_embedding_forward.1
= control target key start
LH: loop header
LB: loop body
LE: loop exit
PB: predicated region body
PF: predicated region fallthrough
CT: control target
= control target key end

     0   :  { %vm113_vm0 = vcmask 31744   ;;  %vm300_vm1 = vcmask 1043456   ;;  %vm1635_vm2 = vcmask 64512   ;;  %vm3939_vm3 = vcmask 130048   ;;  %s10516_s1 = inlined_call_operand.vmem [shape: f32[12,8], index: 1, kind: input, shape index: {}]   ;;  %s10517_s0 = inlined_call_operand.vmem [shape: f32[512,4], index: 0, kind: input, shape index: {}]   ;;  %s10518_s3 = inlined_call_operand.vmem [shape: f32[24,8], index: 3, kind: input, shape index: {}]   ;;  %s10519_s2 = inlined_call_operand.vmem [shape: f32[1,8], index: 2, kind: input, shape index: {}]   ;;  %s10520_s5 = inlined_call_operand.vmem [shape: f32[24,16], index: 5, kind: input, shape index: {}]   ;;  %s10521_s4 = inlined_call_operand.vmem [shape: f32[1,8], index: 4, kind: input, shape index: {}]   ;;  %s10522_s7 = inlined_call_operand.vmem [shape: f32[48,16], index: 7, kind: input, shape index: {}]   ;;  %s10523_s6 = inlined_call_operand.vmem [shape: f32[1,16], index: 6, kind: input, shape index: {}]   ;;  %s10524_s9 = inlined_call_operand.vmem [shape: f32[48,32], index: 9, kind: input, shape index: {}]   ;;  %s10525_s8 = inlined_call_operand.vmem [shape: f32[1,16], index: 8, kind: input, shape index: {}]   ;;  %s10526_s11 = inlined_call_operand.vmem [shape: f32[96,128], index: 11, kind: input, shape index: {}]   ;;  %s10527_s10 = inlined_call_operand.vmem [shape: f32[1,32], index: 10, kind: input, shape index: {}]   ;;  %s10528_s12 = inlined_call_operand.vmem [shape: f32[1,128], index: 12, kind: input, shape index: {}]   ;;  %s10529_s13 = inlined_call_operand.vmem [shape: f32[32,128], index: 13, kind: output, shape index: {}]  }
   0x1   :  { %v108_v0 = vld [vmem:[%s10516_s1] sm:$0xff]  ;;  %v8298_v1 = vld [vmem:[%s10517_s0 + $0x8] sm:$0xff]  ;;  %v8305_v3 = vld [vmem:[%s10517_s0 + $0x10] sm:$0xff]  ;;  %vm8220_vm4 = vmmov 0   ;;  %vm5164_vm5 = vcmask 261120  }
   0x2   :  { %v112_v2 = vrot.slane %v108_v0, 4  ;;  %6787 = vmatprep.mubr.msk.f32.mxu0 %vm113_vm0, %v8298_v1  ;;  %v8311_v4 = vld [vmem:[%s10517_s0 + $0x18] sm:$0xff]  ;;  %v8325_v5 = vld [vmem:[%s10517_s0 + $0x20] sm:$0xff]  ;;  %v8330_v6 = vld [vmem:[%s10517_s0 + $0x28] sm:$0xff] }
   0x3   :  { %v8339_v7 = vld [vmem:[%s10517_s0 + $0x30] sm:$0xff]  ;;  %v8344_v8 = vld [vmem:[%s10517_s0 + $0x38] sm:$0xff]  ;;  %v8353_v9 = vld [vmem:[%s10517_s0 + $0x40] sm:$0xff] }
   0x4   :  { %6785 = vmatprep.subr.msk.mxu0 %vm300_vm1, %v112_v2  ;;  %7862 = vmatprep.subr.msk.mxu1 %vm300_vm1, %v112_v2  ;;  %v8358_v10 = vld [vmem:[%s10517_s0 + $0x48] sm:$0xff]  ;;  %v8367_v11 = vld [vmem:[%s10517_s0 + $0x50] sm:$0xff]  ;;  %v8372_v12 = vld [vmem:[%s10517_s0 + $0x58] sm:$0xff] }
   0x5   :  { %6786 = vmatpush3.msk.msra.mxu0 %vm300_vm1, %v112_v2  ;;  %7863 = vmatpush3.msk.msra.mxu1 %vm300_vm1, %v112_v2  ;;  %v8377_v13 = vld [vmem:[%s10516_s1 + $0x8] sm:$0xf]  ;;  %v8388_v14 = vld [vmem:[%s10517_s0 + $0x60] sm:$0xff]  ;;  %v8402_v16 = vld [vmem:[%s10517_s0 + $0x70] sm:$0xff] }
   0x6   :  { %6788 = vmatmul.mubr.msk.f32.vlgmr.msra.gmra.mrb[0].mxu0 %vm113_vm0, %v8305_v3  ;;  %6880 = vmatprep.subr.msk.mxu0 %vm300_vm1, %v108_v0  ;;  %v8393_v15 = vld [vmem:[%s10517_s0 + $0x68] sm:$0xff]  ;;  %v8407_v17 = vld [vmem:[%s10517_s0 + $0x78] sm:$0xff]  ;;  %v8416_v18 = vld [vmem:[%s10517_s0 + $0x80] sm:$0xff] }
   0x7   :  { %6881 = vmatpush3.msk.msra.mxu0 %vm300_vm1, %v108_v0  ;;  %6790 = vmatprep.mubr.msk.f32.mxu0 %vm113_vm0, %v8311_v4  ;;  %v8421_v19 = vld [vmem:[%s10517_s0 + $0x88] sm:$0xff]  ;;  %v8430_v20 = vld [vmem:[%s10517_s0 + $0x90] sm:$0xff]  ;;  %v8435_v21 = vld [vmem:[%s10517_s0 + $0x98] sm:$0xff] }
   0x8   :  { %6975 = vmatprep.subr.msk.mxu0 %vm300_vm1, %v8377_v13  ;;  %v8444_v22 = vld [vmem:[%s10517_s0 + $0xa0] sm:$0xff]  ;;  %v8449_v23 = vld [vmem:[%s10517_s0 + $0xa8] sm:$0xff]  ;;  %v8458_v24 = vld [vmem:[%s10517_s0 + $0xb0] sm:$0xff] }
   0x9   :  { %v8463_v25 = vld [vmem:[%s10517_s0 + $0xb8] sm:$0xff]  ;;  %v8472_v26 = vld [vmem:[%s10517_s0 + $0xc0] sm:$0xff]  ;;  %v8477_v27 = vld [vmem:[%s10517_s0 + $0xc8] sm:$0xff] }
   0xa   :  { %6791 = vmatmul.mubr.msk.f32.gmra.mrb[2].mxu0 %vm113_vm0, %v8325_v5  ;;  %v8486_v28 = vld [vmem:[%s10517_s0 + $0xd0] sm:$0xff]  ;;  %v8491_v29 = vld [vmem:[%s10517_s0 + $0xd8] sm:$0xff]  ;;  %v8500_v30 = vld [vmem:[%s10517_s0 + $0xe0] sm:$0xff] }
   0xb   :  { %6793 = vmatprep.mubr.msk.f32.mxu0 %vm113_vm0, %v8330_v6  ;;  %v8505_v31 = vld [vmem:[%s10517_s0 + $0xe8] sm:$0xff]  ;;  %v8514_v32 = vld [vmem:[%s10517_s0 + $0xf0] sm:$0xff]  ;;  %v8519_v33 = vld [vmem:[%s10517_s0 + $0xf8] sm:$0xff] }
   0xc   :  { %v8528_v34 = vld [vmem:[%s10517_s0 + $0x100] sm:$0xff]  ;;  %v8533_v35 = vld [vmem:[%s10517_s0 + $0x108] sm:$0xff]  ;;  %v8542_v36 = vld [vmem:[%s10517_s0 + $0x110] sm:$0xff] }
   0xd   :  { %v8547_v37 = vld [vmem:[%s10517_s0 + $0x118] sm:$0xff]  ;;  %v8556_v38 = vld [vmem:[%s10517_s0 + $0x120] sm:$0xff]  ;;  %v8561_v39 = vld [vmem:[%s10517_s0 + $0x128] sm:$0xff] }
   0xe   :  { %6794 = vmatmul.mubr.msk.f32.gmra.mrb[4].mxu0 %vm113_vm0, %v8339_v7  ;;  %v8570_v40 = vld [vmem:[%s10517_s0 + $0x130] sm:$0xff]  ;;  %v8575_v41 = vld [vmem:[%s10517_s0 + $0x138] sm:$0xff]  ;;  %v8584_v42 = vld [vmem:[%s10517_s0 + $0x140] sm:$0xff] }
   0xf   :  { %6796 = vmatprep.mubr.msk.f32.mxu0 %vm113_vm0, %v8344_v8  ;;  %v8589_v43 = vld [vmem:[%s10517_s0 + $0x148] sm:$0xff]  ;;  %v8598_v44 = vld [vmem:[%s10517_s0 + $0x150] sm:$0xff]  ;;  %v8603_v45 = vld [vmem:[%s10517_s0 + $0x158] sm:$0xff] }
  0x10   :  { %v8612_v46 = vld [vmem:[%s10517_s0 + $0x160] sm:$0xff]  ;;  %v8617_v47 = vld [vmem:[%s10517_s0 + $0x168] sm:$0xff]  ;;  %v8626_v48 = vld [vmem:[%s10517_s0 + $0x170] sm:$0xff] }
  0x11   :  { %v8631_v49 = vld [vmem:[%s10517_s0 + $0x178] sm:$0xff]  ;;  %v8640_v50 = vld [vmem:[%s10517_s0 + $0x180] sm:$0xff]  ;;  %v8645_v51 = vld [vmem:[%s10517_s0 + $0x188] sm:$0xff] }
  0x12   :  { %6797 = vmatmul.mubr.msk.f32.gmra.mrb[6].mxu0 %vm113_vm0, %v8353_v9  ;;  %v8654_v52 = vld [vmem:[%s10517_s0 + $0x190] sm:$0xff]  ;;  %v8659_v53 = vld [vmem:[%s10517_s0 + $0x198] sm:$0xff]  ;;  %v8668_v54 = vld [vmem:[%s10517_s0 + $0x1a0] sm:$0xff] }
  0x13   :  { %6799 = vmatprep.mubr.msk.f32.mxu0 %vm113_vm0, %v8358_v10  ;;  %v8673_v55 = vld [vmem:[%s10517_s0 + $0x1a8] sm:$0xff]  ;;  %v8682_v56 = vld [vmem:[%s10517_s0 + $0x1b0] sm:$0xff]  ;;  %v8687_v57 = vld [vmem:[%s10517_s0 + $0x1b8] sm:$0xff] }
  0x14   :  { %v8696_v58 = vld [vmem:[%s10517_s0 + $0x1c0] sm:$0xff]  ;;  %v8701_v59 = vld [vmem:[%s10517_s0 + $0x1c8] sm:$0xff]  ;;  %v8710_v60 = vld [vmem:[%s10517_s0 + $0x1d0] sm:$0xff] }
  0x15   :  { %v8715_v61 = vld [vmem:[%s10517_s0 + $0x1e8] sm:$0xff]  ;;  %v8720_v62 = vld [vmem:[%s10517_s0 + $0x1d8] sm:$0xff]  ;;  %v8731_v63 = vld [vmem:[%s10517_s0 + $0x1e0] sm:$0xff] }
  0x16   :  { %6800 = vmatmul.mubr.msk.f32.gmra.mrb[8].mxu0 %vm113_vm0, %v8367_v11  ;;  %6877 = vmatprep.mubr.msk.f32.mxu1 %vm113_vm0, %v8715_v61  ;;  %v44_v0 = vld [vmem:[%s10517_s0] sm:$0xff]  ;;  %v1632_v2 = vld [vmem:[%s10518_s3 + $0x8] sm:$0xff] }
  0x17   :  { %6802 = vmatprep.mubr.msk.f32.mxu0 %vm113_vm0, %v8372_v12  ;;  %7070 = vmatprep.subr.mxu1 %v1632_v2 }
  0x1a   :  { %6803 = vmatmul.mubr.msk.f32.gmra.mrb[10].mxu0 %vm113_vm0, %v8388_v14 }
  0x1b   :  { %6805 = vmatprep.mubr.msk.f32.mxu0 %vm113_vm0, %v8393_v15 }
  0x1e   :  { %6806 = vmatmul.mubr.msk.f32.gmra.mrb[12].mxu0 %vm113_vm0, %v8402_v16 }
  0x1f   :  { %6808 = vmatprep.mubr.msk.f32.mxu0 %vm113_vm0, %v8407_v17 }
  0x22   :  { %6809 = vmatmul.mubr.msk.f32.gmra.mrb[14].mxu0 %vm113_vm0, %v8416_v18 }
  0x23   :  { %6811 = vmatprep.mubr.msk.f32.mxu0 %vm113_vm0, %v8421_v19 }
  0x26   :  { %6812 = vmatmul.mubr.msk.f32.gmra.mrb[16].mxu0 %vm113_vm0, %v8430_v20 }
  0x27   :  { %6814 = vmatprep.mubr.msk.f32.mxu0 %vm113_vm0, %v8435_v21 }
  0x2a   :  { %6815 = vmatmul.mubr.msk.f32.gmra.mrb[18].mxu0 %vm113_vm0, %v8444_v22 }
  0x2b   :  { %6817 = vmatprep.mubr.msk.f32.mxu0 %vm113_vm0, %v8449_v23 }
  0x2e   :  { %6818 = vmatmul.mubr.msk.f32.gmra.mrb[20].mxu0 %vm113_vm0, %v8458_v24 }
  0x2f   :  { %6820 = vmatprep.mubr.msk.f32.mxu0 %vm113_vm0, %v8463_v25 }
  0x32   :  { %6821 = vmatmul.mubr.msk.f32.gmra.mrb[22].mxu0 %vm113_vm0, %v8472_v26 }
  0x33   :  { %6823 = vmatprep.mubr.msk.f32.mxu0 %vm113_vm0, %v8477_v27 }
  0x36   :  { %6824 = vmatmul.mubr.msk.f32.gmra.mrb[24].mxu0 %vm113_vm0, %v8486_v28 }
  0x37   :  { %6826 = vmatprep.mubr.msk.f32.mxu0 %vm113_vm0, %v8491_v29 }
  0x3a   :  { %6827 = vmatmul.mubr.msk.f32.gmra.mrb[26].mxu0 %vm113_vm0, %v8500_v30 }
  0x3b   :  { %6829 = vmatprep.mubr.msk.f32.mxu0 %vm113_vm0, %v8505_v31 }
  0x3e   :  { %6830 = vmatmul.mubr.msk.f32.gmra.mrb[28].mxu0 %vm113_vm0, %v8514_v32 }
  0x3f   :  { %6832 = vmatprep.mubr.msk.f32.mxu0 %vm113_vm0, %v8519_v33 }
  0x42   :  { %6833 = vmatmul.mubr.msk.f32.gmra.mrb[30].mxu0 %vm113_vm0, %v8528_v34 }
  0x43   :  { %6835 = vmatprep.mubr.msk.f32.mxu0 %vm113_vm0, %v8533_v35 }
  0x46   :  { %6836 = vmatmul.mubr.msk.f32.gmra.mrb[32].mxu0 %vm113_vm0, %v8542_v36 }
  0x47   :  { %6838 = vmatprep.mubr.msk.f32.mxu0 %vm113_vm0, %v8547_v37 }
  0x4a   :  { %6839 = vmatmul.mubr.msk.f32.gmra.mrb[34].mxu0 %vm113_vm0, %v8556_v38 }
  0x4b   :  { %6841 = vmatprep.mubr.msk.f32.mxu0 %vm113_vm0, %v8561_v39 }
  0x4e   :  { %6842 = vmatmul.mubr.msk.f32.gmra.mrb[36].mxu0 %vm113_vm0, %v8570_v40 }
  0x4f   :  { %6844 = vmatprep.mubr.msk.f32.mxu0 %vm113_vm0, %v8575_v41 }
  0x52   :  { %6845 = vmatmul.mubr.msk.f32.gmra.mrb[38].mxu0 %vm113_vm0, %v8584_v42 }
  0x53   :  { %6847 = vmatprep.mubr.msk.f32.mxu0 %vm113_vm0, %v8589_v43 }
  0x56   :  { %6848 = vmatmul.mubr.msk.f32.gmra.mrb[40].mxu0 %vm113_vm0, %v8598_v44 }
  0x57   :  { %6850 = vmatprep.mubr.msk.f32.mxu0 %vm113_vm0, %v8603_v45 }
  0x5a   :  { %6851 = vmatmul.mubr.msk.f32.gmra.mrb[42].mxu0 %vm113_vm0, %v8612_v46 }
  0x5b   :  { %6853 = vmatprep.mubr.msk.f32.mxu0 %vm113_vm0, %v8617_v47 }
  0x5e   :  { %6854 = vmatmul.mubr.msk.f32.gmra.mrb[44].mxu0 %vm113_vm0, %v8626_v48 }
  0x5f   :  { %6856 = vmatprep.mubr.msk.f32.mxu0 %vm113_vm0, %v8631_v49 }
  0x62   :  { %6857 = vmatmul.mubr.msk.f32.gmra.mrb[46].mxu0 %vm113_vm0, %v8640_v50 }
  0x63   :  { %6859 = vmatprep.mubr.msk.f32.mxu0 %vm113_vm0, %v8645_v51 }
  0x66   :  { %6860 = vmatmul.mubr.msk.f32.gmra.mrb[48].mxu0 %vm113_vm0, %v8654_v52 }
  0x67   :  { %6862 = vmatprep.mubr.msk.f32.mxu0 %vm113_vm0, %v8659_v53 }
  0x6a   :  { %6863 = vmatmul.mubr.msk.f32.gmra.mrb[50].mxu0 %vm113_vm0, %v8668_v54 }
  0x6b   :  { %6865 = vmatprep.mubr.msk.f32.mxu0 %vm113_vm0, %v8673_v55 }
  0x6e   :  { %6866 = vmatmul.mubr.msk.f32.gmra.mrb[52].mxu0 %vm113_vm0, %v8682_v56 }
  0x6f   :  { %6868 = vmatprep.mubr.msk.f32.mxu0 %vm113_vm0, %v8687_v57 }
  0x72   :  { %6869 = vmatmul.mubr.msk.f32.gmra.mrb[54].mxu0 %vm113_vm0, %v8696_v58 }
  0x73   :  { %6871 = vmatprep.mubr.msk.f32.mxu0 %vm113_vm0, %v8701_v59 }
  0x76   :  { %6872 = vmatmul.mubr.msk.f32.gmra.mrb[56].mxu0 %vm113_vm0, %v8710_v60 }
  0x77   :  { %6874 = vmatprep.mubr.msk.f32.mxu0 %vm113_vm0, %v8720_v62 }
  0x7a   :  { %6875 = vmatmul.mubr.msk.f32.gmra.mrb[58].mxu0 %vm113_vm0, %v8731_v63 }
  0x7b   :  { %6882 = vmatprep.mubr.msk.f32.mxu0 %vm113_vm0, %v44_v0 }
  0x7e   :  { %6883 = vmatmul.mubr.msk.f32.vlgmr.msra.gmra.mrb[0].mxu0 %vm113_vm0, %v8298_v1  ;;  %v8858_v1 = vld [vmem:[%s10517_s0 + $0x1f0] sm:$0xff] }
  0x7f   :  { %6976 = vmatpush3.msk.msra.mxu0 %vm300_vm1, %v8377_v13  ;;  %6885 = vmatprep.mubr.msk.f32.mxu0 %vm113_vm0, %v8305_v3 }
  0x80   :  { %6878 = vmatmul.mubr.msk.f32.vlgmr.msra.gmra.mrb[0].mxu1 %vm113_vm0, %v8858_v1 }
  0x81   :  { %7071 = vmatpush3.msra.mxu1 %v1632_v2 }
  0x82   :  { %6886 = vmatmul.mubr.msk.f32.gmra.mrb[2].mxu0 %vm113_vm0, %v8311_v4 }
  0x83   :  { %6888 = vmatprep.mubr.msk.f32.mxu0 %vm113_vm0, %v8325_v5 }
  0x86   :  { %6889 = vmatmul.mubr.msk.f32.gmra.mrb[4].mxu0 %vm113_vm0, %v8330_v6 }
  0x87   :  { %6891 = vmatprep.mubr.msk.f32.mxu0 %vm113_vm0, %v8339_v7 }
  0x8a   :  { %6892 = vmatmul.mubr.msk.f32.gmra.mrb[6].mxu0 %vm113_vm0, %v8344_v8 }
  0x8b   :  { %6894 = vmatprep.mubr.msk.f32.mxu0 %vm113_vm0, %v8353_v9 }
  0x8e   :  { %6895 = vmatmul.mubr.msk.f32.gmra.mrb[8].mxu0 %vm113_vm0, %v8358_v10 }
  0x8f   :  { %6897 = vmatprep.mubr.msk.f32.mxu0 %vm113_vm0, %v8367_v11 }
  0x92   :  { %6898 = vmatmul.mubr.msk.f32.gmra.mrb[10].mxu0 %vm113_vm0, %v8372_v12 }
  0x93   :  { %6900 = vmatprep.mubr.msk.f32.mxu0 %vm113_vm0, %v8388_v14 }
  0x96   :  { %6901 = vmatmul.mubr.msk.f32.gmra.mrb[12].mxu0 %vm113_vm0, %v8393_v15 }
  0x97   :  { %6903 = vmatprep.mubr.msk.f32.mxu0 %vm113_vm0, %v8402_v16 }
  0x9a   :  { %6904 = vmatmul.mubr.msk.f32.gmra.mrb[14].mxu0 %vm113_vm0, %v8407_v17 }
  0x9b   :  { %6906 = vmatprep.mubr.msk.f32.mxu0 %vm113_vm0, %v8416_v18 }
  0x9e   :  { %6907 = vmatmul.mubr.msk.f32.gmra.mrb[16].mxu0 %vm113_vm0, %v8421_v19 }
  0x9f   :  { %6909 = vmatprep.mubr.msk.f32.mxu0 %vm113_vm0, %v8430_v20 }
  0xa2   :  { %6910 = vmatmul.mubr.msk.f32.gmra.mrb[18].mxu0 %vm113_vm0, %v8435_v21 }
  0xa3   :  { %6912 = vmatprep.mubr.msk.f32.mxu0 %vm113_vm0, %v8444_v22 }
  0xa6   :  { %6913 = vmatmul.mubr.msk.f32.gmra.mrb[20].mxu0 %vm113_vm0, %v8449_v23 }
  0xa7   :  { %6915 = vmatprep.mubr.msk.f32.mxu0 %vm113_vm0, %v8458_v24 }
  0xaa   :  { %6916 = vmatmul.mubr.msk.f32.gmra.mrb[22].mxu0 %vm113_vm0, %v8463_v25 }
  0xab   :  { %6918 = vmatprep.mubr.msk.f32.mxu0 %vm113_vm0, %v8472_v26 }
  0xae   :  { %6919 = vmatmul.mubr.msk.f32.gmra.mrb[24].mxu0 %vm113_vm0, %v8477_v27 }
  0xaf   :  { %6921 = vmatprep.mubr.msk.f32.mxu0 %vm113_vm0, %v8486_v28 }
  0xb2   :  { %6922 = vmatmul.mubr.msk.f32.gmra.mrb[26].mxu0 %vm113_vm0, %v8491_v29 }
  0xb3   :  { %6924 = vmatprep.mubr.msk.f32.mxu0 %vm113_vm0, %v8500_v30 }
  0xb6   :  { %6925 = vmatmul.mubr.msk.f32.gmra.mrb[28].mxu0 %vm113_vm0, %v8505_v31 }
  0xb7   :  { %6927 = vmatprep.mubr.msk.f32.mxu0 %vm113_vm0, %v8514_v32 }
  0xba   :  { %6928 = vmatmul.mubr.msk.f32.gmra.mrb[30].mxu0 %vm113_vm0, %v8519_v33 }
  0xbb   :  { %6930 = vmatprep.mubr.msk.f32.mxu0 %vm113_vm0, %v8528_v34 }
  0xbe   :  { %6931 = vmatmul.mubr.msk.f32.gmra.mrb[32].mxu0 %vm113_vm0, %v8533_v35 }
  0xbf   :  { %6933 = vmatprep.mubr.msk.f32.mxu0 %vm113_vm0, %v8542_v36 }
  0xc2   :  { %6934 = vmatmul.mubr.msk.f32.gmra.mrb[34].mxu0 %vm113_vm0, %v8547_v37 }
  0xc3   :  { %6936 = vmatprep.mubr.msk.f32.mxu0 %vm113_vm0, %v8556_v38 }
  0xc6   :  { %6937 = vmatmul.mubr.msk.f32.gmra.mrb[36].mxu0 %vm113_vm0, %v8561_v39 }
  0xc7   :  { %6939 = vmatprep.mubr.msk.f32.mxu0 %vm113_vm0, %v8570_v40 }
  0xca   :  { %6940 = vmatmul.mubr.msk.f32.gmra.mrb[38].mxu0 %vm113_vm0, %v8575_v41 }
  0xcb   :  { %6942 = vmatprep.mubr.msk.f32.mxu0 %vm113_vm0, %v8584_v42 }
  0xce   :  { %6943 = vmatmul.mubr.msk.f32.gmra.mrb[40].mxu0 %vm113_vm0, %v8589_v43 }
  0xcf   :  { %6945 = vmatprep.mubr.msk.f32.mxu0 %vm113_vm0, %v8598_v44 }
  0xd2   :  { %6946 = vmatmul.mubr.msk.f32.gmra.mrb[42].mxu0 %vm113_vm0, %v8603_v45 }
  0xd3   :  { %6948 = vmatprep.mubr.msk.f32.mxu0 %vm113_vm0, %v8612_v46 }
  0xd6   :  { %6949 = vmatmul.mubr.msk.f32.gmra.mrb[44].mxu0 %vm113_vm0, %v8617_v47 }
  0xd7   :  { %6951 = vmatprep.mubr.msk.f32.mxu0 %vm113_vm0, %v8626_v48 }
  0xda   :  { %6952 = vmatmul.mubr.msk.f32.gmra.mrb[46].mxu0 %vm113_vm0, %v8631_v49 }
  0xdb   :  { %6954 = vmatprep.mubr.msk.f32.mxu0 %vm113_vm0, %v8640_v50 }
  0xde   :  { %6955 = vmatmul.mubr.msk.f32.gmra.mrb[48].mxu0 %vm113_vm0, %v8645_v51 }
  0xdf   :  { %6957 = vmatprep.mubr.msk.f32.mxu0 %vm113_vm0, %v8654_v52 }
  0xe2   :  { %6958 = vmatmul.mubr.msk.f32.gmra.mrb[50].mxu0 %vm113_vm0, %v8659_v53 }
  0xe3   :  { %6960 = vmatprep.mubr.msk.f32.mxu0 %vm113_vm0, %v8668_v54 }
  0xe6   :  { %6961 = vmatmul.mubr.msk.f32.gmra.mrb[52].mxu0 %vm113_vm0, %v8673_v55 }
  0xe7   :  { %6963 = vmatprep.mubr.msk.f32.mxu0 %vm113_vm0, %v8682_v56 }
  0xea   :  { %6964 = vmatmul.mubr.msk.f32.gmra.mrb[54].mxu0 %vm113_vm0, %v8687_v57 }
  0xeb   :  { %6966 = vmatprep.mubr.msk.f32.mxu0 %vm113_vm0, %v8696_v58 }
  0xee   :  { %6967 = vmatmul.mubr.msk.f32.gmra.mrb[56].mxu0 %vm113_vm0, %v8701_v59 }
  0xef   :  { %6969 = vmatprep.mubr.msk.f32.mxu0 %vm113_vm0, %v8710_v60 }
  0xf2   :  { %6970 = vmatmul.mubr.msk.f32.gmra.mrb[58].mxu0 %vm113_vm0, %v8720_v62 }
  0xf3   :  { %6972 = vmatprep.mubr.msk.f32.mxu0 %vm113_vm0, %v8731_v63 }
  0xf6   :  { %6973 = vmatmul.mubr.msk.f32.gmra.mrb[60].mxu0 %vm113_vm0, %v8715_v61 }
  0xf7   :  { %6977 = vmatprep.mubr.msk.f32.mxu0 %vm113_vm0, %v8305_v3  ;;  %v1631_v3 = vld [vmem:[%s10518_s3] sm:$0xff] }
  0xf8   :  { %7162 = vmatprep.subr.mxu1 %v1631_v3 }
  0xfa   :  { %6978 = vmatmul.mubr.msk.f32.vlgmr.msra.gmra.mrb[0].mxu0 %vm113_vm0, %v8311_v4  ;;  %v107_v4 = vld [vmem:[%s10517_s0 + $0x1f8] sm:$0xff] }
  0xfb   :  { %6980 = vmatprep.mubr.msk.f32.mxu0 %vm113_vm0, %v8325_v5 }
  0xfe   :  { %6981 = vmatmul.mubr.msk.f32.gmra.mrb[2].mxu0 %vm113_vm0, %v8330_v6 }
  0xff   :  { %6983 = vmatprep.mubr.msk.f32.mxu0 %vm113_vm0, %v8339_v7  ;;  %v9009_v7 = vld [vmem:[%s10519_s2] ss:$0 sm:$0xff] }
 0x102   :  { %6984 = vmatmul.mubr.msk.f32.gmra.mrb[4].mxu0 %vm113_vm0, %v8344_v8 }
 0x103   :  { %6986 = vmatprep.mubr.msk.f32.mxu0 %vm113_vm0, %v8353_v9 }
 0x106   :  { %6987 = vmatmul.mubr.msk.f32.gmra.mrb[6].mxu0 %vm113_vm0, %v8358_v10 }
 0x107   :  { %6989 = vmatprep.mubr.msk.f32.mxu0 %vm113_vm0, %v8367_v11 }
 0x10a   :  { %6990 = vmatmul.mubr.msk.f32.gmra.mrb[8].mxu0 %vm113_vm0, %v8372_v12 }
 0x10b   :  { %6992 = vmatprep.mubr.msk.f32.mxu0 %vm113_vm0, %v8388_v14 }
 0x10e   :  { %6993 = vmatmul.mubr.msk.f32.gmra.mrb[10].mxu0 %vm113_vm0, %v8393_v15 }
 0x10f   :  { %6995 = vmatprep.mubr.msk.f32.mxu0 %vm113_vm0, %v8402_v16 }
 0x112   :  { %6996 = vmatmul.mubr.msk.f32.gmra.mrb[12].mxu0 %vm113_vm0, %v8407_v17 }
 0x113   :  { %6998 = vmatprep.mubr.msk.f32.mxu0 %vm113_vm0, %v8416_v18 }
 0x116   :  { %6999 = vmatmul.mubr.msk.f32.gmra.mrb[14].mxu0 %vm113_vm0, %v8421_v19 }
 0x117   :  { %7001 = vmatprep.mubr.msk.f32.mxu0 %vm113_vm0, %v8430_v20 }
 0x11a   :  { %7002 = vmatmul.mubr.msk.f32.gmra.mrb[16].mxu0 %vm113_vm0, %v8435_v21  ;;  %v9030_v21 = vld [vmem:[%s10518_s3 + $0x10] sm:$0xff] }
 0x11b   :  { %7004 = vmatprep.mubr.msk.f32.mxu0 %vm113_vm0, %v8444_v22 }
 0x11e   :  { %7005 = vmatmul.mubr.msk.f32.gmra.mrb[18].mxu0 %vm113_vm0, %v8449_v23 }
 0x11f   :  { %7007 = vmatprep.mubr.msk.f32.mxu0 %vm113_vm0, %v8458_v24 }
 0x122   :  { %7008 = vmatmul.mubr.msk.f32.gmra.mrb[20].mxu0 %vm113_vm0, %v8463_v25 }
 0x123   :  { %7010 = vmatprep.mubr.msk.f32.mxu0 %vm113_vm0, %v8472_v26 }
 0x126   :  { %7011 = vmatmul.mubr.msk.f32.gmra.mrb[22].mxu0 %vm113_vm0, %v8477_v27 }
 0x127   :  { %7013 = vmatprep.mubr.msk.f32.mxu0 %vm113_vm0, %v8486_v28 }
 0x12a   :  { %7014 = vmatmul.mubr.msk.f32.gmra.mrb[24].mxu0 %vm113_vm0, %v8491_v29 }
 0x12b   :  { %7016 = vmatprep.mubr.msk.f32.mxu0 %vm113_vm0, %v8500_v30 }
 0x12e   :  { %7017 = vmatmul.mubr.msk.f32.gmra.mrb[26].mxu0 %vm113_vm0, %v8505_v31 }
 0x12f   :  { %7019 = vmatprep.mubr.msk.f32.mxu0 %vm113_vm0, %v8514_v32 }
 0x132   :  { %7020 = vmatmul.mubr.msk.f32.gmra.mrb[28].mxu0 %vm113_vm0, %v8519_v33 }
 0x133   :  { %7022 = vmatprep.mubr.msk.f32.mxu0 %vm113_vm0, %v8528_v34 }
 0x136   :  { %7023 = vmatmul.mubr.msk.f32.gmra.mrb[30].mxu0 %vm113_vm0, %v8533_v35 }
 0x137   :  { %7025 = vmatprep.mubr.msk.f32.mxu0 %vm113_vm0, %v8542_v36 }
 0x13a   :  { %7026 = vmatmul.mubr.msk.f32.gmra.mrb[32].mxu0 %vm113_vm0, %v8547_v37 }
 0x13b   :  { %7028 = vmatprep.mubr.msk.f32.mxu0 %vm113_vm0, %v8556_v38 }
 0x13e   :  { %7029 = vmatmul.mubr.msk.f32.gmra.mrb[34].mxu0 %vm113_vm0, %v8561_v39 }
 0x13f   :  { %7031 = vmatprep.mubr.msk.f32.mxu0 %vm113_vm0, %v8570_v40 }
 0x142   :  { %7032 = vmatmul.mubr.msk.f32.gmra.mrb[36].mxu0 %vm113_vm0, %v8575_v41 }
 0x143   :  { %7034 = vmatprep.mubr.msk.f32.mxu0 %vm113_vm0, %v8584_v42 }
 0x146   :  { %7035 = vmatmul.mubr.msk.f32.gmra.mrb[38].mxu0 %vm113_vm0, %v8589_v43 }
 0x147   :  { %7037 = vmatprep.mubr.msk.f32.mxu0 %vm113_vm0, %v8598_v44 }
 0x14a   :  { %7038 = vmatmul.mubr.msk.f32.gmra.mrb[40].mxu0 %vm113_vm0, %v8603_v45 }
 0x14b   :  { %7040 = vmatprep.mubr.msk.f32.mxu0 %vm113_vm0, %v8612_v46 }
 0x14e   :  { %7041 = vmatmul.mubr.msk.f32.gmra.mrb[42].mxu0 %vm113_vm0, %v8617_v47 }
 0x14f   :  { %7043 = vmatprep.mubr.msk.f32.mxu0 %vm113_vm0, %v8626_v48 }
 0x152   :  { %7044 = vmatmul.mubr.msk.f32.gmra.mrb[44].mxu0 %vm113_vm0, %v8631_v49 }
 0x153   :  { %7046 = vmatprep.mubr.msk.f32.mxu0 %vm113_vm0, %v8640_v50  ;;  %v9002_v5 = vpop.f32.mrb[0].mxu1 }
 0x154   :  { %v9004_v6 = vpop.f32.mrb[1].mxu1 }
 0x156   :  { %7047 = vmatmul.mubr.msk.f32.gmra.mrb[46].mxu0 %vm113_vm0, %v8645_v51 }
 0x157   :  { %7049 = vmatprep.mubr.msk.f32.mxu0 %vm113_vm0, %v8654_v52 }
 0x15a   :  { %7050 = vmatmul.mubr.msk.f32.gmra.mrb[48].mxu0 %vm113_vm0, %v8659_v53 }
 0x15b   :  { %7052 = vmatprep.mubr.msk.f32.mxu0 %vm113_vm0, %v8668_v54 }
 0x15e   :  { %7053 = vmatmul.mubr.msk.f32.gmra.mrb[50].mxu0 %vm113_vm0, %v8673_v55 }
 0x15f   :  { %7055 = vmatprep.mubr.msk.f32.mxu0 %vm113_vm0, %v8682_v56 }
 0x162   :  { %7056 = vmatmul.mubr.msk.f32.gmra.mrb[52].mxu0 %vm113_vm0, %v8687_v57 }
 0x163   :  { %7058 = vmatprep.mubr.msk.f32.mxu0 %vm113_vm0, %v8696_v58 }
 0x166   :  { %7059 = vmatmul.mubr.msk.f32.gmra.mrb[54].mxu0 %vm113_vm0, %v8701_v59 }
 0x167   :  { %7061 = vmatprep.mubr.msk.f32.mxu0 %vm113_vm0, %v8710_v60 }
 0x16a   :  { %7062 = vmatmul.mubr.msk.f32.gmra.mrb[56].mxu0 %vm113_vm0, %v8720_v62 }
 0x16b   :  { %7064 = vmatprep.mubr.msk.f32.mxu0 %vm113_vm0, %v8731_v63 }
 0x16e   :  { %7065 = vmatmul.mubr.msk.f32.gmra.mrb[58].mxu0 %vm113_vm0, %v8715_v61 }
 0x16f   :  { %7067 = vmatprep.mubr.msk.f32.mxu0 %vm113_vm0, %v8858_v1 }
 0x172   :  { %7068 = vmatmul.mubr.msk.f32.gmra.mrb[60].mxu0 %vm113_vm0, %v107_v4 }
 0x1cd   :  { %v6979_v8 = vpop.f32.mrb[0].mxu0 }
 0x1ce   :  { %v9012_v9 = vadd.f32 %v6979_v8, %v9009_v7  ;;  %v9014_v10 = vpop.f32.mrb[1].mxu0 }
 0x1d0   :  { %v10530_v11 = vmax.f32 %v9012_v9, 0.0 }
 0x1d1   :  { %v6982_v12 = vpop.f32.mrb[2].mxu0 }
 0x1d2   :  { %v1510_v13 = vadd.f32 %v6982_v12, %v9009_v7  ;;  %v1140_v14 = vpop.f32.mrb[3].mxu0  ;;  %7072 = vmatprep.mubr.msk.f32.mxu1 %vm1635_vm2, %v10530_v11 }
 0x1d3   :  { %v1509_v15 = vadd.f32 %v9009_v7, %v1140_v14 }
 0x1d4   :  { %v9024_v18 = vmax.f32 %v1510_v13, 0.0 }
 0x1d5   :  { %v9022_v16 = vmax.f32 %v1509_v15, 0.0  ;;  %v6985_v17 = vpop.f32.mrb[4].mxu0 }
 0x1d6   :  { %v1512_v19 = vadd.f32 %v6985_v17, %v9009_v7  ;;  %v1150_v20 = vpop.f32.mrb[5].mxu0 }
 0x1d7   :  { %v1511_v22 = vadd.f32 %v9009_v7, %v1150_v20  ;;  %7073 = vmatmul.mubr.msk.f32.vlgmr.msra.gmra.mrb[2].mxu1 %vm1635_vm2, %v9022_v16 }
 0x1d8   :  { %7075 = vmatprep.mubr.msk.f32.mxu1 %vm1635_vm2, %v9024_v18  ;;  %7163 = vmatpush3.msra.mxu1 %v1631_v3  ;;  %v9040_v25 = vmax.f32 %v1512_v19, 0.0 }
 0x1d9   :  { %v9037_v23 = vmax.f32 %v1511_v22, 0.0  ;;  %v6988_v24 = vpop.f32.mrb[6].mxu0  ;;  %7254 = vmatprep.subr.mxu1 %v9030_v21 }
 0x1da   :  { %v1514_v26 = vadd.f32 %v6988_v24, %v9009_v7  ;;  %v1160_v27 = vpop.f32.mrb[7].mxu0 }
 0x1db   :  { %v1513_v28 = vadd.f32 %v9009_v7, %v1160_v27  ;;  %7076 = vmatmul.mubr.msk.f32.gmra.mrb[4].mxu1 %vm1635_vm2, %v9037_v23 }
 0x1dc   :  { %7078 = vmatprep.mubr.msk.f32.mxu1 %vm1635_vm2, %v9040_v25  ;;  %v9050_v31 = vmax.f32 %v1514_v26, 0.0 }
 0x1dd   :  { %v9048_v29 = vmax.f32 %v1513_v28, 0.0  ;;  %v6991_v30 = vpop.f32.mrb[8].mxu0 }
 0x1de   :  { %v1516_v32 = vadd.f32 %v6991_v30, %v9009_v7  ;;  %v1170_v33 = vpop.f32.mrb[9].mxu0 }
 0x1df   :  { %v1515_v34 = vadd.f32 %v9009_v7, %v1170_v33  ;;  %7079 = vmatmul.mubr.msk.f32.gmra.mrb[6].mxu1 %vm1635_vm2, %v9048_v29 }
 0x1e0   :  { %7081 = vmatprep.mubr.msk.f32.mxu1 %vm1635_vm2, %v9050_v31  ;;  %v9060_v37 = vmax.f32 %v1516_v32, 0.0 }
 0x1e1   :  { %v9058_v35 = vmax.f32 %v1515_v34, 0.0  ;;  %v6994_v36 = vpop.f32.mrb[10].mxu0 }
 0x1e2   :  { %v1518_v38 = vadd.f32 %v6994_v36, %v9009_v7  ;;  %v1180_v39 = vpop.f32.mrb[11].mxu0 }
 0x1e3   :  { %v1517_v40 = vadd.f32 %v9009_v7, %v1180_v39  ;;  %7082 = vmatmul.mubr.msk.f32.gmra.mrb[8].mxu1 %vm1635_vm2, %v9058_v35 }
 0x1e4   :  { %7084 = vmatprep.mubr.msk.f32.mxu1 %vm1635_vm2, %v9060_v37  ;;  %v9070_v43 = vmax.f32 %v1518_v38, 0.0 }
 0x1e5   :  { %v9068_v41 = vmax.f32 %v1517_v40, 0.0  ;;  %v6997_v42 = vpop.f32.mrb[12].mxu0 }
 0x1e6   :  { %v1520_v44 = vadd.f32 %v6997_v42, %v9009_v7  ;;  %v1190_v45 = vpop.f32.mrb[13].mxu0 }
 0x1e7   :  { %v1519_v46 = vadd.f32 %v9009_v7, %v1190_v45  ;;  %7085 = vmatmul.mubr.msk.f32.gmra.mrb[10].mxu1 %vm1635_vm2, %v9068_v41 }
 0x1e8   :  { %7087 = vmatprep.mubr.msk.f32.mxu1 %vm1635_vm2, %v9070_v43  ;;  %v9080_v49 = vmax.f32 %v1520_v44, 0.0 }
 0x1e9   :  { %v9078_v47 = vmax.f32 %v1519_v46, 0.0  ;;  %v7000_v48 = vpop.f32.mrb[14].mxu0 }
 0x1ea   :  { %v1522_v50 = vadd.f32 %v7000_v48, %v9009_v7  ;;  %v1200_v51 = vpop.f32.mrb[15].mxu0 }
 0x1eb   :  { %v1521_v52 = vadd.f32 %v9009_v7, %v1200_v51  ;;  %7088 = vmatmul.mubr.msk.f32.gmra.mrb[12].mxu1 %vm1635_vm2, %v9078_v47 }
 0x1ec   :  { %7090 = vmatprep.mubr.msk.f32.mxu1 %vm1635_vm2, %v9080_v49  ;;  %v9090_v55 = vmax.f32 %v1522_v50, 0.0 }
 0x1ed   :  { %v9088_v53 = vmax.f32 %v1521_v52, 0.0  ;;  %v7003_v54 = vpop.f32.mrb[16].mxu0 }
 0x1ee   :  { %v1524_v56 = vadd.f32 %v7003_v54, %v9009_v7  ;;  %v1210_v57 = vpop.f32.mrb[17].mxu0 }
 0x1ef   :  { %v1523_v58 = vadd.f32 %v9009_v7, %v1210_v57  ;;  %7091 = vmatmul.mubr.msk.f32.gmra.mrb[14].mxu1 %vm1635_vm2, %v9088_v53 }
 0x1f0   :  { %7093 = vmatprep.mubr.msk.f32.mxu1 %vm1635_vm2, %v9090_v55  ;;  %v9100_v61 = vmax.f32 %v1524_v56, 0.0 }
 0x1f1   :  { %v9098_v59 = vmax.f32 %v1523_v58, 0.0  ;;  %v7006_v60 = vpop.f32.mrb[18].mxu0 }
 0x1f2   :  { %v1526_v62 = vadd.f32 %v7006_v60, %v9009_v7  ;;  %v1220_v63 = vpop.f32.mrb[19].mxu0 }
 0x1f3   :  { %v1525_v0 = vadd.f32 %v9009_v7, %v1220_v63  ;;  %7094 = vmatmul.mubr.msk.f32.gmra.mrb[16].mxu1 %vm1635_vm2, %v9098_v59 }
 0x1f4   :  { %7096 = vmatprep.mubr.msk.f32.mxu1 %vm1635_vm2, %v9100_v61  ;;  %v9110_v3 = vmax.f32 %v1526_v62, 0.0 }
 0x1f5   :  { %v9108_v1 = vmax.f32 %v1525_v0, 0.0  ;;  %v7009_v2 = vpop.f32.mrb[20].mxu0 }
 0x1f6   :  { %v1528_v4 = vadd.f32 %v7009_v2, %v9009_v7  ;;  %v1230_v8 = vpop.f32.mrb[21].mxu0 }
 0x1f7   :  { %v1527_v12 = vadd.f32 %v9009_v7, %v1230_v8  ;;  %7097 = vmatmul.mubr.msk.f32.gmra.mrb[18].mxu1 %vm1635_vm2, %v9108_v1 }
 0x1f8   :  { %7099 = vmatprep.mubr.msk.f32.mxu1 %vm1635_vm2, %v9110_v3  ;;  %v9120_v15 = vmax.f32 %v1528_v4, 0.0 }
 0x1f9   :  { %v9118_v13 = vmax.f32 %v1527_v12, 0.0  ;;  %v7012_v14 = vpop.f32.mrb[22].mxu0 }
 0x1fa   :  { %v1530_v17 = vadd.f32 %v7012_v14, %v9009_v7  ;;  %v1240_v19 = vpop.f32.mrb[23].mxu0 }
 0x1fb   :  { %v1529_v20 = vadd.f32 %v9009_v7, %v1240_v19  ;;  %7100 = vmatmul.mubr.msk.f32.gmra.mrb[20].mxu1 %vm1635_vm2, %v9118_v13 }
 0x1fc   :  { %7102 = vmatprep.mubr.msk.f32.mxu1 %vm1635_vm2, %v9120_v15  ;;  %v9130_v26 = vmax.f32 %v1530_v17, 0.0 }
 0x1fd   :  { %v9128_v22 = vmax.f32 %v1529_v20, 0.0  ;;  %v7015_v24 = vpop.f32.mrb[24].mxu0 }
 0x1fe   :  { %v1532_v27 = vadd.f32 %v7015_v24, %v9009_v7  ;;  %v1250_v28 = vpop.f32.mrb[25].mxu0 }
 0x1ff   :  { %v1531_v30 = vadd.f32 %v9009_v7, %v1250_v28  ;;  %7103 = vmatmul.mubr.msk.f32.gmra.mrb[22].mxu1 %vm1635_vm2, %v9128_v22 }
 0x200   :  { %7105 = vmatprep.mubr.msk.f32.mxu1 %vm1635_vm2, %v9130_v26  ;;  %v9140_v34 = vmax.f32 %v1532_v27, 0.0 }
 0x201   :  { %v9138_v32 = vmax.f32 %v1531_v30, 0.0  ;;  %v7018_v33 = vpop.f32.mrb[26].mxu0 }
 0x202   :  { %v1534_v36 = vadd.f32 %v7018_v33, %v9009_v7  ;;  %v1260_v38 = vpop.f32.mrb[27].mxu0 }
 0x203   :  { %v1533_v39 = vadd.f32 %v9009_v7, %v1260_v38  ;;  %7106 = vmatmul.mubr.msk.f32.gmra.mrb[24].mxu1 %vm1635_vm2, %v9138_v32 }
 0x204   :  { %7108 = vmatprep.mubr.msk.f32.mxu1 %vm1635_vm2, %v9140_v34  ;;  %v9150_v44 = vmax.f32 %v1534_v36, 0.0 }
 0x205   :  { %v9148_v40 = vmax.f32 %v1533_v39, 0.0  ;;  %v7021_v42 = vpop.f32.mrb[28].mxu0 }
 0x206   :  { %v1536_v45 = vadd.f32 %v7021_v42, %v9009_v7  ;;  %v1270_v46 = vpop.f32.mrb[29].mxu0 }
 0x207   :  { %v1535_v48 = vadd.f32 %v9009_v7, %v1270_v46  ;;  %7109 = vmatmul.mubr.msk.f32.gmra.mrb[26].mxu1 %vm1635_vm2, %v9148_v40 }
 0x208   :  { %7111 = vmatprep.mubr.msk.f32.mxu1 %vm1635_vm2, %v9150_v44  ;;  %v9160_v52 = vmax.f32 %v1536_v45, 0.0 }
 0x209   :  { %v9158_v50 = vmax.f32 %v1535_v48, 0.0  ;;  %v7024_v51 = vpop.f32.mrb[30].mxu0 }
 0x20a   :  { %v1538_v54 = vadd.f32 %v7024_v51, %v9009_v7  ;;  %v1280_v56 = vpop.f32.mrb[31].mxu0 }
 0x20b   :  { %v1537_v57 = vadd.f32 %v9009_v7, %v1280_v56  ;;  %7112 = vmatmul.mubr.msk.f32.gmra.mrb[28].mxu1 %vm1635_vm2, %v9158_v50 }
 0x20c   :  { %7114 = vmatprep.mubr.msk.f32.mxu1 %vm1635_vm2, %v9160_v52  ;;  %v9170_v62 = vmax.f32 %v1538_v54, 0.0 }
 0x20d   :  { %v9168_v58 = vmax.f32 %v1537_v57, 0.0  ;;  %v7027_v60 = vpop.f32.mrb[32].mxu0 }
 0x20e   :  { %v1540_v63 = vadd.f32 %v7027_v60, %v9009_v7  ;;  %v1290_v0 = vpop.f32.mrb[33].mxu0 }
 0x20f   :  { %v1539_v2 = vadd.f32 %v9009_v7, %v1290_v0  ;;  %7115 = vmatmul.mubr.msk.f32.gmra.mrb[30].mxu1 %vm1635_vm2, %v9168_v58 }
 0x210   :  { %7117 = vmatprep.mubr.msk.f32.mxu1 %vm1635_vm2, %v9170_v62  ;;  %v9180_v12 = vmax.f32 %v1540_v63, 0.0 }
 0x211   :  { %v9178_v4 = vmax.f32 %v1539_v2, 0.0  ;;  %v7030_v8 = vpop.f32.mrb[34].mxu0 }
 0x212   :  { %v1542_v14 = vadd.f32 %v7030_v8, %v9009_v7  ;;  %v1300_v17 = vpop.f32.mrb[35].mxu0 }
 0x213   :  { %v1541_v19 = vadd.f32 %v9009_v7, %v1300_v17  ;;  %7118 = vmatmul.mubr.msk.f32.gmra.mrb[32].mxu1 %vm1635_vm2, %v9178_v4 }
 0x214   :  { %7120 = vmatprep.mubr.msk.f32.mxu1 %vm1635_vm2, %v9180_v12  ;;  %v9190_v27 = vmax.f32 %v1542_v14, 0.0 }
 0x215   :  { %v9188_v20 = vmax.f32 %v1541_v19, 0.0  ;;  %v7033_v24 = vpop.f32.mrb[36].mxu0 }
 0x216   :  { %v1544_v28 = vadd.f32 %v7033_v24, %v9009_v7  ;;  %v1310_v30 = vpop.f32.mrb[37].mxu0 }
 0x217   :  { %v1543_v33 = vadd.f32 %v9009_v7, %v1310_v30  ;;  %7121 = vmatmul.mubr.msk.f32.gmra.mrb[34].mxu1 %vm1635_vm2, %v9188_v20 }
 0x218   :  { %7123 = vmatprep.mubr.msk.f32.mxu1 %vm1635_vm2, %v9190_v27  ;;  %v9200_v39 = vmax.f32 %v1544_v28, 0.0 }
 0x219   :  { %v9198_v36 = vmax.f32 %v1543_v33, 0.0  ;;  %v7036_v38 = vpop.f32.mrb[38].mxu0 }
 0x21a   :  { %v1546_v42 = vadd.f32 %v7036_v38, %v9009_v7  ;;  %v1320_v45 = vpop.f32.mrb[39].mxu0 }
 0x21b   :  { %v1545_v46 = vadd.f32 %v9009_v7, %v1320_v45  ;;  %7124 = vmatmul.mubr.msk.f32.gmra.mrb[36].mxu1 %vm1635_vm2, %v9198_v36 }
 0x21c   :  { %7126 = vmatprep.mubr.msk.f32.mxu1 %vm1635_vm2, %v9200_v39  ;;  %v9210_v54 = vmax.f32 %v1546_v42, 0.0 }
 0x21d   :  { %v9208_v48 = vmax.f32 %v1545_v46, 0.0  ;;  %v7039_v51 = vpop.f32.mrb[40].mxu0 }
 0x21e   :  { %v1548_v56 = vadd.f32 %v7039_v51, %v9009_v7  ;;  %v1330_v57 = vpop.f32.mrb[41].mxu0 }
 0x21f   :  { %v1547_v60 = vadd.f32 %v9009_v7, %v1330_v57  ;;  %7127 = vmatmul.mubr.msk.f32.gmra.mrb[38].mxu1 %vm1635_vm2, %v9208_v48 }
 0x220   :  { %7129 = vmatprep.mubr.msk.f32.mxu1 %vm1635_vm2, %v9210_v54  ;;  %v9220_v2 = vmax.f32 %v1548_v56, 0.0 }
 0x221   :  { %v9218_v63 = vmax.f32 %v1547_v60, 0.0  ;;  %v7042_v0 = vpop.f32.mrb[42].mxu0 }
 0x222   :  { %v1550_v8 = vadd.f32 %v7042_v0, %v9009_v7  ;;  %v1340_v14 = vpop.f32.mrb[43].mxu0 }
 0x223   :  { %v1549_v17 = vadd.f32 %v9009_v7, %v1340_v14  ;;  %7130 = vmatmul.mubr.msk.f32.gmra.mrb[40].mxu1 %vm1635_vm2, %v9218_v63 }
 0x224   :  { %7132 = vmatprep.mubr.msk.f32.mxu1 %vm1635_vm2, %v9220_v2  ;;  %v9230_v28 = vmax.f32 %v1550_v8, 0.0 }
 0x225   :  { %v9228_v19 = vmax.f32 %v1549_v17, 0.0  ;;  %v7045_v24 = vpop.f32.mrb[44].mxu0 }
 0x226   :  { %v1552_v30 = vadd.f32 %v7045_v24, %v9009_v7  ;;  %v1350_v33 = vpop.f32.mrb[45].mxu0 }
 0x227   :  { %v1551_v38 = vadd.f32 %v9009_v7, %v1350_v33  ;;  %7133 = vmatmul.mubr.msk.f32.gmra.mrb[42].mxu1 %vm1635_vm2, %v9228_v19 }
 0x228   :  { %7135 = vmatprep.mubr.msk.f32.mxu1 %vm1635_vm2, %v9230_v28  ;;  %v9240_v46 = vmax.f32 %v1552_v30, 0.0 }
 0x229   :  { %v9238_v42 = vmax.f32 %v1551_v38, 0.0  ;;  %v7048_v45 = vpop.f32.mrb[46].mxu0 }
 0x22a   :  { %v1554_v51 = vadd.f32 %v7048_v45, %v9009_v7  ;;  %v1360_v56 = vpop.f32.mrb[47].mxu0 }
 0x22b   :  { %v1553_v57 = vadd.f32 %v9009_v7, %v1360_v56  ;;  %7136 = vmatmul.mubr.msk.f32.gmra.mrb[44].mxu1 %vm1635_vm2, %v9238_v42 }
 0x22c   :  { %7138 = vmatprep.mubr.msk.f32.mxu1 %vm1635_vm2, %v9240_v46  ;;  %v9250_v8 = vmax.f32 %v1554_v51, 0.0 }
 0x22d   :  { %v9248_v60 = vmax.f32 %v1553_v57, 0.0  ;;  %v7051_v0 = vpop.f32.mrb[48].mxu0 }
 0x22e   :  { %v1556_v14 = vadd.f32 %v7051_v0, %v9009_v7  ;;  %v1370_v17 = vpop.f32.mrb[49].mxu0 }
 0x22f   :  { %v1555_v24 = vadd.f32 %v9009_v7, %v1370_v17  ;;  %7139 = vmatmul.mubr.msk.f32.gmra.mrb[46].mxu1 %vm1635_vm2, %v9248_v60 }
 0x230   :  { %7141 = vmatprep.mubr.msk.f32.mxu1 %vm1635_vm2, %v9250_v8  ;;  %v9260_v38 = vmax.f32 %v1556_v14, 0.0 }
 0x231   :  { %v9258_v30 = vmax.f32 %v1555_v24, 0.0  ;;  %v7054_v33 = vpop.f32.mrb[50].mxu0 }
 0x232   :  { %10548 = vst [vmem:[#allocation3_spill] sm:$0xff] %v9260_v38  ;;  %v1558_v45 = vadd.f32 %v7054_v33, %v9009_v7  ;;  %v1380_v51 = vpop.f32.mrb[51].mxu0 }
 0x233   :  { %10547 = vst [vmem:[#allocation2_spill] sm:$0xff] %v9258_v30  ;;  %v1557_v56 = vadd.f32 %v9009_v7, %v1380_v51  ;;  %7142 = vmatmul.mubr.msk.f32.gmra.mrb[48].mxu1 %vm1635_vm2, %v9258_v30 }
 0x234   :  { %7144 = vmatprep.mubr.msk.f32.mxu1 %vm1635_vm2, %v9260_v38  ;;  %v9270_v17 = vmax.f32 %v1558_v45, 0.0 }
 0x235   :  { %v9268_v57 = vmax.f32 %v1557_v56, 0.0  ;;  %v7057_v0 = vpop.f32.mrb[52].mxu0 }
 0x236   :  { %10550 = vst [vmem:[#allocation5_spill] sm:$0xff] %v9270_v17  ;;  %v1560_v24 = vadd.f32 %v7057_v0, %v9009_v7  ;;  %v1390_v14 = vpop.f32.mrb[53].mxu0 }
 0x237   :  { %10549 = vst [vmem:[#allocation4_spill] sm:$0xff] %v9268_v57  ;;  %v1559_v11 = vadd.f32 %v9009_v7, %v1390_v14  ;;  %7145 = vmatmul.mubr.msk.f32.gmra.mrb[50].mxu1 %vm1635_vm2, %v9268_v57 }
 0x238   :  { %7147 = vmatprep.mubr.msk.f32.mxu1 %vm1635_vm2, %v9270_v17  ;;  %v9280_v38 = vmax.f32 %v1560_v24, 0.0 }
 0x239   :  { %v9278_v33 = vmax.f32 %v1559_v11, 0.0  ;;  %v7060_v51 = vpop.f32.mrb[54].mxu0 }
 0x23a   :  { %10552 = vst [vmem:[#allocation7_spill] sm:$0xff] %v9280_v38  ;;  %v1562_v56 = vadd.f32 %v7060_v51, %v9009_v7  ;;  %v1400_v45 = vpop.f32.mrb[55].mxu0 }
 0x23b   :  { %10551 = vst [vmem:[#allocation6_spill] sm:$0xff] %v9278_v33  ;;  %v1561_v30 = vadd.f32 %v9009_v7, %v1400_v45  ;;  %7148 = vmatmul.mubr.msk.f32.gmra.mrb[52].mxu1 %vm1635_vm2, %v9278_v33 }
 0x23c   :  { %7150 = vmatprep.mubr.msk.f32.mxu1 %vm1635_vm2, %v9280_v38  ;;  %v9290_v17 = vmax.f32 %v1562_v56, 0.0 }
 0x23d   :  { %v9288_v0 = vmax.f32 %v1561_v30, 0.0  ;;  %v7063_v14 = vpop.f32.mrb[56].mxu0 }
 0x23e   :  { %10553 = vst [vmem:[#allocation8_spill] sm:$0xff] %v9290_v17  ;;  %v1564_v11 = vadd.f32 %v7063_v14, %v9009_v7  ;;  %v1410_v24 = vpop.f32.mrb[57].mxu0 }
 0x23f   :  { %v1563_v57 = vadd.f32 %v9009_v7, %v1410_v24  ;;  %7151 = vmatmul.mubr.msk.f32.gmra.mrb[54].mxu1 %vm1635_vm2, %v9288_v0 }
 0x240   :  { %7153 = vmatprep.mubr.msk.f32.mxu1 %vm1635_vm2, %v9290_v17  ;;  %v9300_v38 = vmax.f32 %v1564_v11, 0.0 }
 0x241   :  { %v9298_v51 = vmax.f32 %v1563_v57, 0.0  ;;  %v7066_v45 = vpop.f32.mrb[58].mxu0 }
 0x242   :  { %10554 = vst [vmem:[#allocation9_spill] sm:$0xff] %v9300_v38  ;;  %v1566_v30 = vadd.f32 %v7066_v45, %v9009_v7  ;;  %v1420_v56 = vpop.f32.mrb[59].mxu0 }
 0x243   :  { %v1565_v33 = vadd.f32 %v9009_v7, %v1420_v56  ;;  %7154 = vmatmul.mubr.msk.f32.gmra.mrb[56].mxu1 %vm1635_vm2, %v9298_v51  ;;  %v1507_v56 = vadd.f32 %v9009_v7, %v9014_v10  ;;  %v10558_v10 = vld [vmem:[#allocation4_spill] sm:$0xff] }
 0x244   :  { %7156 = vmatprep.mubr.msk.f32.mxu1 %vm1635_vm2, %v9300_v38  ;;  %v9310_v17 = vmax.f32 %v1566_v30, 0.0 }
 0x245   :  { %v9308_v14 = vmax.f32 %v1565_v33, 0.0  ;;  %v7069_v24 = vpop.f32.mrb[60].mxu0  ;;  %v1569_v38 = vmax.f32 %v1507_v56, 0.0 }
 0x246   :  { %v9313_v57 = vadd.f32 %v7069_v24, %v9002_v5  ;;  %v1430_v11 = vpop.f32.mrb[61].mxu0  ;;  %v10555_v5 = vmax.f32 %v9012_v9, 0.0  ;;  %v10557_v9 = vld [vmem:[#allocation3_spill] sm:$0xff] }
 0x247   :  { %v7865_v45 = vadd.f32 %v1430_v11, %v9004_v6  ;;  %7157 = vmatmul.mubr.msk.f32.gmra.mrb[58].mxu1 %vm1635_vm2, %v9308_v14  ;;  %v10556_v6 = vld [vmem:[#allocation2_spill] sm:$0xff]  ;;  %v10561_v24 = vld [vmem:[#allocation7_spill] sm:$0xff]  ;;  %v10562_v11 = vld [vmem:[#allocation8_spill] sm:$0xff] }
 0x248   :  { %7159 = vmatprep.mubr.msk.f32.mxu1 %vm1635_vm2, %v9310_v17 }
 0x249   :  { %v9323_v33 = vadd.f32 %v7865_v45, %v9009_v7  ;;  %v3134_v45 = vld [vmem:[%s10520_s5 + $0x8] sm:$0xff]  ;;  %v10563_v56 = vld [vmem:[#allocation9_spill] sm:$0xff] }
 0x24b   :  { %v1629_v30 = vmax.f32 %v9323_v33, 0.0 }
 0x24d   :  { %7160 = vmatmul.mubr.msk.f32.gmra.mrb[60].mxu1 %vm1635_vm2, %v1629_v30 }
 0x24e   :  { %7164 = vmatprep.mubr.msk.f32.mxu1 %vm1635_vm2, %v1569_v38  ;;  %v10560_v38 = vld [vmem:[#allocation6_spill] sm:$0xff] }
 0x251   :  { %7165 = vmatmul.mubr.msk.f32.vlgmr.msra.gmra.mrb[2].mxu1 %vm1635_vm2, %v10555_v5 }
 0x252   :  { %7167 = vmatprep.mubr.msk.f32.mxu1 %vm1635_vm2, %v9022_v16  ;;  %7255 = vmatpush3.msra.mxu1 %v9030_v21  ;;  %v10559_v21 = vld [vmem:[#allocation5_spill] sm:$0xff] }
 0x253   :  { %7346 = vmatprep.subr.mxu1 %v3134_v45 }
 0x255   :  { %7168 = vmatmul.mubr.msk.f32.gmra.mrb[4].mxu1 %vm1635_vm2, %v9024_v18 }
 0x256   :  { %7170 = vmatprep.mubr.msk.f32.mxu1 %vm1635_vm2, %v9037_v23 }
 0x259   :  { %7171 = vmatmul.mubr.msk.f32.gmra.mrb[6].mxu1 %vm1635_vm2, %v9040_v25 }
 0x25a   :  { %7173 = vmatprep.mubr.msk.f32.mxu1 %vm1635_vm2, %v9048_v29 }
 0x25d   :  { %7174 = vmatmul.mubr.msk.f32.gmra.mrb[8].mxu1 %vm1635_vm2, %v9050_v31 }
 0x25e   :  { %7176 = vmatprep.mubr.msk.f32.mxu1 %vm1635_vm2, %v9058_v35 }
 0x261   :  { %7177 = vmatmul.mubr.msk.f32.gmra.mrb[10].mxu1 %vm1635_vm2, %v9060_v37 }
 0x262   :  { %7179 = vmatprep.mubr.msk.f32.mxu1 %vm1635_vm2, %v9068_v41 }
 0x265   :  { %7180 = vmatmul.mubr.msk.f32.gmra.mrb[12].mxu1 %vm1635_vm2, %v9070_v43 }
 0x266   :  { %7182 = vmatprep.mubr.msk.f32.mxu1 %vm1635_vm2, %v9078_v47 }
 0x269   :  { %7183 = vmatmul.mubr.msk.f32.gmra.mrb[14].mxu1 %vm1635_vm2, %v9080_v49 }
 0x26a   :  { %7185 = vmatprep.mubr.msk.f32.mxu1 %vm1635_vm2, %v9088_v53 }
 0x26d   :  { %7186 = vmatmul.mubr.msk.f32.gmra.mrb[16].mxu1 %vm1635_vm2, %v9090_v55 }
 0x26e   :  { %7188 = vmatprep.mubr.msk.f32.mxu1 %vm1635_vm2, %v9098_v59 }
 0x271   :  { %7189 = vmatmul.mubr.msk.f32.gmra.mrb[18].mxu1 %vm1635_vm2, %v9100_v61 }
 0x272   :  { %7191 = vmatprep.mubr.msk.f32.mxu1 %vm1635_vm2, %v9108_v1 }
 0x275   :  { %7192 = vmatmul.mubr.msk.f32.gmra.mrb[20].mxu1 %vm1635_vm2, %v9110_v3 }
 0x276   :  { %7194 = vmatprep.mubr.msk.f32.mxu1 %vm1635_vm2, %v9118_v13 }
 0x279   :  { %7195 = vmatmul.mubr.msk.f32.gmra.mrb[22].mxu1 %vm1635_vm2, %v9120_v15 }
 0x27a   :  { %7197 = vmatprep.mubr.msk.f32.mxu1 %vm1635_vm2, %v9128_v22 }
 0x27d   :  { %7198 = vmatmul.mubr.msk.f32.gmra.mrb[24].mxu1 %vm1635_vm2, %v9130_v26 }
 0x27e   :  { %7200 = vmatprep.mubr.msk.f32.mxu1 %vm1635_vm2, %v9138_v32 }
 0x281   :  { %7201 = vmatmul.mubr.msk.f32.gmra.mrb[26].mxu1 %vm1635_vm2, %v9140_v34 }
 0x282   :  { %7203 = vmatprep.mubr.msk.f32.mxu1 %vm1635_vm2, %v9148_v40 }
 0x285   :  { %7204 = vmatmul.mubr.msk.f32.gmra.mrb[28].mxu1 %vm1635_vm2, %v9150_v44 }
 0x286   :  { %7206 = vmatprep.mubr.msk.f32.mxu1 %vm1635_vm2, %v9158_v50 }
 0x289   :  { %7207 = vmatmul.mubr.msk.f32.gmra.mrb[30].mxu1 %vm1635_vm2, %v9160_v52 }
 0x28a   :  { %7209 = vmatprep.mubr.msk.f32.mxu1 %vm1635_vm2, %v9168_v58 }
 0x28d   :  { %7210 = vmatmul.mubr.msk.f32.gmra.mrb[32].mxu1 %vm1635_vm2, %v9170_v62 }
 0x28e   :  { %7212 = vmatprep.mubr.msk.f32.mxu1 %vm1635_vm2, %v9178_v4 }
 0x291   :  { %7213 = vmatmul.mubr.msk.f32.gmra.mrb[34].mxu1 %vm1635_vm2, %v9180_v12 }
 0x292   :  { %7215 = vmatprep.mubr.msk.f32.mxu1 %vm1635_vm2, %v9188_v20 }
 0x295   :  { %7216 = vmatmul.mubr.msk.f32.gmra.mrb[36].mxu1 %vm1635_vm2, %v9190_v27 }
 0x296   :  { %7218 = vmatprep.mubr.msk.f32.mxu1 %vm1635_vm2, %v9198_v36 }
 0x299   :  { %7219 = vmatmul.mubr.msk.f32.gmra.mrb[38].mxu1 %vm1635_vm2, %v9200_v39 }
 0x29a   :  { %7221 = vmatprep.mubr.msk.f32.mxu1 %vm1635_vm2, %v9208_v48 }
 0x29d   :  { %7222 = vmatmul.mubr.msk.f32.gmra.mrb[40].mxu1 %vm1635_vm2, %v9210_v54 }
 0x29e   :  { %7224 = vmatprep.mubr.msk.f32.mxu1 %vm1635_vm2, %v9218_v63 }
 0x2a1   :  { %7225 = vmatmul.mubr.msk.f32.gmra.mrb[42].mxu1 %vm1635_vm2, %v9220_v2 }
 0x2a2   :  { %7227 = vmatprep.mubr.msk.f32.mxu1 %vm1635_vm2, %v9228_v19 }
 0x2a5   :  { %7228 = vmatmul.mubr.msk.f32.gmra.mrb[44].mxu1 %vm1635_vm2, %v9230_v28 }
 0x2a6   :  { %7230 = vmatprep.mubr.msk.f32.mxu1 %vm1635_vm2, %v9238_v42 }
 0x2a9   :  { %7231 = vmatmul.mubr.msk.f32.gmra.mrb[46].mxu1 %vm1635_vm2, %v9240_v46 }
 0x2aa   :  { %7233 = vmatprep.mubr.msk.f32.mxu1 %vm1635_vm2, %v9248_v60 }
 0x2ad   :  { %7234 = vmatmul.mubr.msk.f32.gmra.mrb[48].mxu1 %vm1635_vm2, %v9250_v8 }
 0x2ae   :  { %7236 = vmatprep.mubr.msk.f32.mxu1 %vm1635_vm2, %v10556_v6 }
 0x2b1   :  { %7237 = vmatmul.mubr.msk.f32.gmra.mrb[50].mxu1 %vm1635_vm2, %v10557_v9 }
 0x2b2   :  { %7239 = vmatprep.mubr.msk.f32.mxu1 %vm1635_vm2, %v10558_v10 }
 0x2b5   :  { %7240 = vmatmul.mubr.msk.f32.gmra.mrb[52].mxu1 %vm1635_vm2, %v10559_v21 }
 0x2b6   :  { %7242 = vmatprep.mubr.msk.f32.mxu1 %vm1635_vm2, %v10560_v38 }
 0x2b9   :  { %7243 = vmatmul.mubr.msk.f32.gmra.mrb[54].mxu1 %vm1635_vm2, %v10561_v24 }
 0x2ba   :  { %7245 = vmatprep.mubr.msk.f32.mxu1 %vm1635_vm2, %v9288_v0 }
 0x2bd   :  { %7246 = vmatmul.mubr.msk.f32.gmra.mrb[56].mxu1 %vm1635_vm2, %v10562_v11 }
 0x2be   :  { %7248 = vmatprep.mubr.msk.f32.mxu1 %vm1635_vm2, %v9298_v51 }
 0x2c1   :  { %7249 = vmatmul.mubr.msk.f32.gmra.mrb[58].mxu1 %vm1635_vm2, %v10563_v56 }
 0x2c2   :  { %7251 = vmatprep.mubr.msk.f32.mxu1 %vm1635_vm2, %v9308_v14 }
 0x2c5   :  { %7252 = vmatmul.mubr.msk.f32.gmra.mrb[60].mxu1 %vm1635_vm2, %v9310_v17 }
 0x2c6   :  { %7256 = vmatprep.mubr.msk.f32.mxu1 %vm1635_vm2, %v9022_v16  ;;  %v1568_v16 = vadd.f32 %v9313_v57, %v9009_v7 }
 0x2c9   :  { %7257 = vmatmul.mubr.msk.f32.vlgmr.msra.gmra.mrb[2].mxu1 %vm1635_vm2, %v9024_v18  ;;  %v1630_v18 = vmax.f32 %v1568_v16, 0.0 }
 0x2ca   :  { %7259 = vmatprep.mubr.msk.f32.mxu1 %vm1635_vm2, %v9037_v23  ;;  %7347 = vmatpush3.msra.mxu1 %v3134_v45  ;;  %v3133_v23 = vld [vmem:[%s10520_s5] sm:$0xff] }
 0x2cb   :  { %7390 = vmatprep.subr.mxu1 %v3133_v23 }
 0x2cd   :  { %7260 = vmatmul.mubr.msk.f32.gmra.mrb[4].mxu1 %vm1635_vm2, %v9040_v25  ;;  %v9581_v25 = vld [vmem:[%s10521_s4] ss:$0 sm:$0xff] }
 0x2ce   :  { %7262 = vmatprep.mubr.msk.f32.mxu1 %vm1635_vm2, %v9048_v29 }
 0x2d1   :  { %7263 = vmatmul.mubr.msk.f32.gmra.mrb[6].mxu1 %vm1635_vm2, %v9050_v31 }
 0x2d2   :  { %7265 = vmatprep.mubr.msk.f32.mxu1 %vm1635_vm2, %v9058_v35 }
 0x2d5   :  { %7266 = vmatmul.mubr.msk.f32.gmra.mrb[8].mxu1 %vm1635_vm2, %v9060_v37 }
 0x2d6   :  { %7268 = vmatprep.mubr.msk.f32.mxu1 %vm1635_vm2, %v9068_v41 }
 0x2d9   :  { %7269 = vmatmul.mubr.msk.f32.gmra.mrb[10].mxu1 %vm1635_vm2, %v9070_v43 }
 0x2da   :  { %7271 = vmatprep.mubr.msk.f32.mxu1 %vm1635_vm2, %v9078_v47 }
 0x2dd   :  { %7272 = vmatmul.mubr.msk.f32.gmra.mrb[12].mxu1 %vm1635_vm2, %v9080_v49 }
 0x2de   :  { %7274 = vmatprep.mubr.msk.f32.mxu1 %vm1635_vm2, %v9088_v53 }
 0x2e1   :  { %7275 = vmatmul.mubr.msk.f32.gmra.mrb[14].mxu1 %vm1635_vm2, %v9090_v55 }
 0x2e2   :  { %7277 = vmatprep.mubr.msk.f32.mxu1 %vm1635_vm2, %v9098_v59 }
 0x2e5   :  { %7278 = vmatmul.mubr.msk.f32.gmra.mrb[16].mxu1 %vm1635_vm2, %v9100_v61 }
 0x2e6   :  { %7280 = vmatprep.mubr.msk.f32.mxu1 %vm1635_vm2, %v9108_v1 }
 0x2e9   :  { %7281 = vmatmul.mubr.msk.f32.gmra.mrb[18].mxu1 %vm1635_vm2, %v9110_v3 }
 0x2ea   :  { %7283 = vmatprep.mubr.msk.f32.mxu1 %vm1635_vm2, %v9118_v13 }
 0x2ed   :  { %7284 = vmatmul.mubr.msk.f32.gmra.mrb[20].mxu1 %vm1635_vm2, %v9120_v15 }
 0x2ee   :  { %7286 = vmatprep.mubr.msk.f32.mxu1 %vm1635_vm2, %v9128_v22 }
 0x2f1   :  { %7287 = vmatmul.mubr.msk.f32.gmra.mrb[22].mxu1 %vm1635_vm2, %v9130_v26 }
 0x2f2   :  { %7289 = vmatprep.mubr.msk.f32.mxu1 %vm1635_vm2, %v9138_v32 }
 0x2f5   :  { %7290 = vmatmul.mubr.msk.f32.gmra.mrb[24].mxu1 %vm1635_vm2, %v9140_v34 }
 0x2f6   :  { %7292 = vmatprep.mubr.msk.f32.mxu1 %vm1635_vm2, %v9148_v40 }
 0x2f9   :  { %7293 = vmatmul.mubr.msk.f32.gmra.mrb[26].mxu1 %vm1635_vm2, %v9150_v44 }
 0x2fa   :  { %7295 = vmatprep.mubr.msk.f32.mxu1 %vm1635_vm2, %v9158_v50 }
 0x2fd   :  { %7296 = vmatmul.mubr.msk.f32.gmra.mrb[28].mxu1 %vm1635_vm2, %v9160_v52 }
 0x2fe   :  { %7298 = vmatprep.mubr.msk.f32.mxu1 %vm1635_vm2, %v9168_v58 }
 0x301   :  { %7299 = vmatmul.mubr.msk.f32.gmra.mrb[30].mxu1 %vm1635_vm2, %v9170_v62  ;;  %v9602_v62 = vld [vmem:[%s10520_s5 + $0x10] sm:$0xff] }
 0x302   :  { %7301 = vmatprep.mubr.msk.f32.mxu1 %vm1635_vm2, %v9178_v4 }
 0x305   :  { %7302 = vmatmul.mubr.msk.f32.gmra.mrb[32].mxu1 %vm1635_vm2, %v9180_v12 }
 0x306   :  { %7304 = vmatprep.mubr.msk.f32.mxu1 %vm1635_vm2, %v9188_v20 }
 0x309   :  { %7305 = vmatmul.mubr.msk.f32.gmra.mrb[34].mxu1 %vm1635_vm2, %v9190_v27 }
 0x30a   :  { %7307 = vmatprep.mubr.msk.f32.mxu1 %vm1635_vm2, %v9198_v36 }
 0x30d   :  { %7308 = vmatmul.mubr.msk.f32.gmra.mrb[36].mxu1 %vm1635_vm2, %v9200_v39 }
 0x30e   :  { %7310 = vmatprep.mubr.msk.f32.mxu1 %vm1635_vm2, %v9208_v48 }
 0x311   :  { %7311 = vmatmul.mubr.msk.f32.gmra.mrb[38].mxu1 %vm1635_vm2, %v9210_v54 }
 0x312   :  { %7313 = vmatprep.mubr.msk.f32.mxu1 %vm1635_vm2, %v9218_v63 }
 0x315   :  { %7314 = vmatmul.mubr.msk.f32.gmra.mrb[40].mxu1 %vm1635_vm2, %v9220_v2 }
 0x316   :  { %7316 = vmatprep.mubr.msk.f32.mxu1 %vm1635_vm2, %v9228_v19 }
 0x319   :  { %7317 = vmatmul.mubr.msk.f32.gmra.mrb[42].mxu1 %vm1635_vm2, %v9230_v28 }
 0x31a   :  { %7319 = vmatprep.mubr.msk.f32.mxu1 %vm1635_vm2, %v9238_v42 }
 0x31d   :  { %7320 = vmatmul.mubr.msk.f32.gmra.mrb[44].mxu1 %vm1635_vm2, %v9240_v46 }
 0x31e   :  { %7322 = vmatprep.mubr.msk.f32.mxu1 %vm1635_vm2, %v9248_v60 }
 0x321   :  { %7323 = vmatmul.mubr.msk.f32.gmra.mrb[46].mxu1 %vm1635_vm2, %v9250_v8 }
 0x322   :  { %7325 = vmatprep.mubr.msk.f32.mxu1 %vm1635_vm2, %v10556_v6 }
 0x325   :  { %7326 = vmatmul.mubr.msk.f32.gmra.mrb[48].mxu1 %vm1635_vm2, %v10557_v9 }
 0x326   :  { %7328 = vmatprep.mubr.msk.f32.mxu1 %vm1635_vm2, %v10558_v10 }
 0x329   :  { %7329 = vmatmul.mubr.msk.f32.gmra.mrb[50].mxu1 %vm1635_vm2, %v10559_v21 }
 0x32a   :  { %7331 = vmatprep.mubr.msk.f32.mxu1 %vm1635_vm2, %v10560_v38 }
 0x32d   :  { %7332 = vmatmul.mubr.msk.f32.gmra.mrb[52].mxu1 %vm1635_vm2, %v10561_v24 }
 0x32e   :  { %7334 = vmatprep.mubr.msk.f32.mxu1 %vm1635_vm2, %v9288_v0 }
 0x331   :  { %7335 = vmatmul.mubr.msk.f32.gmra.mrb[54].mxu1 %vm1635_vm2, %v10562_v11 }
 0x332   :  { %7337 = vmatprep.mubr.msk.f32.mxu1 %vm1635_vm2, %v9298_v51 }
 0x335   :  { %7338 = vmatmul.mubr.msk.f32.gmra.mrb[56].mxu1 %vm1635_vm2, %v10563_v56 }
 0x336   :  { %7340 = vmatprep.mubr.msk.f32.mxu1 %vm1635_vm2, %v9308_v14 }
 0x339   :  { %7341 = vmatmul.mubr.msk.f32.gmra.mrb[58].mxu1 %vm1635_vm2, %v9310_v17 }
 0x33a   :  { %7343 = vmatprep.mubr.msk.f32.mxu1 %vm1635_vm2, %v1629_v30 }
 0x33d   :  { %7344 = vmatmul.mubr.msk.f32.gmra.mrb[60].mxu1 %vm1635_vm2, %v1630_v18 }
 0x39c   :  { %v7258_v7 = vpop.f32.mrb[2].mxu1 }
 0x39d   :  { %v2984_v29 = vadd.f32 %v7258_v7, %v9581_v25  ;;  %v2618_v31 = vpop.f32.mrb[3].mxu1 }
 0x39e   :  { %v2983_v35 = vadd.f32 %v9581_v25, %v2618_v31 }
 0x39f   :  { %v3044_v37 = vmax.f32 %v2984_v29, 0.0 }
 0x3a0   :  { %v3043_v41 = vmax.f32 %v2983_v35, 0.0  ;;  %v7261_v43 = vpop.f32.mrb[4].mxu1 }
 0x3a1   :  { %v2986_v47 = vadd.f32 %v7261_v43, %v9581_v25  ;;  %v2628_v49 = vpop.f32.mrb[5].mxu1 }
 0x3a2   :  { %v9586_v53 = vmax.f32 %v3043_v41, %v3044_v37  ;;  %v2985_v55 = vadd.f32 %v9581_v25, %v2628_v49 }
 0x3a3   :  { %v3046_v59 = vmax.f32 %v2986_v47, 0.0 }
 0x3a4   :  { %v3045_v61 = vmax.f32 %v2985_v55, 0.0  ;;  %v7264_v1 = vpop.f32.mrb[6].mxu1 }
 0x3a5   :  { %v2988_v3 = vadd.f32 %v7264_v1, %v9581_v25  ;;  %v2638_v13 = vpop.f32.mrb[7].mxu1 }
 0x3a6   :  { %v9590_v15 = vmax.f32 %v3045_v61, %v3046_v59  ;;  %v2987_v22 = vadd.f32 %v9581_v25, %v2638_v13 }
 0x3a7   :  { %v3048_v26 = vmax.f32 %v2988_v3, 0.0 }
 0x3a8   :  { %v3047_v32 = vmax.f32 %v2987_v22, 0.0  ;;  %v7267_v34 = vpop.f32.mrb[8].mxu1  ;;  %7348 = vmatprep.mubr.msk.f32.mxu1 %vm1635_vm2, %v9590_v15 }
 0x3a9   :  { %v2990_v40 = vadd.f32 %v7267_v34, %v9581_v25  ;;  %v2648_v44 = vpop.f32.mrb[9].mxu1 }
 0x3aa   :  { %v9596_v50 = vmax.f32 %v3047_v32, %v3048_v26  ;;  %v2989_v52 = vadd.f32 %v9581_v25, %v2648_v44 }
 0x3ab   :  { %v3050_v58 = vmax.f32 %v2990_v40, 0.0 }
 0x3ac   :  { %v3049_v4 = vmax.f32 %v2989_v52, 0.0  ;;  %v7270_v12 = vpop.f32.mrb[10].mxu1  ;;  %7349 = vmatmul.mubr.msk.f32.vlgmr.msra.gmra.mrb[62].mxu1 %vm1635_vm2, %v9596_v50 }
 0x3ad   :  { %v2992_v20 = vadd.f32 %v7270_v12, %v9581_v25  ;;  %v2658_v27 = vpop.f32.mrb[11].mxu1  ;;  %7391 = vmatpush3.msra.mxu1 %v3133_v23 }
 0x3ae   :  { %v9607_v36 = vmax.f32 %v3049_v4, %v3050_v58  ;;  %v2991_v39 = vadd.f32 %v9581_v25, %v2658_v27  ;;  %7434 = vmatprep.subr.mxu1 %v9602_v62 }
 0x3af   :  { %v3052_v48 = vmax.f32 %v2992_v20, 0.0 }
 0x3b0   :  { %v3051_v54 = vmax.f32 %v2991_v39, 0.0  ;;  %v7273_v63 = vpop.f32.mrb[12].mxu1  ;;  %7351 = vmatprep.mubr.msk.f32.mxu1 %vm1635_vm2, %v9607_v36 }
 0x3b1   :  { %v2994_v2 = vadd.f32 %v7273_v63, %v9581_v25  ;;  %v2668_v19 = vpop.f32.mrb[13].mxu1 }
 0x3b2   :  { %v9614_v28 = vmax.f32 %v3051_v54, %v3052_v48  ;;  %v2993_v42 = vadd.f32 %v9581_v25, %v2668_v19 }
 0x3b3   :  { %v3054_v46 = vmax.f32 %v2994_v2, 0.0 }
 0x3b4   :  { %v3053_v60 = vmax.f32 %v2993_v42, 0.0  ;;  %v7276_v8 = vpop.f32.mrb[14].mxu1  ;;  %7352 = vmatmul.mubr.msk.f32.gmra.mrb[64].mxu1 %vm1635_vm2, %v9614_v28 }
 0x3b5   :  { %v2996_v17 = vadd.f32 %v7276_v8, %v9581_v25  ;;  %v2678_v0 = vpop.f32.mrb[15].mxu1 }
 0x3b6   :  { %v9620_v51 = vmax.f32 %v3053_v60, %v3054_v46  ;;  %v2995_v14 = vadd.f32 %v9581_v25, %v2678_v0 }
 0x3b7   :  { %v3056_v57 = vmax.f32 %v2996_v17, 0.0 }
 0x3b8   :  { %v3055_v33 = vmax.f32 %v2995_v14, 0.0  ;;  %v7279_v30 = vpop.f32.mrb[16].mxu1  ;;  %7354 = vmatprep.mubr.msk.f32.mxu1 %vm1635_vm2, %v9620_v51 }
 0x3b9   :  { %v2998_v5 = vadd.f32 %v7279_v30, %v9581_v25  ;;  %v2688_v6 = vpop.f32.mrb[17].mxu1 }
 0x3ba   :  { %v9626_v9 = vmax.f32 %v3055_v33, %v3056_v57  ;;  %v2997_v10 = vadd.f32 %v9581_v25, %v2688_v6 }
 0x3bb   :  { %v3058_v21 = vmax.f32 %v2998_v5, 0.0 }
 0x3bc   :  { %v3057_v38 = vmax.f32 %v2997_v10, 0.0  ;;  %v7282_v24 = vpop.f32.mrb[18].mxu1  ;;  %7355 = vmatmul.mubr.msk.f32.gmra.mrb[66].mxu1 %vm1635_vm2, %v9626_v9 }
 0x3bd   :  { %v3000_v11 = vadd.f32 %v7282_v24, %v9581_v25  ;;  %v2698_v45 = vpop.f32.mrb[19].mxu1 }
 0x3be   :  { %v9632_v56 = vmax.f32 %v3057_v38, %v3058_v21  ;;  %v2999_v16 = vadd.f32 %v9581_v25, %v2698_v45 }
 0x3bf   :  { %v3060_v18 = vmax.f32 %v3000_v11, 0.0 }
 0x3c0   :  { %v3059_v23 = vmax.f32 %v2999_v16, 0.0  ;;  %v7285_v7 = vpop.f32.mrb[20].mxu1  ;;  %7357 = vmatprep.mubr.msk.f32.mxu1 %vm1635_vm2, %v9632_v56 }
 0x3c1   :  { %v3002_v29 = vadd.f32 %v7285_v7, %v9581_v25  ;;  %v2708_v31 = vpop.f32.mrb[21].mxu1 }
 0x3c2   :  { %v9638_v35 = vmax.f32 %v3059_v23, %v3060_v18  ;;  %v3001_v37 = vadd.f32 %v9581_v25, %v2708_v31 }
 0x3c3   :  { %v3062_v41 = vmax.f32 %v3002_v29, 0.0 }
 0x3c4   :  { %v3061_v43 = vmax.f32 %v3001_v37, 0.0  ;;  %v7288_v47 = vpop.f32.mrb[22].mxu1  ;;  %7358 = vmatmul.mubr.msk.f32.gmra.mrb[68].mxu1 %vm1635_vm2, %v9638_v35 }
 0x3c5   :  { %v3004_v49 = vadd.f32 %v7288_v47, %v9581_v25  ;;  %v2718_v55 = vpop.f32.mrb[23].mxu1 }
 0x3c6   :  { %v9644_v59 = vmax.f32 %v3061_v43, %v3062_v41  ;;  %v3003_v61 = vadd.f32 %v9581_v25, %v2718_v55 }
 0x3c7   :  { %v3064_v1 = vmax.f32 %v3004_v49, 0.0 }
 0x3c8   :  { %v3063_v3 = vmax.f32 %v3003_v61, 0.0  ;;  %v7291_v13 = vpop.f32.mrb[24].mxu1  ;;  %7360 = vmatprep.mubr.msk.f32.mxu1 %vm1635_vm2, %v9644_v59 }
 0x3c9   :  { %v3006_v22 = vadd.f32 %v7291_v13, %v9581_v25  ;;  %v2728_v26 = vpop.f32.mrb[25].mxu1 }
 0x3ca   :  { %v9650_v32 = vmax.f32 %v3063_v3, %v3064_v1  ;;  %v3005_v34 = vadd.f32 %v9581_v25, %v2728_v26 }
 0x3cb   :  { %v3066_v40 = vmax.f32 %v3006_v22, 0.0 }
 0x3cc   :  { %v3065_v44 = vmax.f32 %v3005_v34, 0.0  ;;  %v7294_v52 = vpop.f32.mrb[26].mxu1  ;;  %7361 = vmatmul.mubr.msk.f32.gmra.mrb[70].mxu1 %vm1635_vm2, %v9650_v32 }
 0x3cd   :  { %v3008_v58 = vadd.f32 %v7294_v52, %v9581_v25  ;;  %v2738_v4 = vpop.f32.mrb[27].mxu1 }
 0x3ce   :  { %v9656_v12 = vmax.f32 %v3065_v44, %v3066_v40  ;;  %v3007_v20 = vadd.f32 %v9581_v25, %v2738_v4 }
 0x3cf   :  { %v3068_v27 = vmax.f32 %v3008_v58, 0.0 }
 0x3d0   :  { %v3067_v39 = vmax.f32 %v3007_v20, 0.0  ;;  %v7297_v48 = vpop.f32.mrb[28].mxu1  ;;  %7363 = vmatprep.mubr.msk.f32.mxu1 %vm1635_vm2, %v9656_v12 }
 0x3d1   :  { %v3010_v54 = vadd.f32 %v7297_v48, %v9581_v25  ;;  %v2748_v63 = vpop.f32.mrb[29].mxu1 }
 0x3d2   :  { %v9662_v2 = vmax.f32 %v3067_v39, %v3068_v27  ;;  %v3009_v19 = vadd.f32 %v9581_v25, %v2748_v63 }
 0x3d3   :  { %v3070_v42 = vmax.f32 %v3010_v54, 0.0 }
 0x3d4   :  { %v3069_v46 = vmax.f32 %v3009_v19, 0.0  ;;  %v7300_v60 = vpop.f32.mrb[30].mxu1  ;;  %7364 = vmatmul.mubr.msk.f32.gmra.mrb[72].mxu1 %vm1635_vm2, %v9662_v2 }
 0x3d5   :  { %v3012_v8 = vadd.f32 %v7300_v60, %v9581_v25  ;;  %v2758_v17 = vpop.f32.mrb[31].mxu1 }
 0x3d6   :  { %v9668_v0 = vmax.f32 %v3069_v46, %v3070_v42  ;;  %v3011_v14 = vadd.f32 %v9581_v25, %v2758_v17 }
 0x3d7   :  { %v3072_v57 = vmax.f32 %v3012_v8, 0.0 }
 0x3d8   :  { %v3071_v33 = vmax.f32 %v3011_v14, 0.0  ;;  %v7303_v30 = vpop.f32.mrb[32].mxu1  ;;  %7366 = vmatprep.mubr.msk.f32.mxu1 %vm1635_vm2, %v9668_v0 }
 0x3d9   :  { %v3014_v5 = vadd.f32 %v7303_v30, %v9581_v25  ;;  %v2768_v6 = vpop.f32.mrb[33].mxu1 }
 0x3da   :  { %v9674_v10 = vmax.f32 %v3071_v33, %v3072_v57  ;;  %v3013_v21 = vadd.f32 %v9581_v25, %v2768_v6 }
 0x3db   :  { %v3074_v38 = vmax.f32 %v3014_v5, 0.0 }
 0x3dc   :  { %v3073_v24 = vmax.f32 %v3013_v21, 0.0  ;;  %v7306_v11 = vpop.f32.mrb[34].mxu1  ;;  %7367 = vmatmul.mubr.msk.f32.gmra.mrb[74].mxu1 %vm1635_vm2, %v9674_v10 }
 0x3dd   :  { %v3016_v45 = vadd.f32 %v7306_v11, %v9581_v25  ;;  %v2778_v16 = vpop.f32.mrb[35].mxu1 }
 0x3de   :  { %v9680_v18 = vmax.f32 %v3073_v24, %v3074_v38  ;;  %v3015_v23 = vadd.f32 %v9581_v25, %v2778_v16 }
 0x3df   :  { %v3076_v7 = vmax.f32 %v3016_v45, 0.0 }
 0x3e0   :  { %v3075_v29 = vmax.f32 %v3015_v23, 0.0  ;;  %v7309_v31 = vpop.f32.mrb[36].mxu1  ;;  %7369 = vmatprep.mubr.msk.f32.mxu1 %vm1635_vm2, %v9680_v18 }
 0x3e1   :  { %v3018_v37 = vadd.f32 %v7309_v31, %v9581_v25  ;;  %v2788_v41 = vpop.f32.mrb[37].mxu1 }
 0x3e2   :  { %v9686_v43 = vmax.f32 %v3075_v29, %v3076_v7  ;;  %v3017_v47 = vadd.f32 %v9581_v25, %v2788_v41 }
 0x3e3   :  { %v3078_v49 = vmax.f32 %v3018_v37, 0.0 }
 0x3e4   :  { %v3077_v55 = vmax.f32 %v3017_v47, 0.0  ;;  %v7312_v61 = vpop.f32.mrb[38].mxu1  ;;  %7370 = vmatmul.mubr.msk.f32.gmra.mrb[76].mxu1 %vm1635_vm2, %v9686_v43 }
 0x3e5   :  { %v3020_v1 = vadd.f32 %v7312_v61, %v9581_v25  ;;  %v2798_v3 = vpop.f32.mrb[39].mxu1 }
 0x3e6   :  { %v9692_v13 = vmax.f32 %v3077_v55, %v3078_v49  ;;  %v3019_v22 = vadd.f32 %v9581_v25, %v2798_v3 }
 0x3e7   :  { %v3080_v26 = vmax.f32 %v3020_v1, 0.0 }
 0x3e8   :  { %v3079_v34 = vmax.f32 %v3019_v22, 0.0  ;;  %v7315_v40 = vpop.f32.mrb[40].mxu1  ;;  %7372 = vmatprep.mubr.msk.f32.mxu1 %vm1635_vm2, %v9692_v13 }
 0x3e9   :  { %v3022_v44 = vadd.f32 %v7315_v40, %v9581_v25  ;;  %v2808_v52 = vpop.f32.mrb[41].mxu1 }
 0x3ea   :  { %v9698_v58 = vmax.f32 %v3079_v34, %v3080_v26  ;;  %v3021_v4 = vadd.f32 %v9581_v25, %v2808_v52 }
 0x3eb   :  { %v3082_v20 = vmax.f32 %v3022_v44, 0.0 }
 0x3ec   :  { %v3081_v27 = vmax.f32 %v3021_v4, 0.0  ;;  %v7318_v39 = vpop.f32.mrb[42].mxu1  ;;  %7373 = vmatmul.mubr.msk.f32.gmra.mrb[78].mxu1 %vm1635_vm2, %v9698_v58 }
 0x3ed   :  { %v3024_v48 = vadd.f32 %v7318_v39, %v9581_v25  ;;  %v2818_v54 = vpop.f32.mrb[43].mxu1 }
 0x3ee   :  { %v9704_v63 = vmax.f32 %v3081_v27, %v3082_v20  ;;  %v3023_v19 = vadd.f32 %v9581_v25, %v2818_v54  ;;  %v3934_v54 = vld [vmem:[%s10522_s7 + $0x10] sm:$0xff] }
 0x3ef   :  { %v3084_v42 = vmax.f32 %v3024_v48, 0.0 }
 0x3f0   :  { %v3083_v46 = vmax.f32 %v3023_v19, 0.0  ;;  %v7321_v60 = vpop.f32.mrb[44].mxu1  ;;  %7375 = vmatprep.mubr.msk.f32.mxu1 %vm1635_vm2, %v9704_v63  ;;  %v3935_v19 = vld [vmem:[%s10522_s7 + $0x18] sm:$0xff] }
 0x3f1   :  { %v3026_v8 = vadd.f32 %v7321_v60, %v9581_v25  ;;  %v2828_v17 = vpop.f32.mrb[45].mxu1  ;;  %v7823_v60 = vpack.c.bf16 %v3935_v19, %v3934_v54 }
 0x3f2   :  { %v9710_v14 = vmax.f32 %v3083_v46, %v3084_v42  ;;  %v3025_v57 = vadd.f32 %v9581_v25, %v2828_v17 }
 0x3f3   :  { %v3086_v33 = vmax.f32 %v3026_v8, 0.0  ;;  %7824 = vmatprep.subr.bf16.mxu0 %v7823_v60 }
 0x3f4   :  { %v3085_v30 = vmax.f32 %v3025_v57, 0.0  ;;  %v7324_v5 = vpop.f32.mrb[46].mxu1  ;;  %7376 = vmatmul.mubr.msk.f32.gmra.mrb[80].mxu1 %vm1635_vm2, %v9710_v14  ;;  %7826 = vmatpush3.bf16.msra.mxu0 %v7823_v60 }
 0x3f5   :  { %v3028_v6 = vadd.f32 %v7324_v5, %v9581_v25  ;;  %v2838_v21 = vpop.f32.mrb[47].mxu1 }
 0x3f6   :  { %v9716_v38 = vmax.f32 %v3085_v30, %v3086_v33  ;;  %v3027_v24 = vadd.f32 %v9581_v25, %v2838_v21 }
 0x3f7   :  { %v3088_v11 = vmax.f32 %v3028_v6, 0.0 }
 0x3f8   :  { %v3087_v45 = vmax.f32 %v3027_v24, 0.0  ;;  %v7327_v16 = vpop.f32.mrb[48].mxu1  ;;  %7378 = vmatprep.mubr.msk.f32.mxu1 %vm1635_vm2, %v9716_v38 }
 0x3f9   :  { %v3030_v23 = vadd.f32 %v7327_v16, %v9581_v25  ;;  %v2848_v7 = vpop.f32.mrb[49].mxu1 }
 0x3fa   :  { %v9722_v29 = vmax.f32 %v3087_v45, %v3088_v11  ;;  %v3029_v31 = vadd.f32 %v9581_v25, %v2848_v7 }
 0x3fb   :  { %v3090_v37 = vmax.f32 %v3030_v23, 0.0 }
 0x3fc   :  { %v3089_v41 = vmax.f32 %v3029_v31, 0.0  ;;  %v7330_v47 = vpop.f32.mrb[50].mxu1  ;;  %7379 = vmatmul.mubr.msk.f32.gmra.mrb[82].mxu1 %vm1635_vm2, %v9722_v29 }
 0x3fd   :  { %v3032_v49 = vadd.f32 %v7330_v47, %v9581_v25  ;;  %v2858_v55 = vpop.f32.mrb[51].mxu1 }
 0x3fe   :  { %v9728_v61 = vmax.f32 %v3089_v41, %v3090_v37  ;;  %v3031_v1 = vadd.f32 %v9581_v25, %v2858_v55 }
 0x3ff   :  { %v3092_v3 = vmax.f32 %v3032_v49, 0.0 }
 0x400   :  { %v3091_v22 = vmax.f32 %v3031_v1, 0.0  ;;  %v7333_v26 = vpop.f32.mrb[52].mxu1  ;;  %7381 = vmatprep.mubr.msk.f32.mxu1 %vm1635_vm2, %v9728_v61 }
 0x401   :  { %v3034_v34 = vadd.f32 %v7333_v26, %v9581_v25  ;;  %v2868_v40 = vpop.f32.mrb[53].mxu1 }
 0x402   :  { %v9734_v44 = vmax.f32 %v3091_v22, %v3092_v3  ;;  %v3033_v52 = vadd.f32 %v9581_v25, %v2868_v40 }
 0x403   :  { %v3094_v4 = vmax.f32 %v3034_v34, 0.0 }
 0x404   :  { %v3093_v20 = vmax.f32 %v3033_v52, 0.0  ;;  %v7336_v27 = vpop.f32.mrb[54].mxu1  ;;  %7382 = vmatmul.mubr.msk.f32.gmra.mrb[84].mxu1 %vm1635_vm2, %v9734_v44 }
 0x405   :  { %v3036_v39 = vadd.f32 %v7336_v27, %v9581_v25  ;;  %v2878_v48 = vpop.f32.mrb[55].mxu1 }
 0x406   :  { %v9746_v42 = vmax.f32 %v3093_v20, %v3094_v4  ;;  %v3035_v46 = vadd.f32 %v9581_v25, %v2878_v48 }
 0x407   :  { %v3096_v8 = vmax.f32 %v3036_v39, 0.0 }
 0x408   :  { %v3095_v17 = vmax.f32 %v3035_v46, 0.0  ;;  %v7339_v57 = vpop.f32.mrb[56].mxu1  ;;  %7384 = vmatprep.mubr.msk.f32.mxu1 %vm1635_vm2, %v9746_v42 }
 0x409   :  { %v3038_v33 = vadd.f32 %v7339_v57, %v9581_v25  ;;  %v2888_v30 = vpop.f32.mrb[57].mxu1 }
 0x40a   :  { %v9752_v5 = vmax.f32 %v3095_v17, %v3096_v8  ;;  %v3037_v6 = vadd.f32 %v9581_v25, %v2888_v30 }
 0x40b   :  { %v3098_v21 = vmax.f32 %v3038_v33, 0.0 }
 0x40c   :  { %v3097_v24 = vmax.f32 %v3037_v6, 0.0  ;;  %v7342_v11 = vpop.f32.mrb[58].mxu1  ;;  %7385 = vmatmul.mubr.msk.f32.gmra.mrb[86].mxu1 %vm1635_vm2, %v9752_v5 }
 0x40d   :  { %v3040_v45 = vadd.f32 %v7342_v11, %v9581_v25  ;;  %v2898_v16 = vpop.f32.mrb[59].mxu1 }
 0x40e   :  { %v9758_v23 = vmax.f32 %v3097_v24, %v3098_v21  ;;  %v3039_v7 = vadd.f32 %v9581_v25, %v2898_v16 }
 0x40f   :  { %v3100_v31 = vmax.f32 %v3040_v45, 0.0 }
 0x410   :  { %v3099_v37 = vmax.f32 %v3039_v7, 0.0  ;;  %v7345_v41 = vpop.f32.mrb[60].mxu1  ;;  %7387 = vmatprep.mubr.msk.f32.mxu1 %vm1635_vm2, %v9758_v23 }
 0x411   :  { %v3042_v47 = vadd.f32 %v7345_v41, %v9581_v25  ;;  %v2908_v49 = vpop.f32.mrb[61].mxu1 }
 0x412   :  { %v3131_v55 = vmax.f32 %v3099_v37, %v3100_v31  ;;  %v3041_v1 = vadd.f32 %v9581_v25, %v2908_v49  ;;  %v3932_v25 = vld [vmem:[%s10522_s7] sm:$0xff] }
 0x413   :  { %v3102_v3 = vmax.f32 %v3042_v47, 0.0  ;;  %v8219_v47 = vmov 0.0|0.0   ;;  %v4706_v49 = vld [vmem:[%s10524_s9] sm:$0xff] }
 0x414   :  { %v3101_v22 = vmax.f32 %v3041_v1, 0.0  ;;  %7388 = vmatmul.mubr.msk.f32.gmra.mrb[88].mxu1 %vm1635_vm2, %v3131_v55 }
 0x415   :  { %7392 = vmatprep.mubr.msk.f32.mxu1 %vm1635_vm2, %v9586_v53  ;;  %v3933_v53 = vld [vmem:[%s10522_s7 + $0x8] sm:$0xff] }
 0x416   :  { %v3132_v26 = vmax.f32 %v3101_v22, %v3102_v3  ;;  %v4707_v3 = vld [vmem:[%s10524_s9 + $0x8] sm:$0xff] }
 0x418   :  { %7393 = vmatmul.mubr.msk.f32.vlgmr.msra.gmra.mrb[62].mxu1 %vm1635_vm2, %v9590_v15  ;;  %v7827_v15 = vpack.c.bf16 %v3933_v53, %v3932_v25  ;;  %v7839_v53 = vpack.c.bf16 %v4707_v3, %v4706_v49 }
 0x419   :  { %7395 = vmatprep.mubr.msk.f32.mxu1 %vm1635_vm2, %v9596_v50  ;;  %7435 = vmatpush3.msra.mxu1 %v9602_v62 }
 0x41a   :  { %7828 = vmatprep.subr.bf16.mxu0 %v7827_v15  ;;  %7838 = vmatprep.subr.bf16.mxu1 %v8219_v47 }
 0x41c   :  { %7396 = vmatmul.mubr.msk.f32.gmra.mrb[64].mxu1 %vm1635_vm2, %v9607_v36 }
 0x41d   :  { %7398 = vmatprep.mubr.msk.f32.mxu1 %vm1635_vm2, %v9614_v28 }
 0x420   :  { %7399 = vmatmul.mubr.msk.f32.gmra.mrb[66].mxu1 %vm1635_vm2, %v9620_v51 }
 0x421   :  { %7401 = vmatprep.mubr.msk.f32.mxu1 %vm1635_vm2, %v9626_v9 }
 0x424   :  { %7402 = vmatmul.mubr.msk.f32.gmra.mrb[68].mxu1 %vm1635_vm2, %v9632_v56 }
 0x425   :  { %7404 = vmatprep.mubr.msk.f32.mxu1 %vm1635_vm2, %v9638_v35 }
 0x428   :  { %7405 = vmatmul.mubr.msk.f32.gmra.mrb[70].mxu1 %vm1635_vm2, %v9644_v59 }
 0x429   :  { %7407 = vmatprep.mubr.msk.f32.mxu1 %vm1635_vm2, %v9650_v32 }
 0x42c   :  { %7408 = vmatmul.mubr.msk.f32.gmra.mrb[72].mxu1 %vm1635_vm2, %v9656_v12 }
 0x42d   :  { %7410 = vmatprep.mubr.msk.f32.mxu1 %vm1635_vm2, %v9662_v2 }
 0x430   :  { %7411 = vmatmul.mubr.msk.f32.gmra.mrb[74].mxu1 %vm1635_vm2, %v9668_v0 }
 0x431   :  { %7413 = vmatprep.mubr.msk.f32.mxu1 %vm1635_vm2, %v9674_v10 }
 0x434   :  { %7414 = vmatmul.mubr.msk.f32.gmra.mrb[76].mxu1 %vm1635_vm2, %v9680_v18 }
 0x435   :  { %7416 = vmatprep.mubr.msk.f32.mxu1 %vm1635_vm2, %v9686_v43 }
 0x438   :  { %7417 = vmatmul.mubr.msk.f32.gmra.mrb[78].mxu1 %vm1635_vm2, %v9692_v13 }
 0x439   :  { %7419 = vmatprep.mubr.msk.f32.mxu1 %vm1635_vm2, %v9698_v58 }
 0x43c   :  { %7420 = vmatmul.mubr.msk.f32.gmra.mrb[80].mxu1 %vm1635_vm2, %v9704_v63 }
 0x43d   :  { %7422 = vmatprep.mubr.msk.f32.mxu1 %vm1635_vm2, %v9710_v14 }
 0x440   :  { %7423 = vmatmul.mubr.msk.f32.gmra.mrb[82].mxu1 %vm1635_vm2, %v9716_v38 }
 0x441   :  { %7425 = vmatprep.mubr.msk.f32.mxu1 %vm1635_vm2, %v9722_v29 }
 0x444   :  { %7426 = vmatmul.mubr.msk.f32.gmra.mrb[84].mxu1 %vm1635_vm2, %v9728_v61 }
 0x445   :  { %7428 = vmatprep.mubr.msk.f32.mxu1 %vm1635_vm2, %v9734_v44 }
 0x448   :  { %7429 = vmatmul.mubr.msk.f32.gmra.mrb[86].mxu1 %vm1635_vm2, %v9746_v42 }
 0x449   :  { %7431 = vmatprep.mubr.msk.f32.mxu1 %vm1635_vm2, %v9752_v5 }
 0x44c   :  { %7432 = vmatmul.mubr.msk.f32.gmra.mrb[88].mxu1 %vm1635_vm2, %v9758_v23 }
 0x44d   :  { %7436 = vmatprep.mubr.msk.f32.mxu1 %vm1635_vm2, %v9596_v50  ;;  %v9886_v50 = vld [vmem:[%s10523_s6] ss:$0 sm:$0xff] }
 0x450   :  { %7437 = vmatmul.mubr.msk.f32.vlgmr.msra.gmra.mrb[62].mxu1 %vm1635_vm2, %v9607_v36 }
 0x451   :  { %7439 = vmatprep.mubr.msk.f32.mxu1 %vm1635_vm2, %v9614_v28  ;;  %7840 = vmatpush3.bf16.msra.mxu1 %v7839_v53 }
 0x452   :  { %7844 = vmatprep.subr.bf16.mxu1 %v8219_v47 }
 0x454   :  { %7440 = vmatmul.mubr.msk.f32.gmra.mrb[64].mxu1 %vm1635_vm2, %v9620_v51 }
 0x455   :  { %7442 = vmatprep.mubr.msk.f32.mxu1 %vm1635_vm2, %v9626_v9 }
 0x458   :  { %7443 = vmatmul.mubr.msk.f32.gmra.mrb[66].mxu1 %vm1635_vm2, %v9632_v56 }
 0x459   :  { %7445 = vmatprep.mubr.msk.f32.mxu1 %vm1635_vm2, %v9638_v35 }
 0x45c   :  { %7446 = vmatmul.mubr.msk.f32.gmra.mrb[68].mxu1 %vm1635_vm2, %v9644_v59  ;;  %v3936_v59 = vld [vmem:[%s10522_s7 + $0x20] sm:$0xff] }
 0x45d   :  { %7448 = vmatprep.mubr.msk.f32.mxu1 %vm1635_vm2, %v9650_v32  ;;  %v3937_v32 = vld [vmem:[%s10522_s7 + $0x28] sm:$0xff] }
 0x460   :  { %7449 = vmatmul.mubr.msk.f32.gmra.mrb[70].mxu1 %vm1635_vm2, %v9656_v12 }
 0x461   :  { %7451 = vmatprep.mubr.msk.f32.mxu1 %vm1635_vm2, %v9662_v2 }
 0x464   :  { %7452 = vmatmul.mubr.msk.f32.gmra.mrb[72].mxu1 %vm1635_vm2, %v9668_v0 }
 0x465   :  { %7454 = vmatprep.mubr.msk.f32.mxu1 %vm1635_vm2, %v9674_v10  ;;  %v9907_v10 = vpack.c.bf16 %v3937_v32, %v3936_v59 }
 0x468   :  { %7455 = vmatmul.mubr.msk.f32.gmra.mrb[74].mxu1 %vm1635_vm2, %v9680_v18 }
 0x469   :  { %7457 = vmatprep.mubr.msk.f32.mxu1 %vm1635_vm2, %v9686_v43 }
 0x46c   :  { %7458 = vmatmul.mubr.msk.f32.gmra.mrb[76].mxu1 %vm1635_vm2, %v9692_v13 }
 0x46d   :  { %7460 = vmatprep.mubr.msk.f32.mxu1 %vm1635_vm2, %v9698_v58 }
 0x470   :  { %7461 = vmatmul.mubr.msk.f32.gmra.mrb[78].mxu1 %vm1635_vm2, %v9704_v63 }
 0x471   :  { %7463 = vmatprep.mubr.msk.f32.mxu1 %vm1635_vm2, %v9710_v14 }
 0x474   :  { %7464 = vmatmul.mubr.msk.f32.gmra.mrb[80].mxu1 %vm1635_vm2, %v9716_v38 }
 0x475   :  { %7466 = vmatprep.mubr.msk.f32.mxu1 %vm1635_vm2, %v9722_v29 }
 0x478   :  { %7467 = vmatmul.mubr.msk.f32.gmra.mrb[82].mxu1 %vm1635_vm2, %v9728_v61 }
 0x479   :  { %7469 = vmatprep.mubr.msk.f32.mxu1 %vm1635_vm2, %v9734_v44 }
 0x47c   :  { %7470 = vmatmul.mubr.msk.f32.gmra.mrb[84].mxu1 %vm1635_vm2, %v9746_v42 }
 0x47d   :  { %7472 = vmatprep.mubr.msk.f32.mxu1 %vm1635_vm2, %v9752_v5 }
 0x480   :  { %7473 = vmatmul.mubr.msk.f32.gmra.mrb[86].mxu1 %vm1635_vm2, %v9758_v23 }
 0x481   :  { %7475 = vmatprep.mubr.msk.f32.mxu1 %vm1635_vm2, %v3131_v55 }
 0x484   :  { %7476 = vmatmul.mubr.msk.f32.gmra.mrb[88].mxu1 %vm1635_vm2, %v3132_v26 }
 0x523   :  { %v7438_v62 = vpop.f32.mrb[62].mxu1 }
 0x524   :  { %v9889_v36 = vadd.f32 %v7438_v62, %v9886_v50  ;;  %v9891_v28 = vpop.f32.mrb[63].mxu1 }
 0x526   :  { %v3905_v51 = vmax.f32 %v9889_v36, 0.0  ;;  %v4709_v36 = vld [vmem:[%s10524_s9 + $0x18] sm:$0xff] }
 0x527   :  { %v7441_v9 = vpop.f32.mrb[64].mxu1 }
 0x528   :  { %v3879_v56 = vadd.f32 %v7441_v9, %v9886_v50  ;;  %v3713_v35 = vpop.f32.mrb[65].mxu1  ;;  %7482 = vmatprep.mubr.msk.f32.mxu0 %vm3939_vm3, %v3905_v51 }
 0x529   :  { %v3878_v12 = vadd.f32 %v9886_v50, %v3713_v35 }
 0x52a   :  { %v9909_v18 = vmax.f32 %v3879_v56, 0.0 }
 0x52b   :  { %v9905_v2 = vmax.f32 %v3878_v12, 0.0  ;;  %v7444_v0 = vpop.f32.mrb[66].mxu1 }
 0x52c   :  { %v3881_v43 = vadd.f32 %v7444_v0, %v9886_v50  ;;  %v3723_v13 = vpop.f32.mrb[67].mxu1 }
 0x52d   :  { %v3880_v58 = vadd.f32 %v9886_v50, %v3723_v13  ;;  %7483 = vmatmul.mubr.msk.f32.vlgmr.msra.gmra.mrb[62].mxu0 %vm3939_vm3, %v9905_v2 }
 0x52e   :  { %7485 = vmatprep.mubr.msk.f32.mxu0 %vm3939_vm3, %v9909_v18  ;;  %7830 = vmatpush3.bf16.msra.mxu0 %v7827_v15  ;;  %v9920_v38 = vmax.f32 %v3881_v43, 0.0 }
 0x52f   :  { %v9917_v63 = vmax.f32 %v3880_v58, 0.0  ;;  %v7447_v14 = vpop.f32.mrb[68].mxu1  ;;  %7832 = vmatprep.subr.bf16.mxu0 %v9907_v10 }
 0x530   :  { %v3883_v29 = vadd.f32 %v7447_v14, %v9886_v50  ;;  %v3733_v61 = vpop.f32.mrb[69].mxu1 }
 0x531   :  { %v3882_v34 = vadd.f32 %v9886_v50, %v3733_v61  ;;  %7486 = vmatmul.mubr.msk.f32.gmra.mrb[64].mxu0 %vm3939_vm3, %v9917_v63 }
 0x532   :  { %7488 = vmatprep.mubr.msk.f32.mxu0 %vm3939_vm3, %v9920_v38  ;;  %v9930_v52 = vmax.f32 %v3883_v29, 0.0 }
 0x533   :  { %v9928_v40 = vmax.f32 %v3882_v34, 0.0  ;;  %v7450_v44 = vpop.f32.mrb[70].mxu1 }
 0x534   :  { %v3885_v4 = vadd.f32 %v7450_v44, %v9886_v50  ;;  %v3743_v20 = vpop.f32.mrb[71].mxu1 }
 0x535   :  { %v3884_v27 = vadd.f32 %v9886_v50, %v3743_v20  ;;  %7489 = vmatmul.mubr.msk.f32.gmra.mrb[66].mxu0 %vm3939_vm3, %v9928_v40 }
 0x536   :  { %7491 = vmatprep.mubr.msk.f32.mxu0 %vm3939_vm3, %v9930_v52  ;;  %v9940_v54 = vmax.f32 %v3885_v4, 0.0 }
 0x537   :  { %v9938_v39 = vmax.f32 %v3884_v27, 0.0  ;;  %v7453_v48 = vpop.f32.mrb[72].mxu1 }
 0x538   :  { %v3887_v19 = vadd.f32 %v7453_v48, %v9886_v50  ;;  %v3753_v42 = vpop.f32.mrb[73].mxu1 }
 0x539   :  { %v3886_v46 = vadd.f32 %v9886_v50, %v3753_v42  ;;  %7492 = vmatmul.mubr.msk.f32.gmra.mrb[68].mxu0 %vm3939_vm3, %v9938_v39 }
 0x53a   :  { %7494 = vmatprep.mubr.msk.f32.mxu0 %vm3939_vm3, %v9940_v54  ;;  %v9950_v17 = vmax.f32 %v3887_v19, 0.0  ;;  %v3876_v19 = vadd.f32 %v9886_v50, %v9891_v28 }
 0x53b   :  { %v9948_v60 = vmax.f32 %v3886_v46, 0.0  ;;  %v7456_v8 = vpop.f32.mrb[74].mxu1 }
 0x53c   :  { %v3889_v57 = vadd.f32 %v7456_v8, %v9886_v50  ;;  %v3763_v33 = vpop.f32.mrb[75].mxu1 }
 0x53d   :  { %v3888_v30 = vadd.f32 %v9886_v50, %v3763_v33  ;;  %7495 = vmatmul.mubr.msk.f32.gmra.mrb[70].mxu0 %vm3939_vm3, %v9948_v60 }
 0x53e   :  { %7497 = vmatprep.mubr.msk.f32.mxu0 %vm3939_vm3, %v9950_v17  ;;  %v9960_v21 = vmax.f32 %v3889_v57, 0.0 }
 0x53f   :  { %v9958_v5 = vmax.f32 %v3888_v30, 0.0  ;;  %v7459_v6 = vpop.f32.mrb[76].mxu1  ;;  %v3904_v30 = vmax.f32 %v3876_v19, 0.0 }
 0x540   :  { %v3891_v24 = vadd.f32 %v7459_v6, %v9886_v50  ;;  %v3773_v11 = vpop.f32.mrb[77].mxu1 }
 0x541   :  { %v3890_v45 = vadd.f32 %v9886_v50, %v3773_v11  ;;  %7498 = vmatmul.mubr.msk.f32.gmra.mrb[72].mxu0 %vm3939_vm3, %v9958_v5 }
 0x542   :  { %7500 = vmatprep.mubr.msk.f32.mxu0 %vm3939_vm3, %v9960_v21  ;;  %v9970_v7 = vmax.f32 %v3891_v24, 0.0  ;;  %v4711_v24 = vld [vmem:[%s10524_s9 + $0x28] sm:$0xff] }
 0x543   :  { %v9968_v16 = vmax.f32 %v3890_v45, 0.0  ;;  %v7462_v23 = vpop.f32.mrb[78].mxu1 }
 0x544   :  { %v3893_v31 = vadd.f32 %v7462_v23, %v9886_v50  ;;  %v3783_v37 = vpop.f32.mrb[79].mxu1 }
 0x545   :  { %v3892_v41 = vadd.f32 %v9886_v50, %v3783_v37  ;;  %7501 = vmatmul.mubr.msk.f32.gmra.mrb[74].mxu0 %vm3939_vm3, %v9968_v16 }
 0x546   :  { %7503 = vmatprep.mubr.msk.f32.mxu0 %vm3939_vm3, %v9970_v7  ;;  %v9987_v22 = vmax.f32 %v3893_v31, 0.0 }
 0x547   :  { %v9982_v55 = vmax.f32 %v3892_v41, 0.0  ;;  %v7465_v1 = vpop.f32.mrb[80].mxu1 }
 0x548   :  { %v3895_v26 = vadd.f32 %v7465_v1, %v9886_v50  ;;  %v3793_v25 = vpop.f32.mrb[81].mxu1 }
 0x549   :  { %v3894_v15 = vadd.f32 %v9886_v50, %v3793_v25  ;;  %7504 = vmatmul.mubr.msk.f32.gmra.mrb[76].mxu0 %vm3939_vm3, %v9982_v55 }
 0x54a   :  { %7506 = vmatprep.mubr.msk.f32.mxu0 %vm3939_vm3, %v9987_v22  ;;  %v9998_v56 = vmax.f32 %v3895_v26, 0.0 }
 0x54b   :  { %v9995_v62 = vmax.f32 %v3894_v15, 0.0  ;;  %v7468_v9 = vpop.f32.mrb[82].mxu1 }
 0x54c   :  { %v3897_v35 = vadd.f32 %v7468_v9, %v9886_v50  ;;  %v3803_v59 = vpop.f32.mrb[83].mxu1 }
 0x54d   :  { %v3896_v32 = vadd.f32 %v9886_v50, %v3803_v59  ;;  %7507 = vmatmul.mubr.msk.f32.gmra.mrb[78].mxu0 %vm3939_vm3, %v9995_v62 }
 0x54e   :  { %7509 = vmatprep.mubr.msk.f32.mxu0 %vm3939_vm3, %v9998_v56  ;;  %v10008_v43 = vmax.f32 %v3897_v35, 0.0 }
 0x54f   :  { %v10006_v12 = vmax.f32 %v3896_v32, 0.0  ;;  %v7471_v0 = vpop.f32.mrb[84].mxu1 }
 0x550   :  { %v3899_v13 = vadd.f32 %v7471_v0, %v9886_v50  ;;  %v3813_v58 = vpop.f32.mrb[85].mxu1 }
 0x551   :  { %v3898_v14 = vadd.f32 %v9886_v50, %v3813_v58  ;;  %7510 = vmatmul.mubr.msk.f32.gmra.mrb[80].mxu0 %vm3939_vm3, %v10006_v12 }
 0x552   :  { %7512 = vmatprep.mubr.msk.f32.mxu0 %vm3939_vm3, %v10008_v43  ;;  %v10018_v34 = vmax.f32 %v3899_v13, 0.0 }
 0x553   :  { %v10016_v29 = vmax.f32 %v3898_v14, 0.0  ;;  %v7474_v61 = vpop.f32.mrb[86].mxu1 }
 0x554   :  { %v3901_v44 = vadd.f32 %v7474_v61, %v9886_v50  ;;  %v3823_v4 = vpop.f32.mrb[87].mxu1 }
 0x555   :  { %v3900_v20 = vadd.f32 %v9886_v50, %v3823_v4  ;;  %7513 = vmatmul.mubr.msk.f32.gmra.mrb[82].mxu0 %vm3939_vm3, %v10016_v29 }
 0x556   :  { %7515 = vmatprep.mubr.msk.f32.mxu0 %vm3939_vm3, %v10018_v34  ;;  %v10030_v42 = vmax.f32 %v3901_v44, 0.0 }
 0x557   :  { %v10026_v27 = vmax.f32 %v3900_v20, 0.0  ;;  %v7477_v48 = vpop.f32.mrb[88].mxu1 }
 0x558   :  { %v10033_v46 = vadd.f32 %v7477_v48, %v9886_v50  ;;  %v3833_v8 = vpop.f32.mrb[89].mxu1 }
 0x559   :  { %v10036_v57 = vadd.f32 %v9886_v50, %v3833_v8  ;;  %7516 = vmatmul.mubr.msk.f32.gmra.mrb[84].mxu0 %vm3939_vm3, %v10026_v27  ;;  %v4708_v50 = vld [vmem:[%s10524_s9 + $0x10] sm:$0xff] }
 0x55a   :  { %7518 = vmatprep.mubr.msk.f32.mxu0 %vm3939_vm3, %v10030_v42  ;;  %v7836_v28 = vpack.c.bf16 %v4709_v36, %v4708_v50 }
 0x55b   :  { %v3930_v33 = vmax.f32 %v10036_v57, 0.0 }
 0x55d   :  { %7519 = vmatmul.mubr.msk.f32.gmra.mrb[86].mxu0 %vm3939_vm3, %v3930_v33 }
 0x55e   :  { %7525 = vmatprep.mubr.msk.f32.mxu0 %vm3939_vm3, %v3904_v30 }
 0x561   :  { %7526 = vmatmul.mubr.msk.f32.vlgmr.msra.gmra.mrb[62].mxu0 %vm3939_vm3, %v3905_v51  ;;  %v3931_v51 = vmax.f32 %v10033_v46, 0.0 }
 0x562   :  { %7528 = vmatprep.mubr.msk.f32.mxu0 %vm3939_vm3, %v9905_v2  ;;  %7834 = vmatpush3.bf16.msra.mxu0 %v9907_v10  ;;  %v10163_v10 = vld [vmem:[%s10525_s8] ss:$0 sm:$0xff] }
 0x563   :  { %7835 = vmatprep.subr.bf16.mxu0 %v8219_v47 }
 0x565   :  { %7529 = vmatmul.mubr.msk.f32.gmra.mrb[64].mxu0 %vm3939_vm3, %v9909_v18 }
 0x566   :  { %7531 = vmatprep.mubr.msk.f32.mxu0 %vm3939_vm3, %v9917_v63 }
 0x569   :  { %7532 = vmatmul.mubr.msk.f32.gmra.mrb[66].mxu0 %vm3939_vm3, %v9920_v38 }
 0x56a   :  { %7534 = vmatprep.mubr.msk.f32.mxu0 %vm3939_vm3, %v9928_v40 }
 0x56d   :  { %7535 = vmatmul.mubr.msk.f32.gmra.mrb[68].mxu0 %vm3939_vm3, %v9930_v52 }
 0x56e   :  { %7537 = vmatprep.mubr.msk.f32.mxu0 %vm3939_vm3, %v9938_v39 }
 0x571   :  { %7538 = vmatmul.mubr.msk.f32.gmra.mrb[70].mxu0 %vm3939_vm3, %v9940_v54 }
 0x572   :  { %7540 = vmatprep.mubr.msk.f32.mxu0 %vm3939_vm3, %v9948_v60 }
 0x575   :  { %7541 = vmatmul.mubr.msk.f32.gmra.mrb[72].mxu0 %vm3939_vm3, %v9950_v17 }
 0x576   :  { %7543 = vmatprep.mubr.msk.f32.mxu0 %vm3939_vm3, %v9958_v5 }
 0x579   :  { %7544 = vmatmul.mubr.msk.f32.gmra.mrb[74].mxu0 %vm3939_vm3, %v9960_v21 }
 0x57a   :  { %7546 = vmatprep.mubr.msk.f32.mxu0 %vm3939_vm3, %v9968_v16 }
 0x57d   :  { %7547 = vmatmul.mubr.msk.f32.gmra.mrb[76].mxu0 %vm3939_vm3, %v9970_v7 }
 0x57e   :  { %7549 = vmatprep.mubr.msk.f32.mxu0 %vm3939_vm3, %v9982_v55 }
 0x581   :  { %7550 = vmatmul.mubr.msk.f32.gmra.mrb[78].mxu0 %vm3939_vm3, %v9987_v22 }
 0x582   :  { %7552 = vmatprep.mubr.msk.f32.mxu0 %vm3939_vm3, %v9995_v62 }
 0x585   :  { %7553 = vmatmul.mubr.msk.f32.gmra.mrb[80].mxu0 %vm3939_vm3, %v9998_v56 }
 0x586   :  { %7555 = vmatprep.mubr.msk.f32.mxu0 %vm3939_vm3, %v10006_v12 }
 0x589   :  { %7556 = vmatmul.mubr.msk.f32.gmra.mrb[82].mxu0 %vm3939_vm3, %v10008_v43 }
 0x58a   :  { %7558 = vmatprep.mubr.msk.f32.mxu0 %vm3939_vm3, %v10016_v29 }
 0x58d   :  { %7559 = vmatmul.mubr.msk.f32.gmra.mrb[84].mxu0 %vm3939_vm3, %v10018_v34 }
 0x58e   :  { %7561 = vmatprep.mubr.msk.f32.mxu0 %vm3939_vm3, %v10026_v27 }
 0x591   :  { %7562 = vmatmul.mubr.msk.f32.gmra.mrb[86].mxu0 %vm3939_vm3, %v10030_v42 }
 0x592   :  { %7568 = vmatprep.mubr.msk.f32.mxu0 %vm3939_vm3, %v9905_v2  ;;  %v8221_v2 = vmov 0.0  }
 0x593   :  { %7648 = vmatprep.mubr.msk.f32.mxu1 %vm8220_vm4, %v8221_v2 }
 0x595   :  { %7569 = vmatmul.mubr.msk.f32.vlgmr.msra.gmra.mrb[62].mxu0 %vm3939_vm3, %v9909_v18 }
 0x596   :  { %7571 = vmatprep.mubr.msk.f32.mxu0 %vm3939_vm3, %v9917_v63  ;;  %7837 = vmatpush3.bf16.msra.mxu0 %v7836_v28 }
 0x597   :  { %7841 = vmatprep.subr.bf16.mxu0 %v8219_v47 }
 0x599   :  { %7572 = vmatmul.mubr.msk.f32.gmra.mrb[64].mxu0 %vm3939_vm3, %v9920_v38 }
 0x59a   :  { %7574 = vmatprep.mubr.msk.f32.mxu0 %vm3939_vm3, %v9928_v40 }
 0x59d   :  { %7575 = vmatmul.mubr.msk.f32.gmra.mrb[66].mxu0 %vm3939_vm3, %v9930_v52 }
 0x59e   :  { %7577 = vmatprep.mubr.msk.f32.mxu0 %vm3939_vm3, %v9938_v39 }
 0x5a1   :  { %7578 = vmatmul.mubr.msk.f32.gmra.mrb[68].mxu0 %vm3939_vm3, %v9940_v54 }
 0x5a2   :  { %7580 = vmatprep.mubr.msk.f32.mxu0 %vm3939_vm3, %v9948_v60 }
 0x5a5   :  { %7581 = vmatmul.mubr.msk.f32.gmra.mrb[70].mxu0 %vm3939_vm3, %v9950_v17 }
 0x5a6   :  { %7583 = vmatprep.mubr.msk.f32.mxu0 %vm3939_vm3, %v9958_v5 }
 0x5a9   :  { %7584 = vmatmul.mubr.msk.f32.gmra.mrb[72].mxu0 %vm3939_vm3, %v9960_v21  ;;  %v4710_v21 = vld [vmem:[%s10524_s9 + $0x20] sm:$0xff] }
 0x5aa   :  { %7586 = vmatprep.mubr.msk.f32.mxu0 %vm3939_vm3, %v9968_v16  ;;  %v7842_v31 = vpack.c.bf16 %v4711_v24, %v4710_v21 }
 0x5ad   :  { %7587 = vmatmul.mubr.msk.f32.gmra.mrb[74].mxu0 %vm3939_vm3, %v9970_v7 }
 0x5ae   :  { %7589 = vmatprep.mubr.msk.f32.mxu0 %vm3939_vm3, %v9982_v55 }
 0x5b1   :  { %7590 = vmatmul.mubr.msk.f32.gmra.mrb[76].mxu0 %vm3939_vm3, %v9987_v22 }
 0x5b2   :  { %7592 = vmatprep.mubr.msk.f32.mxu0 %vm3939_vm3, %v9995_v62 }
 0x5b5   :  { %7593 = vmatmul.mubr.msk.f32.gmra.mrb[78].mxu0 %vm3939_vm3, %v9998_v56 }
 0x5b6   :  { %7595 = vmatprep.mubr.msk.f32.mxu0 %vm3939_vm3, %v10006_v12 }
 0x5b9   :  { %7596 = vmatmul.mubr.msk.f32.gmra.mrb[80].mxu0 %vm3939_vm3, %v10008_v43 }
 0x5ba   :  { %7598 = vmatprep.mubr.msk.f32.mxu0 %vm3939_vm3, %v10016_v29 }
 0x5bd   :  { %7599 = vmatmul.mubr.msk.f32.gmra.mrb[82].mxu0 %vm3939_vm3, %v10018_v34 }
 0x5be   :  { %7601 = vmatprep.mubr.msk.f32.mxu0 %vm3939_vm3, %v10026_v27 }
 0x5c1   :  { %7602 = vmatmul.mubr.msk.f32.gmra.mrb[84].mxu0 %vm3939_vm3, %v10030_v42 }
 0x5c2   :  { %7604 = vmatprep.mubr.msk.f32.mxu0 %vm3939_vm3, %v3930_v33 }
 0x5c5   :  { %7605 = vmatmul.mubr.msk.f32.gmra.mrb[86].mxu0 %vm3939_vm3, %v3931_v51 }
 0x5c6   :  { %7611 = vmatprep.mubr.msk.f32.mxu0 %vm8220_vm4, %v8221_v2 }
 0x668   :  { %v7570_v18 = vpop.f32.mrb[62].mxu0 }
 0x669   :  { %v4642_v63 = vadd.f32 %v7570_v18, %v10163_v10  ;;  %v4480_v38 = vpop.f32.mrb[63].mxu0 }
 0x66a   :  { %v4641_v40 = vadd.f32 %v10163_v10, %v4480_v38 }
 0x66b   :  { %v4668_v52 = vmax.f32 %v4642_v63, 0.0 }
 0x66c   :  { %v4667_v39 = vmax.f32 %v4641_v40, 0.0  ;;  %v7573_v54 = vpop.f32.mrb[64].mxu0 }
 0x66d   :  { %v4644_v60 = vadd.f32 %v7573_v54, %v10163_v10  ;;  %v4490_v17 = vpop.f32.mrb[65].mxu0 }
 0x66e   :  { %v4693_v5 = vmax.f32 %v4667_v39, %v4668_v52  ;;  %v4643_v6 = vadd.f32 %v10163_v10, %v4490_v17 }
 0x66f   :  { %v4670_v11 = vmax.f32 %v4644_v60, 0.0 }
 0x670   :  { %v4669_v45 = vmax.f32 %v4643_v6, 0.0  ;;  %v7576_v16 = vpop.f32.mrb[66].mxu0  ;;  %7649 = vmatmul.mubr.msk.f32.vlgmr.msra.gmra.mrb[90].mxu1 %vm3939_vm3, %v4693_v5 }
 0x671   :  { %v4646_v23 = vadd.f32 %v7576_v16, %v10163_v10  ;;  %v4500_v7 = vpop.f32.mrb[67].mxu0  ;;  %7651 = vmatprep.mubr.msk.f32.mxu1 %vm8220_vm4, %v8221_v2 }
 0x672   :  { %v4694_v37 = vmax.f32 %v4669_v45, %v4670_v11  ;;  %v4645_v41 = vadd.f32 %v10163_v10, %v4500_v7 }
 0x673   :  { %v4672_v49 = vmax.f32 %v4646_v23, 0.0 }
 0x674   :  { %v4671_v55 = vmax.f32 %v4645_v41, 0.0  ;;  %v7579_v1 = vpop.f32.mrb[68].mxu0  ;;  %7612 = vmatmul.mubr.msk.f32.vlgmr.msra.gmra.mrb[88].mxu0 %vm3939_vm3, %v4694_v37  ;;  %7652 = vmatmul.mubr.msk.f32.gmra.mrb[92].mxu1 %vm3939_vm3, %v4694_v37 }
 0x675   :  { %v4648_v3 = vadd.f32 %v7579_v1, %v10163_v10  ;;  %v4510_v22 = vpop.f32.mrb[69].mxu0  ;;  %7843 = vmatpush3.bf16.msra.mxu0 %v7842_v31  ;;  %7614 = vmatprep.mubr.msk.f32.mxu0 %vm8220_vm4, %v8221_v2 }
 0x676   :  { %v10185_v26 = vmax.f32 %v4671_v55, %v4672_v49  ;;  %v4647_v25 = vadd.f32 %v10163_v10, %v4510_v22  ;;  %7654 = vmatprep.mubr.msk.f32.mxu1 %vm8220_vm4, %v8221_v2  ;;  %7856 = vmatprep.subr.bf16.mxu0 %v8219_v47 }
 0x677   :  { %v4674_v53 = vmax.f32 %v4648_v3, 0.0 }
 0x678   :  { %v4673_v15 = vmax.f32 %v4647_v25, 0.0  ;;  %v7582_v62 = vpop.f32.mrb[70].mxu0  ;;  %7615 = vmatmul.mubr.msk.f32.gmra.mrb[90].mxu0 %vm3939_vm3, %v10185_v26  ;;  %7655 = vmatmul.mubr.msk.f32.gmra.mrb[94].mxu1 %vm3939_vm3, %v10185_v26 }
 0x679   :  { %v4650_v9 = vadd.f32 %v7582_v62, %v10163_v10  ;;  %v4520_v56 = vpop.f32.mrb[71].mxu0  ;;  %7617 = vmatprep.mubr.msk.f32.mxu0 %vm8220_vm4, %v8221_v2  ;;  %7657 = vmatprep.mubr.msk.f32.mxu1 %vm8220_vm4, %v8221_v2 }
 0x67a   :  { %v10200_v35 = vmax.f32 %v4673_v15, %v4674_v53  ;;  %v4649_v59 = vadd.f32 %v10163_v10, %v4520_v56 }
 0x67b   :  { %v4676_v32 = vmax.f32 %v4650_v9, 0.0 }
 0x67c   :  { %v4675_v12 = vmax.f32 %v4649_v59, 0.0  ;;  %v7585_v0 = vpop.f32.mrb[72].mxu0  ;;  %7618 = vmatmul.mubr.msk.f32.gmra.mrb[92].mxu0 %vm3939_vm3, %v10200_v35  ;;  %7658 = vmatmul.mubr.msk.f32.gmra.mrb[96].mxu1 %vm3939_vm3, %v10200_v35 }
 0x67d   :  { %v4652_v43 = vadd.f32 %v7585_v0, %v10163_v10  ;;  %v4530_v13 = vpop.f32.mrb[73].mxu0  ;;  %7620 = vmatprep.mubr.msk.f32.mxu0 %vm8220_vm4, %v8221_v2  ;;  %7660 = vmatprep.mubr.msk.f32.mxu1 %vm8220_vm4, %v8221_v2 }
 0x67e   :  { %v10212_v58 = vmax.f32 %v4675_v12, %v4676_v32  ;;  %v4651_v14 = vadd.f32 %v10163_v10, %v4530_v13  ;;  %v5157_v32 = vld [vmem:[%s10526_s11 + $0x30] sm:$0xff]  ;;  %v5158_v12 = vld [vmem:[%s10526_s11 + $0x38] sm:$0xff]  ;;  %v5160_v13 = vld [vmem:[%s10526_s11 + $0x48] sm:$0xff] }
 0x67f   :  { %v4678_v29 = vmax.f32 %v4652_v43, 0.0  ;;  %v7848_v0 = vpack.c.bf16 %v5158_v12, %v5157_v32  ;;  %v5159_v43 = vld [vmem:[%s10526_s11 + $0x40] sm:$0xff] }
 0x680   :  { %v4677_v61 = vmax.f32 %v4651_v14, 0.0  ;;  %v7588_v34 = vpop.f32.mrb[74].mxu0  ;;  %7621 = vmatmul.mubr.msk.f32.gmra.mrb[94].mxu0 %vm3939_vm3, %v10212_v58  ;;  %7661 = vmatmul.mubr.msk.f32.gmra.mrb[98].mxu1 %vm3939_vm3, %v10212_v58  ;;  %v5161_v14 = vld [vmem:[%s10526_s11 + $0x50] sm:$0xff] }
 0x681   :  { %v4654_v44 = vadd.f32 %v7588_v34, %v10163_v10  ;;  %v4540_v4 = vpop.f32.mrb[75].mxu0  ;;  %7623 = vmatprep.mubr.msk.f32.mxu0 %vm8220_vm4, %v8221_v2  ;;  %7663 = vmatprep.mubr.msk.f32.mxu1 %vm8220_vm4, %v8221_v2 }
 0x682   :  { %v10224_v20 = vmax.f32 %v4677_v61, %v4678_v29  ;;  %v4653_v27 = vadd.f32 %v10163_v10, %v4540_v4  ;;  %v5162_v29 = vld [vmem:[%s10526_s11 + $0x58] sm:$0xff] }
 0x683   :  { %v4680_v48 = vmax.f32 %v4654_v44, 0.0  ;;  %v7860_v61 = vpack.c.bf16 %v5162_v29, %v5161_v14 }
 0x684   :  { %v4679_v19 = vmax.f32 %v4653_v27, 0.0  ;;  %v7591_v42 = vpop.f32.mrb[76].mxu0  ;;  %7624 = vmatmul.mubr.msk.f32.gmra.mrb[96].mxu0 %vm3939_vm3, %v10224_v20  ;;  %7664 = vmatmul.mubr.msk.f32.gmra.mrb[100].mxu1 %vm3939_vm3, %v10224_v20 }
 0x685   :  { %v4656_v46 = vadd.f32 %v7591_v42, %v10163_v10  ;;  %v4550_v8 = vpop.f32.mrb[77].mxu0  ;;  %7626 = vmatprep.mubr.msk.f32.mxu0 %vm8220_vm4, %v8221_v2  ;;  %7666 = vmatprep.mubr.msk.f32.mxu1 %vm8220_vm4, %v8221_v2 }
 0x686   :  { %v10236_v57 = vmax.f32 %v4679_v19, %v4680_v48  ;;  %v4655_v33 = vadd.f32 %v10163_v10, %v4550_v8 }
 0x687   :  { %v4682_v30 = vmax.f32 %v4656_v46, 0.0 }
 0x688   :  { %v4681_v50 = vmax.f32 %v4655_v33, 0.0  ;;  %v7594_v36 = vpop.f32.mrb[78].mxu0  ;;  %7627 = vmatmul.mubr.msk.f32.gmra.mrb[98].mxu0 %vm3939_vm3, %v10236_v57  ;;  %7667 = vmatmul.mubr.msk.f32.gmra.mrb[102].mxu1 %vm3939_vm3, %v10236_v57 }
 0x689   :  { %v4658_v28 = vadd.f32 %v7594_v36, %v10163_v10  ;;  %v4560_v51 = vpop.f32.mrb[79].mxu0  ;;  %7629 = vmatprep.mubr.msk.f32.mxu0 %vm8220_vm4, %v8221_v2  ;;  %7669 = vmatprep.mubr.msk.f32.mxu1 %vm8220_vm4, %v8221_v2 }
 0x68a   :  { %v4700_v18 = vmax.f32 %v4681_v50, %v4682_v30  ;;  %v4657_v63 = vadd.f32 %v10163_v10, %v4560_v51 }
 0x68b   :  { %v4684_v38 = vmax.f32 %v4658_v28, 0.0 }
 0x68c   :  { %v4683_v40 = vmax.f32 %v4657_v63, 0.0  ;;  %v7597_v52 = vpop.f32.mrb[80].mxu0  ;;  %7630 = vmatmul.mubr.msk.f32.gmra.mrb[100].mxu0 %vm3939_vm3, %v4700_v18  ;;  %7670 = vmatmul.mubr.msk.f32.gmra.mrb[104].mxu1 %vm3939_vm3, %v4700_v18 }
 0x68d   :  { %v4660_v39 = vadd.f32 %v7597_v52, %v10163_v10  ;;  %v4570_v54 = vpop.f32.mrb[81].mxu0  ;;  %7632 = vmatprep.mubr.msk.f32.mxu0 %vm8220_vm4, %v8221_v2  ;;  %7672 = vmatprep.mubr.msk.f32.mxu1 %vm8220_vm4, %v8221_v2 }
 0x68e   :  { %v4701_v60 = vmax.f32 %v4683_v40, %v4684_v38  ;;  %v4659_v17 = vadd.f32 %v10163_v10, %v4570_v54 }
 0x68f   :  { %v4686_v5 = vmax.f32 %v4660_v39, 0.0 }
 0x690   :  { %v4685_v6 = vmax.f32 %v4659_v17, 0.0  ;;  %v7600_v21 = vpop.f32.mrb[82].mxu0  ;;  %7633 = vmatmul.mubr.msk.f32.gmra.mrb[102].mxu0 %vm3939_vm3, %v4701_v60  ;;  %7673 = vmatmul.mubr.msk.f32.gmra.mrb[106].mxu1 %vm3939_vm3, %v4701_v60 }
 0x691   :  { %v4662_v24 = vadd.f32 %v7600_v21, %v10163_v10  ;;  %v4580_v11 = vpop.f32.mrb[83].mxu0  ;;  %7635 = vmatprep.mubr.msk.f32.mxu0 %vm8220_vm4, %v8221_v2  ;;  %7675 = vmatprep.mubr.msk.f32.mxu1 %vm8220_vm4, %v8221_v2 }
 0x692   :  { %v4702_v45 = vmax.f32 %v4685_v6, %v4686_v5  ;;  %v4661_v16 = vadd.f32 %v10163_v10, %v4580_v11 }
 0x693   :  { %v4688_v23 = vmax.f32 %v4662_v24, 0.0 }
 0x694   :  { %v4687_v7 = vmax.f32 %v4661_v16, 0.0  ;;  %v7603_v31 = vpop.f32.mrb[84].mxu0  ;;  %7636 = vmatmul.mubr.msk.f32.gmra.mrb[104].mxu0 %vm3939_vm3, %v4702_v45  ;;  %7676 = vmatmul.mubr.msk.f32.gmra.mrb[108].mxu1 %vm3939_vm3, %v4702_v45 }
 0x695   :  { %v4664_v37 = vadd.f32 %v7603_v31, %v10163_v10  ;;  %v4590_v41 = vpop.f32.mrb[85].mxu0  ;;  %7638 = vmatprep.mubr.msk.f32.mxu0 %vm8220_vm4, %v8221_v2  ;;  %7678 = vmatprep.mubr.msk.f32.mxu1 %vm8220_vm4, %v8221_v2 }
 0x696   :  { %v4703_v49 = vmax.f32 %v4687_v7, %v4688_v23  ;;  %v4663_v55 = vadd.f32 %v10163_v10, %v4590_v41 }
 0x697   :  { %v4690_v1 = vmax.f32 %v4664_v37, 0.0 }
 0x698   :  { %v4689_v3 = vmax.f32 %v4663_v55, 0.0  ;;  %v7606_v22 = vpop.f32.mrb[86].mxu0  ;;  %7639 = vmatmul.mubr.msk.f32.gmra.mrb[106].mxu0 %vm3939_vm3, %v4703_v49  ;;  %7679 = vmatmul.mubr.msk.f32.gmra.mrb[110].mxu1 %vm3939_vm3, %v4703_v49 }
 0x699   :  { %v4666_v25 = vadd.f32 %v7606_v22, %v10163_v10  ;;  %v4600_v53 = vpop.f32.mrb[87].mxu0  ;;  %7641 = vmatprep.mubr.msk.f32.mxu0 %vm8220_vm4, %v8221_v2  ;;  %7726 = vmatprep.mubr.msk.f32.mxu1 %vm8220_vm4, %v8221_v2 }
 0x69a   :  { %v4704_v15 = vmax.f32 %v4689_v3, %v4690_v1  ;;  %v4665_v62 = vadd.f32 %v10163_v10, %v4600_v53  ;;  %v5155_v10 = vld [vmem:[%s10526_s11 + $0x20] sm:$0xff] }
 0x69b   :  { %v4692_v9 = vmax.f32 %v4666_v25, 0.0 }
 0x69c   :  { %v4691_v56 = vmax.f32 %v4665_v62, 0.0  ;;  %7642 = vmatmul.mubr.msk.f32.gmra.mrb[108].mxu0 %vm3939_vm3, %v4704_v15 }
 0x69d   :  { %7685 = vmatprep.mubr.msk.f32.mxu0 %vm8220_vm4, %v8221_v2 }
 0x69e   :  { %v4705_v59 = vmax.f32 %v4691_v56, %v4692_v9 }
 0x6a0   :  { %7686 = vmatmul.mubr.msk.f32.vlgmr.msra.gmra.mrb[110].mxu0 %vm3939_vm3, %v10185_v26  ;;  %v5156_v26 = vld [vmem:[%s10526_s11 + $0x28] sm:$0xff] }
 0x6a1   :  { %7688 = vmatprep.mubr.msk.f32.mxu0 %vm8220_vm4, %v8221_v2 }
 0x6a4   :  { %7689 = vmatmul.mubr.msk.f32.gmra.mrb[112].mxu0 %vm3939_vm3, %v10200_v35  ;;  %v7845_v35 = vpack.c.bf16 %v5156_v26, %v5155_v10 }
 0x6a5   :  { %7691 = vmatprep.mubr.msk.f32.mxu0 %vm8220_vm4, %v8221_v2 }
 0x6a6   :  { %7846 = vmatpush3.bf16.msra.mxu1 %v7845_v35 }
 0x6a7   :  { %7847 = vmatprep.subr.bf16.mxu1 %v8219_v47 }
 0x6a8   :  { %7692 = vmatmul.mubr.msk.f32.gmra.mrb[114].mxu0 %vm3939_vm3, %v10212_v58  ;;  %v7857_v58 = vpack.c.bf16 %v5160_v13, %v5159_v43 }
 0x6a9   :  { %7694 = vmatprep.mubr.msk.f32.mxu0 %vm8220_vm4, %v8221_v2 }
 0x6aa   :  { %7849 = vmatpush3.bf16.msra.mxu1 %v7848_v0  ;;  %7858 = vmatpush3.bf16.msra.mxu0 %v7857_v58 }
 0x6ab   :  { %7850 = vmatprep.subr.bf16.mxu1 %v8219_v47  ;;  %7859 = vmatprep.subr.bf16.mxu0 %v8219_v47 }
 0x6ac   :  { %7695 = vmatmul.mubr.msk.f32.gmra.mrb[116].mxu0 %vm3939_vm3, %v10224_v20 }
 0x6ad   :  { %7697 = vmatprep.mubr.msk.f32.mxu0 %vm8220_vm4, %v8221_v2 }
 0x6ae   :  { %7861 = vmatpush3.bf16.msra.mxu0 %v7860_v61  ;;  %v5151_v61 = vld [vmem:[%s10526_s11] sm:$0xff] }
 0x6b0   :  { %7698 = vmatmul.mubr.msk.f32.gmra.mrb[118].mxu0 %vm3939_vm3, %v10236_v57 }
 0x6b1   :  { %7700 = vmatprep.mubr.msk.f32.mxu0 %vm8220_vm4, %v8221_v2 }
 0x6b4   :  { %7701 = vmatmul.mubr.msk.f32.gmra.mrb[120].mxu0 %vm3939_vm3, %v4700_v18 }
 0x6b5   :  { %7703 = vmatprep.mubr.msk.f32.mxu0 %vm8220_vm4, %v8221_v2 }
 0x6b8   :  { %7704 = vmatmul.mubr.msk.f32.gmra.mrb[122].mxu0 %vm3939_vm3, %v4701_v60 }
 0x6b9   :  { %7706 = vmatprep.mubr.msk.f32.mxu0 %vm8220_vm4, %v8221_v2 }
 0x6bc   :  { %7707 = vmatmul.mubr.msk.f32.gmra.mrb[124].mxu0 %vm3939_vm3, %v4702_v45 }
 0x6bd   :  { %7709 = vmatprep.mubr.msk.f32.mxu0 %vm8220_vm4, %v8221_v2 }
 0x6c0   :  { %7710 = vmatmul.mubr.msk.f32.gmra.mrb[126].mxu0 %vm3939_vm3, %v4703_v49 }
 0x6c1   :  { %7712 = vmatprep.mubr.msk.f32.mxu0 %vm8220_vm4, %v8221_v2 }
 0x6c4   :  { %7713 = vmatmul.mubr.msk.f32.gmra.mrb[128].mxu0 %vm3939_vm3, %v4704_v15 }
 0x6c5   :  { %7715 = vmatprep.mubr.msk.f32.mxu0 %vm8220_vm4, %v8221_v2 }
 0x6c8   :  { %7716 = vmatmul.mubr.msk.f32.gmra.mrb[130].mxu0 %vm3939_vm3, %v4705_v59 }
 0x6c9   :  { %7796 = vmatprep.mubr.msk.f32.mxu0 %vm8220_vm4, %v8221_v2 }
 0x743   :  { %v4935_v34 = vpop.f32.mrb[90].mxu1 }
 0x744   :  { %v7650_v44 = vpop.f32.mrb[91].mxu1 }
 0x745   :  { %v10374_v44 = vld [vmem:[%s10527_s10] ss:$0 sm:$0xff] }
 0x747   :  { %v4812_v4 = vpop.f32.mrb[88].mxu0  ;;  %v4940_v20 = vpop.f32.mrb[92].mxu1 }
 0x748   :  { %v4936_v27 = vadd.f32 %v4935_v34, %v4812_v4  ;;  %v7613_v48 = vpop.f32.mrb[89].mxu0  ;;  %v7653_v19 = vpop.f32.mrb[93].mxu1  ;;  %v5152_v34 = vld [vmem:[%s10526_s11 + $0x8] sm:$0xff] }
 0x74b   :  { %v4817_v42 = vpop.f32.mrb[90].mxu0  ;;  %v4945_v46 = vpop.f32.mrb[94].mxu1 }
 0x74c   :  { %v4941_v8 = vadd.f32 %v4940_v20, %v4817_v42  ;;  %v7616_v57 = vpop.f32.mrb[91].mxu0  ;;  %v7656_v33 = vpop.f32.mrb[95].mxu1 }
 0x74f   :  { %v4822_v30 = vpop.f32.mrb[92].mxu0  ;;  %v4950_v50 = vpop.f32.mrb[96].mxu1 }
 0x750   :  { %v4946_v36 = vadd.f32 %v4945_v46, %v4822_v30  ;;  %v7619_v28 = vpop.f32.mrb[93].mxu0  ;;  %v7659_v51 = vpop.f32.mrb[97].mxu1  ;;  %v5153_v46 = vld [vmem:[%s10526_s11 + $0x10] sm:$0xff] }
 0x753   :  { %v4827_v18 = vpop.f32.mrb[94].mxu0  ;;  %v4955_v63 = vpop.f32.mrb[98].mxu1 }
 0x754   :  { %v4951_v38 = vadd.f32 %v4950_v50, %v4827_v18  ;;  %v7622_v40 = vpop.f32.mrb[95].mxu0  ;;  %v7662_v52 = vpop.f32.mrb[99].mxu1 }
 0x757   :  { %v4832_v39 = vpop.f32.mrb[96].mxu0  ;;  %v4960_v54 = vpop.f32.mrb[100].mxu1 }
 0x758   :  { %v10349_v60 = vadd.f32 %v4955_v63, %v4832_v39  ;;  %v7625_v17 = vpop.f32.mrb[97].mxu0  ;;  %v7665_v5 = vpop.f32.mrb[101].mxu1 }
 0x75b   :  { %v4837_v6 = vpop.f32.mrb[98].mxu0  ;;  %v4965_v21 = vpop.f32.mrb[102].mxu1 }
 0x75c   :  { %v10351_v24 = vadd.f32 %v4960_v54, %v4837_v6  ;;  %v7628_v11 = vpop.f32.mrb[99].mxu0  ;;  %v7668_v45 = vpop.f32.mrb[103].mxu1 }
 0x75f   :  { %v4842_v16 = vpop.f32.mrb[100].mxu0  ;;  %v4970_v23 = vpop.f32.mrb[104].mxu1 }
 0x760   :  { %v10353_v7 = vadd.f32 %v4965_v21, %v4842_v16  ;;  %v7631_v31 = vpop.f32.mrb[101].mxu0  ;;  %v7671_v37 = vpop.f32.mrb[105].mxu1 }
 0x763   :  { %v4847_v41 = vpop.f32.mrb[102].mxu0  ;;  %v4975_v49 = vpop.f32.mrb[106].mxu1 }
 0x764   :  { %v10355_v55 = vadd.f32 %v4970_v23, %v4847_v41  ;;  %v7634_v1 = vpop.f32.mrb[103].mxu0  ;;  %v7674_v3 = vpop.f32.mrb[107].mxu1 }
 0x767   :  { %v4852_v22 = vpop.f32.mrb[104].mxu0  ;;  %v4980_v25 = vpop.f32.mrb[108].mxu1 }
 0x768   :  { %v10357_v53 = vadd.f32 %v4975_v49, %v4852_v22  ;;  %v7637_v15 = vpop.f32.mrb[105].mxu0  ;;  %v7677_v62 = vpop.f32.mrb[109].mxu1 }
 0x76b   :  { %v4857_v9 = vpop.f32.mrb[106].mxu0  ;;  %v4985_v56 = vpop.f32.mrb[110].mxu1 }
 0x76c   :  { %v10359_v59 = vadd.f32 %v4980_v25, %v4857_v9  ;;  %v7640_v10 = vpop.f32.mrb[107].mxu0  ;;  %v7680_v26 = vpop.f32.mrb[111].mxu1 }
 0x76f   :  { %v4862_v35 = vpop.f32.mrb[108].mxu0 }
 0x770   :  { %v10361_v32 = vadd.f32 %v4985_v56, %v4862_v35  ;;  %v7643_v12 = vpop.f32.mrb[109].mxu0 }
 0x773   :  { %v5058_v0 = vpop.f32.mrb[110].mxu0 }
 0x774   :  { %v10363_v43 = vadd.f32 %v5058_v0, %v4936_v27  ;;  %v7687_v13 = vpop.f32.mrb[111].mxu0  ;;  %v7851_v27 = vpack.c.bf16 %v5152_v34, %v5151_v61 }
 0x776   :  { %v5129_v9 = vadd.f32 %v10374_v44, %v10363_v43 }
 0x777   :  { %v5063_v58 = vpop.f32.mrb[112].mxu0 }
 0x778   :  { %v5113_v14 = vadd.f32 %v5063_v58, %v4941_v8  ;;  %v7690_v29 = vpop.f32.mrb[113].mxu0  ;;  %v5154_v8 = vld [vmem:[%s10526_s11 + $0x18] sm:$0xff]  ;;  %v5140_v35 = vmax.f32 %v5129_v9, 0.0 }
 0x779   :  { %v7854_v28 = vpack.c.bf16 %v5154_v8, %v5153_v46 }
 0x77a   :  { %v10377_v4 = vadd.f32 %v10374_v44, %v5113_v14 }
 0x77b   :  { %v5068_v20 = vpop.f32.mrb[114].mxu0 }
 0x77c   :  { %v5141_v48 = vmax.f32 %v10377_v4, 0.0  ;;  %v5114_v19 = vadd.f32 %v5068_v20, %v4946_v36  ;;  %v7693_v42 = vpop.f32.mrb[115].mxu0 }
 0x77e   :  { %v5131_v57 = vadd.f32 %v10374_v44, %v5114_v19  ;;  %7727 = vmatmul.mubr.msk.f32.vlgmr.msra.gmra.mrb[112].mxu1 %vm5164_vm5, %v5141_v48 }
 0x77f   :  { %v5073_v33 = vpop.f32.mrb[116].mxu0  ;;  %7852 = vmatpush3.bf16.msra.mxu1 %v7851_v27  ;;  %7729 = vmatprep.mubr.msk.f32.mxu1 %vm8220_vm4, %v8221_v2 }
 0x780   :  { %v10392_v30 = vmax.f32 %v5131_v57, 0.0  ;;  %v5115_v50 = vadd.f32 %v5073_v33, %v4951_v38  ;;  %v7696_v36 = vpop.f32.mrb[117].mxu0  ;;  %7853 = vmatprep.subr.bf16.mxu1 %v8219_v47 }
 0x782   :  { %v5132_v51 = vadd.f32 %v10374_v44, %v5115_v50  ;;  %7730 = vmatmul.mubr.msk.f32.gmra.mrb[114].mxu1 %vm5164_vm5, %v10392_v30  ;;  %7797 = vmatmul.mubr.msk.f32.vlgmr.msra.gmra.mrb[132].mxu0 %vm5164_vm5, %v10392_v30 }
 0x783   :  { %v5078_v18 = vpop.f32.mrb[118].mxu0  ;;  %7732 = vmatprep.mubr.msk.f32.mxu1 %vm8220_vm4, %v8221_v2  ;;  %7799 = vmatprep.mubr.msk.f32.mxu0 %vm8220_vm4, %v8221_v2 }
 0x784   :  { %v10404_v63 = vmax.f32 %v5132_v51, 0.0  ;;  %v5116_v47 = vadd.f32 %v5078_v18, %v10349_v60  ;;  %v7699_v38 = vpop.f32.mrb[119].mxu0  ;;  %7855 = vmatpush3.bf16.msra.mxu1 %v7854_v28 }
 0x786   :  { %v5133_v40 = vadd.f32 %v10374_v44, %v5116_v47  ;;  %7733 = vmatmul.mubr.msk.f32.gmra.mrb[116].mxu1 %vm5164_vm5, %v10404_v63  ;;  %7800 = vmatmul.mubr.msk.f32.gmra.mrb[134].mxu0 %vm5164_vm5, %v10404_v63 }
 0x787   :  { %v5083_v52 = vpop.f32.mrb[120].mxu0  ;;  %7735 = vmatprep.mubr.msk.f32.mxu1 %vm8220_vm4, %v8221_v2  ;;  %7802 = vmatprep.mubr.msk.f32.mxu0 %vm8220_vm4, %v8221_v2 }
 0x788   :  { %v10416_v39 = vmax.f32 %v5133_v40, 0.0  ;;  %v5117_v54 = vadd.f32 %v5083_v52, %v10351_v24  ;;  %v7702_v60 = vpop.f32.mrb[121].mxu0 }
 0x78a   :  { %v5134_v17 = vadd.f32 %v10374_v44, %v5117_v54  ;;  %7736 = vmatmul.mubr.msk.f32.gmra.mrb[118].mxu1 %vm5164_vm5, %v10416_v39  ;;  %7803 = vmatmul.mubr.msk.f32.gmra.mrb[136].mxu0 %vm5164_vm5, %v10416_v39 }
 0x78b   :  { %v5088_v5 = vpop.f32.mrb[122].mxu0  ;;  %7738 = vmatprep.mubr.msk.f32.mxu1 %vm8220_vm4, %v8221_v2  ;;  %7805 = vmatprep.mubr.msk.f32.mxu0 %vm8220_vm4, %v8221_v2 }
 0x78c   :  { %v5145_v6 = vmax.f32 %v5134_v17, 0.0  ;;  %v5118_v21 = vadd.f32 %v5088_v5, %v10353_v7  ;;  %v7705_v24 = vpop.f32.mrb[123].mxu0 }
 0x78e   :  { %v5135_v11 = vadd.f32 %v10374_v44, %v5118_v21  ;;  %7739 = vmatmul.mubr.msk.f32.gmra.mrb[120].mxu1 %vm5164_vm5, %v5145_v6  ;;  %7806 = vmatmul.mubr.msk.f32.gmra.mrb[138].mxu0 %vm5164_vm5, %v5145_v6 }
 0x78f   :  { %v5093_v45 = vpop.f32.mrb[124].mxu0  ;;  %7741 = vmatprep.mubr.msk.f32.mxu1 %vm8220_vm4, %v8221_v2  ;;  %7808 = vmatprep.mubr.msk.f32.mxu0 %vm8220_vm4, %v8221_v2 }
 0x790   :  { %v5146_v16 = vmax.f32 %v5135_v11, 0.0  ;;  %v5119_v23 = vadd.f32 %v5093_v45, %v10355_v55  ;;  %v7708_v31 = vpop.f32.mrb[125].mxu0  ;;  %v6163_v11 = vld [vmem:[%s10528_s12] ss:$0 sm:$0xff] }
 0x792   :  { %v5136_v7 = vadd.f32 %v10374_v44, %v5119_v23  ;;  %7742 = vmatmul.mubr.msk.f32.gmra.mrb[122].mxu1 %vm5164_vm5, %v5146_v16  ;;  %7809 = vmatmul.mubr.msk.f32.gmra.mrb[140].mxu0 %vm5164_vm5, %v5146_v16 }
 0x793   :  { %v5098_v37 = vpop.f32.mrb[126].mxu0  ;;  %7744 = vmatprep.mubr.msk.f32.mxu1 %vm8220_vm4, %v8221_v2  ;;  %7811 = vmatprep.mubr.msk.f32.mxu0 %vm8220_vm4, %v8221_v2 }
 0x794   :  { %v5147_v41 = vmax.f32 %v5136_v7, 0.0  ;;  %v5120_v49 = vadd.f32 %v5098_v37, %v10357_v53  ;;  %v7711_v1 = vpop.f32.mrb[127].mxu0 }
 0x796   :  { %v5137_v55 = vadd.f32 %v10374_v44, %v5120_v49  ;;  %7745 = vmatmul.mubr.msk.f32.gmra.mrb[124].mxu1 %vm5164_vm5, %v5147_v41  ;;  %7812 = vmatmul.mubr.msk.f32.gmra.mrb[142].mxu0 %vm5164_vm5, %v5147_v41 }
 0x797   :  { %v5103_v3 = vpop.f32.mrb[128].mxu0  ;;  %7747 = vmatprep.mubr.msk.f32.mxu1 %vm8220_vm4, %v8221_v2  ;;  %7814 = vmatprep.mubr.msk.f32.mxu0 %vm8220_vm4, %v8221_v2 }
 0x798   :  { %v5148_v22 = vmax.f32 %v5137_v55, 0.0  ;;  %v5121_v25 = vadd.f32 %v5103_v3, %v10359_v59  ;;  %v7714_v15 = vpop.f32.mrb[129].mxu0 }
 0x79a   :  { %v5138_v53 = vadd.f32 %v10374_v44, %v5121_v25  ;;  %7748 = vmatmul.mubr.msk.f32.gmra.mrb[126].mxu1 %vm5164_vm5, %v5148_v22  ;;  %7815 = vmatmul.mubr.msk.f32.gmra.mrb[144].mxu0 %vm5164_vm5, %v5148_v22 }
 0x79b   :  { %v5108_v62 = vpop.f32.mrb[130].mxu0  ;;  %7750 = vmatprep.mubr.msk.f32.mxu1 %vm8220_vm4, %v8221_v2  ;;  %7817 = vmatprep.mubr.msk.f32.mxu0 %vm8220_vm4, %v8221_v2 }
 0x79c   :  { %v5149_v56 = vmax.f32 %v5138_v53, 0.0  ;;  %v5122_v59 = vadd.f32 %v5108_v62, %v10361_v32  ;;  %v7717_v10 = vpop.f32.mrb[131].mxu0 }
 0x79e   :  { %v5139_v26 = vadd.f32 %v10374_v44, %v5122_v59  ;;  %7751 = vmatmul.mubr.msk.f32.gmra.mrb[128].mxu1 %vm5164_vm5, %v5149_v56  ;;  %7818 = vmatmul.mubr.msk.f32.gmra.mrb[146].mxu0 %vm5164_vm5, %v5149_v56 }
 0x79f   :  { %7761 = vmatprep.mubr.msk.f32.mxu1 %vm8220_vm4, %v8221_v2  ;;  %7820 = vmatprep.mubr.msk.f32.mxu0 %vm8220_vm4, %v8221_v2 }
 0x7a0   :  { %v5150_v12 = vmax.f32 %v5139_v26, 0.0 }
 0x7a2   :  { %7762 = vmatmul.mubr.msk.f32.vlgmr.msra.gmra.mrb[130].mxu1 %vm5164_vm5, %v5140_v35  ;;  %7821 = vmatmul.mubr.msk.f32.gmra.mrb[148].mxu0 %vm5164_vm5, %v5150_v12 }
 0x7a3   :  { %7764 = vmatprep.mubr.msk.f32.mxu1 %vm8220_vm4, %v8221_v2 }
 0x7a6   :  { %7765 = vmatmul.mubr.msk.f32.gmra.mrb[132].mxu1 %vm5164_vm5, %v5141_v48 }
 0x7a7   :  { %7767 = vmatprep.mubr.msk.f32.mxu1 %vm8220_vm4, %v8221_v2 }
 0x7aa   :  { %7768 = vmatmul.mubr.msk.f32.gmra.mrb[134].mxu1 %vm5164_vm5, %v10392_v30 }
 0x7ab   :  { %7770 = vmatprep.mubr.msk.f32.mxu1 %vm8220_vm4, %v8221_v2 }
 0x7ae   :  { %7771 = vmatmul.mubr.msk.f32.gmra.mrb[136].mxu1 %vm5164_vm5, %v10404_v63 }
 0x7af   :  { %7773 = vmatprep.mubr.msk.f32.mxu1 %vm8220_vm4, %v8221_v2 }
 0x7b2   :  { %7774 = vmatmul.mubr.msk.f32.gmra.mrb[138].mxu1 %vm5164_vm5, %v10416_v39 }
 0x7b3   :  { %7776 = vmatprep.mubr.msk.f32.mxu1 %vm8220_vm4, %v8221_v2 }
 0x7b6   :  { %7777 = vmatmul.mubr.msk.f32.gmra.mrb[140].mxu1 %vm5164_vm5, %v5145_v6 }
 0x7b7   :  { %7779 = vmatprep.mubr.msk.f32.mxu1 %vm8220_vm4, %v8221_v2 }
 0x7ba   :  { %7780 = vmatmul.mubr.msk.f32.gmra.mrb[142].mxu1 %vm5164_vm5, %v5146_v16 }
 0x7bb   :  { %7782 = vmatprep.mubr.msk.f32.mxu1 %vm8220_vm4, %v8221_v2 }
 0x7be   :  { %7783 = vmatmul.mubr.msk.f32.gmra.mrb[144].mxu1 %vm5164_vm5, %v5147_v41 }
 0x7bf   :  { %7785 = vmatprep.mubr.msk.f32.mxu1 %vm8220_vm4, %v8221_v2 }
 0x7c2   :  { %7786 = vmatmul.mubr.msk.f32.gmra.mrb[146].mxu1 %vm5164_vm5, %v5148_v22 }
 0x851   :  { %v5258_v32 = vpop.f32.mrb[112].mxu1 }
 0x852   :  { %v7728_v0 = vpop.f32.mrb[113].mxu1 }
 0x855   :  { %v5263_v43 = vpop.f32.mrb[114].mxu1  ;;  %v5482_v13 = vpop.f32.mrb[132].mxu0 }
 0x856   :  { %v7731_v58 = vpop.f32.mrb[115].mxu1  ;;  %v7798_v14 = vpop.f32.mrb[133].mxu0 }
 0x859   :  { %v5268_v29 = vpop.f32.mrb[116].mxu1  ;;  %v5487_v61 = vpop.f32.mrb[134].mxu0 }
 0x85a   :  { %v7734_v34 = vpop.f32.mrb[117].mxu1  ;;  %v7801_v44 = vpop.f32.mrb[135].mxu0 }
 0x85d   :  { %v5273_v4 = vpop.f32.mrb[118].mxu1  ;;  %v5492_v20 = vpop.f32.mrb[136].mxu0 }
 0x85e   :  { %v7737_v27 = vpop.f32.mrb[119].mxu1  ;;  %v7804_v48 = vpop.f32.mrb[137].mxu0 }
 0x861   :  { %v5278_v19 = vpop.f32.mrb[120].mxu1  ;;  %v5497_v42 = vpop.f32.mrb[138].mxu0 }
 0x862   :  { %v7740_v46 = vpop.f32.mrb[121].mxu1  ;;  %v7807_v2 = vpop.f32.mrb[139].mxu0 }
 0x865   :  { %v5283_v8 = vpop.f32.mrb[122].mxu1  ;;  %v5502_v57 = vpop.f32.mrb[140].mxu0 }
 0x866   :  { %v7743_v33 = vpop.f32.mrb[123].mxu1  ;;  %v7810_v30 = vpop.f32.mrb[141].mxu0 }
 0x869   :  { %v5288_v50 = vpop.f32.mrb[124].mxu1  ;;  %v5507_v36 = vpop.f32.mrb[142].mxu0 }
 0x86a   :  { %v7746_v28 = vpop.f32.mrb[125].mxu1  ;;  %v7813_v51 = vpop.f32.mrb[143].mxu0 }
 0x86d   :  { %v5293_v18 = vpop.f32.mrb[126].mxu1  ;;  %v5512_v63 = vpop.f32.mrb[144].mxu0 }
 0x86e   :  { %v7749_v47 = vpop.f32.mrb[127].mxu1  ;;  %v7816_v38 = vpop.f32.mrb[145].mxu0 }
 0x871   :  { %v5298_v40 = vpop.f32.mrb[128].mxu1  ;;  %v5517_v52 = vpop.f32.mrb[146].mxu0 }
 0x872   :  { %v7752_v39 = vpop.f32.mrb[129].mxu1  ;;  %v7819_v54 = vpop.f32.mrb[147].mxu0 }
 0x875   :  { %v5370_v60 = vpop.f32.mrb[130].mxu1  ;;  %v5522_v17 = vpop.f32.mrb[148].mxu0 }
 0x876   :  { %v5371_v5 = vadd.f32 %v5370_v60, %v5258_v32  ;;  %v7763_v6 = vpop.f32.mrb[131].mxu1  ;;  %v7822_v21 = vpop.f32.mrb[149].mxu0 }
 0x878   :  { %v5525_v24 = vadd.f32 %v5482_v13, %v5371_v5 }
 0x879   :  { %v5375_v45 = vpop.f32.mrb[132].mxu1 }
 0x87a   :  { %v5376_v16 = vadd.f32 %v5375_v45, %v5263_v43  ;;  %v7766_v23 = vpop.f32.mrb[133].mxu1  ;;  %v5539_v31 = vadd.f32 %v6163_v11, %v5525_v24 }
 0x87c   :  { %v5526_v7 = vadd.f32 %v5487_v61, %v5376_v16  ;;  %v5547_v55 = vmax.f32 %v5539_v31, 0.0 }
 0x87d   :  { %v5380_v37 = vpop.f32.mrb[134].mxu1 }
 0x87e   :  { %v5540_v41 = vadd.f32 %v6163_v11, %v5526_v7  ;;  %v5381_v49 = vadd.f32 %v5380_v37, %v5268_v29  ;;  %v7769_v1 = vpop.f32.mrb[135].mxu1 }
 0x880   :  { %v5548_v3 = vmax.f32 %v5540_v41, 0.0  ;;  %v5527_v22 = vadd.f32 %v5492_v20, %v5381_v49 }
 0x881   :  { %v5385_v25 = vpop.f32.mrb[136].mxu1 }
 0x882   :  { %v5555_v15 = vmax.f32 %v5547_v55, %v5548_v3  ;;  %v5386_v53 = vadd.f32 %v5385_v25, %v5273_v4  ;;  %v7772_v62 = vpop.f32.mrb[137].mxu1  ;;  %v5541_v9 = vadd.f32 %v6163_v11, %v5527_v22 }
 0x884   :  { %5559 = vst [vmem:[%s10529_s13] sm:$0xff] %v5555_v15  ;;  %v5528_v56 = vadd.f32 %v5497_v42, %v5386_v53  ;;  %v5549_v12 = vmax.f32 %v5541_v9, 0.0 }
 0x885   :  { %v5390_v59 = vpop.f32.mrb[138].mxu1 }
 0x886   :  { %v5542_v10 = vadd.f32 %v6163_v11, %v5528_v56  ;;  %v5391_v26 = vadd.f32 %v5390_v59, %v5278_v19  ;;  %v7775_v35 = vpop.f32.mrb[139].mxu1 }
 0x888   :  { %v5550_v32 = vmax.f32 %v5542_v10, 0.0  ;;  %v5529_v0 = vadd.f32 %v5502_v57, %v5391_v26 }
 0x889   :  { %v5395_v43 = vpop.f32.mrb[140].mxu1 }
 0x88a   :  { %v5556_v13 = vmax.f32 %v5549_v12, %v5550_v32  ;;  %v5396_v58 = vadd.f32 %v5395_v43, %v5283_v8  ;;  %v7778_v14 = vpop.f32.mrb[141].mxu1  ;;  %v5543_v29 = vadd.f32 %v6163_v11, %v5529_v0 }
 0x88c   :  { %5560 = vst [vmem:[%s10529_s13 + $0x8] sm:$0xff] %v5556_v13  ;;  %v5530_v61 = vadd.f32 %v5507_v36, %v5396_v58  ;;  %v5551_v27 = vmax.f32 %v5543_v29, 0.0 }
 0x88d   :  { %v5400_v34 = vpop.f32.mrb[142].mxu1 }
 0x88e   :  { %v5544_v44 = vadd.f32 %v6163_v11, %v5530_v61  ;;  %v5401_v4 = vadd.f32 %v5400_v34, %v5288_v50  ;;  %v7781_v20 = vpop.f32.mrb[143].mxu1 }
 0x890   :  { %v5552_v48 = vmax.f32 %v5544_v44, 0.0  ;;  %v5531_v19 = vadd.f32 %v5512_v63, %v5401_v4 }
 0x891   :  { %v5405_v42 = vpop.f32.mrb[144].mxu1 }
 0x892   :  { %v5557_v46 = vmax.f32 %v5551_v27, %v5552_v48  ;;  %v5406_v2 = vadd.f32 %v5405_v42, %v5293_v18  ;;  %v7784_v57 = vpop.f32.mrb[145].mxu1  ;;  %v5545_v8 = vadd.f32 %v6163_v11, %v5531_v19 }
 0x894   :  { %5561 = vst [vmem:[%s10529_s13 + $0x10] sm:$0xff] %v5557_v46  ;;  %v5532_v33 = vadd.f32 %v5517_v52, %v5406_v2  ;;  %v5553_v51 = vmax.f32 %v5545_v8, 0.0 }
 0x895   :  { %v5410_v30 = vpop.f32.mrb[146].mxu1 }
 0x896   :  { %v5546_v28 = vadd.f32 %v6163_v11, %v5532_v33  ;;  %v7787_v36 = vpop.f32.mrb[147].mxu1 }
 0x898   :  { %v5554_v47 = vmax.f32 %v5546_v28, 0.0 }
 0x89a   :  { %v5558_v50 = vmax.f32 %v5553_v51, %v5554_v47 }
 0x89c   :  { %5562 = vst [vmem:[%s10529_s13 + $0x18] sm:$0xff] %v5558_v50 }

</bundles_post_ra>
